<compile_context>
chip_gen: v5e
topology: v5e:2x2
jax: 0.10.0
libtpu: 0.0.40
codegen_flags: <defaults>
</compile_context>

<pallas_src>
import functools

import jax
import jax.numpy as jnp
from jax.experimental import pallas as pl
from jax.experimental.pallas import tpu as pltpu


def _tensorcores_per_chip():
    """Best-effort TensorCores-per-chip detection (v7x has 2, v5e/v6e have 1)."""
    try:
        d = jax.devices()[0]
        nc = getattr(d, "num_cores", None)
        if isinstance(nc, int) and nc >= 1:
            return nc
        kind = str(getattr(d, "device_kind", "")).lower()
        if "v7" in kind or "7x" in kind:
            return 2
    except Exception:
        pass
    return 1


# ----------------------------------------------------------------------------
# One Attention block on in-register f32 tiles (runs inside the kernel).
# ----------------------------------------------------------------------------
def _attention_layer(x, y, wq, wk, wv, wp, vecs, *, bg, m, n, self_attn):
    """x: (bg*m, C) f32, y: (bg*n, C) f32 (== x for self-attn) -> (bg*m, C)."""
    C = x.shape[-1]
    scale = float(C) ** (-0.5)

    bq, bk, bv, bp = vecs[0:1], vecs[1:2], vecs[2:3], vecs[3:4]
    gamma, beta = vecs[4:5], vecs[5:6]

    xb = x.astype(jnp.bfloat16)
    yb = xb if self_attn else y.astype(jnp.bfloat16)

    # Three separate (C, C) matmuls: everything stays lane-0-aligned (no 3C
    # fused output whose 32/64 lane slices would cross vreg tiles at C=32).
    q = (jnp.dot(xb, wq, preferred_element_type=jnp.float32) + bq) * scale
    k = jnp.dot(yb, wk, preferred_element_type=jnp.float32) + bk
    v = jnp.dot(yb, wv, preferred_element_type=jnp.float32) + bv

    # Per-batch scores (bg, m, n): contract channel dims directly (no k.T).
    q3 = q.reshape(bg, m, C).astype(jnp.bfloat16)
    k3 = k.reshape(bg, n, C).astype(jnp.bfloat16)
    v3 = v.reshape(bg, n, C).astype(jnp.bfloat16)
    s = jnp.einsum('bmc,bnc->bmn', q3, k3, preferred_element_type=jnp.float32)

    # numerically-stable softmax; denominator via EUP approx reciprocal.
    s = s - jnp.max(s, axis=-1, keepdims=True)
    p = jnp.exp(s)
    p = p * pl.reciprocal(jnp.sum(p, axis=-1, keepdims=True), approx=True)

    # attention output + output projection (bf16 operands, f32 accumulation).
    h3 = jnp.einsum('bmn,bnc->bmc', p.astype(jnp.bfloat16), v3,
                    preferred_element_type=jnp.float32)
    h = jnp.dot(h3.reshape(bg * m, C).astype(jnp.bfloat16), wp,
                preferred_element_type=jnp.float32) + bp

    # residual + LayerNorm (eps=1e-5, biased variance; matches nn.LayerNorm).
    z = x + h
    mean = jnp.mean(z, axis=-1, keepdims=True)
    zc = z - mean
    var = jnp.mean(zc * zc, axis=-1, keepdims=True)
    return zc * jax.lax.rsqrt(var + 1e-5) * gamma + beta


# ----------------------------------------------------------------------------
# Fused kernel: whole ShapeDenoiser stack for one batch group per grid step.
# ----------------------------------------------------------------------------
def _denoiser_kernel(*refs, n_layers, has_cond, bg, m, n):
    if has_cond:
        x_ref, cond_ref, w_ref, vec_ref, o_ref = refs
    else:
        x_ref, w_ref, vec_ref, o_ref = refs

    C = x_ref.shape[-1]
    x = x_ref[...].reshape(bg * m, C).astype(jnp.float32)   # resident tile
    y = (cond_ref[...].reshape(bg * n, C).astype(jnp.float32)
         if has_cond else x)

    for i in range(n_layers):               # static unroll (n_layers is small)
        self_attn = (i % 2 == 0) or (not has_cond)
        x = _attention_layer(
            x, x if self_attn else y,
            w_ref[i, 0], w_ref[i, 1], w_ref[i, 2], w_ref[i, 3],
            vec_ref[i],
            bg=bg, m=m, n=(m if self_attn else n), self_attn=self_attn)

    o_ref[...] = x.reshape(bg, m, C).astype(o_ref.dtype)


def shape_denoiser(x, cond, params, *, batch_groups=None):
    """[B, M, C] -> [B, M, C]; alternates self-attention and cross-attention."""
    w_all, vec_all = params
    B, M, C = x.shape
    L = w_all.shape[0]
    has_cond = cond is not None
    N = cond.shape[1] if has_cond else M

    if batch_groups is None:
        # v7x (2 TCs): one batch group per TensorCore.  1-TC chips (v5e/v6e):
        # fold the whole batch into a single grid step (no serial grid loop,
        # better MXU sublane fill on the (B*M, C) projections).
        tc = _tensorcores_per_chip()
        batch_groups = tc if (tc > 1 and B % tc == 0 and B >= tc) else 1
    assert B % batch_groups == 0
    bg = B // batch_groups

    kernel = functools.partial(_denoiser_kernel, n_layers=L,
                               has_cond=has_cond, bg=bg, m=M, n=N)

    # Advisory cost model so XLA schedules around this tiny latency-bound call.
    flops = L * B * 2 * (2 * M * C * C + 2 * N * C * C + 2 * M * N * C)
    transcendentals = L * B * (M * N + M)          # exp + rsqrt
    bytes_accessed = (2 * x.size * x.dtype.itemsize
                      + (cond.size * cond.dtype.itemsize if has_cond else 0)
                      + w_all.size * w_all.dtype.itemsize
                      + vec_all.size * vec_all.dtype.itemsize)
    cost = pl.CostEstimate(flops=flops, transcendentals=transcendentals,
                           bytes_accessed=bytes_accessed)

    def build(single_buffer_weights):
        wt_kw = ({"pipeline_mode": pl.Buffered(1)}
                 if single_buffer_weights else {})
        in_specs = [pl.BlockSpec((bg, M, C), lambda b: (b, 0, 0))]   # x
        args = [x]
        if has_cond:
            in_specs.append(pl.BlockSpec((bg, N, C), lambda b: (b, 0, 0)))
            args.append(cond)
        in_specs += [
            pl.BlockSpec((L, 4, C, C), lambda b: (0, 0, 0, 0), **wt_kw),  # W
            pl.BlockSpec((L, 6, C), lambda b: (0, 0, 0), **wt_kw),        # b/LN
        ]
        args += [w_all, vec_all]
        return pl.pallas_call(
            kernel,
            out_shape=jax.ShapeDtypeStruct((B, M, C), x.dtype),
            grid_spec=pltpu.PrefetchScalarGridSpec(
                num_scalar_prefetch=0,
                grid=(batch_groups,),
                in_specs=in_specs,
                out_specs=pl.BlockSpec((bg, M, C), lambda b: (b, 0, 0)),
            ),
            compiler_params=pltpu.CompilerParams(
                dimension_semantics=("parallel",)),
            cost_estimate=cost,
        )(*args)

    try:
        return build(True)
    except Exception:
        # pipeline_mode=pl.Buffered(1) not supported on this jax/libtpu combo.
        return build(False)


# ----------------------------------------------------------------------------
# Parameter init (mirrors Attention.initialize): xavier_uniform weights,
# zero biases, proj weight xavier_uniform with gain 1e-5, LN gamma=1, beta=0.
# Weights are packed ONCE to bf16 (halves DMA bytes, no in-kernel casts).
# ----------------------------------------------------------------------------
def init_shape_denoiser_params(key, channels, layers):
    L = 2 * layers
    a = (3.0 / channels) ** 0.5        # xavier bound, fan_in = fan_out = C
    w_l, vec_l = [], []
    for k in jax.random.split(key, L):
        kq, kk, kv, kp_ = jax.random.split(k, 4)
        xavier = lambda kk_, gain=1.0: jax.random.uniform(
            kk_, (channels, channels), jnp.float32, -gain * a, gain * a)
        w_l.append(jnp.stack([xavier(kq), xavier(kk), xavier(kv),
                              xavier(kp_, gain=1e-5)]))          # (4, C, C)
        vec_l.append(jnp.stack([
            jnp.zeros((channels,), jnp.float32),                 # bq
            jnp.zeros((channels,), jnp.float32),                 # bk
            jnp.zeros((channels,), jnp.float32),                 # bv
            jnp.zeros((channels,), jnp.float32),                 # bp
            jnp.ones((channels,), jnp.float32),                  # gamma
            jnp.zeros((channels,), jnp.float32),                 # beta
        ]))                                                       # (6, C)
    return jnp.stack(w_l).astype(jnp.bfloat16), jnp.stack(vec_l)


# ----------------------------------------------------------------------------
# Pure-JAX reference (for correctness sanity check).
# ----------------------------------------------------------------------------
def shape_denoiser_ref(x, cond, params):
    w_all, vec_all = params
    w_all = w_all.astype(jnp.float32)
    C = x.shape[-1]
    y = x
    for i in range(w_all.shape[0]):
        wq, wk, wv, wp = (w_all[i, j] for j in range(4))
        bq, bk, bv, bp, gamma, beta = (vec_all[i, j] for j in range(6))
        ctx = y if (i % 2 == 0 or cond is None) else cond
        q = y @ wq + bq
        k = ctx @ wk + bk
        v = ctx @ wv + bv
        w = jnp.einsum('bmc,bnc->bmn', q, k) * (float(C) ** -0.5)
        w = jax.nn.softmax(w, axis=-1)
        h = jnp.einsum('bmn,bnc->bmc', w, v) @ wp + bp
        z = y + h
        mean = jnp.mean(z, axis=-1, keepdims=True)
        var = jnp.mean((z - mean) ** 2, axis=-1, keepdims=True)
        y = (z - mean) * jax.lax.rsqrt(var + 1e-5) * gamma + beta
    return y


if __name__ == "__main__":
    B, M, N, C, LAYERS = 2, 8, 8, 32, 2

    key = jax.random.PRNGKey(0)
    kx, kc, kp = jax.random.split(key, 3)
    x = jax.random.normal(kx, (B, M, C), jnp.float32)
    cond = jax.random.normal(kc, (B, N, C), jnp.float32)
    params = init_shape_denoiser_params(kp, C, LAYERS)

    # cross-attention path (cond provided)
    out = jax.block_until_ready(shape_denoiser(x, cond, params))
    ref = shape_denoiser_ref(x, cond, params)
    assert out.shape == (B, M, C)
    err = float(jnp.max(jnp.abs(out - ref)))
    assert jnp.allclose(out, ref, atol=5e-4, rtol=5e-4), (
        "cond path mismatch: max abs err = %e" % err)

    # self-attention-only path (cond=None -> cond input dropped from the call)
    out_nc = jax.block_until_ready(shape_denoiser(x, None, params))
    ref_nc = shape_denoiser_ref(x, None, params)
    err_nc = float(jnp.max(jnp.abs(out_nc - ref_nc)))
    assert jnp.allclose(out_nc, ref_nc, atol=5e-4, rtol=5e-4), (
        "no-cond path mismatch: max abs err = %e" % err_nc)

    print("KERNEL_OK")
</pallas_src>

<mosaic_0001>
module attributes {stable_mosaic.version = 11 : i64} {
  func.func @_denoiser_kernel(%arg0: i32, %arg1: memref<2x8x32xf32, #tpu.memory_space<vmem>>, %arg2: memref<2x8x32xf32, #tpu.memory_space<vmem>>, %arg3: memref<4x4x32x32xbf16, #tpu.memory_space<vmem>>, %arg4: memref<4x6x32xf32, #tpu.memory_space<vmem>>, %arg5: memref<2x8x32xf32, #tpu.memory_space<vmem>>) attributes {dimension_semantics = [#tpu.dimension_semantics<parallel>], iteration_bounds = array<i64: 1>, scalar_prefetch = 0 : i64, scratch_operands = 0 : i64, tpu.core_type = #tpu.core_type<tc>, window_params = [{transform_indices = @transform_0, window_bounds = array<i64: 2, 8, 32>}, {transform_indices = @transform_1, window_bounds = array<i64: 2, 8, 32>}, {pipeline_mode = #tpu.pipeline_mode<synchronous>, transform_indices = @transform_2, window_bounds = array<i64: 4, 4, 32, 32>}, {pipeline_mode = #tpu.pipeline_mode<synchronous>, transform_indices = @transform_3, window_bounds = array<i64: 4, 6, 32>}, {transform_indices = @transform_4, window_bounds = array<i64: 2, 8, 32>}]} {
    %c0 = arith.constant 0 : index
    %c0_0 = arith.constant 0 : index
    %c0_1 = arith.constant 0 : index
    %0 = vector.load %arg1[%c0, %c0_0, %c0_1] : memref<2x8x32xf32, #tpu.memory_space<vmem>>, vector<2x8x32xf32>
    %1 = vector.shape_cast %0 : vector<2x8x32xf32> to vector<16x32xf32>
    %c0_2 = arith.constant 0 : index
    %c0_3 = arith.constant 0 : index
    %c0_4 = arith.constant 0 : index
    %2 = vector.load %arg2[%c0_2, %c0_3, %c0_4] : memref<2x8x32xf32, #tpu.memory_space<vmem>>, vector<2x8x32xf32>
    %3 = vector.shape_cast %2 : vector<2x8x32xf32> to vector<16x32xf32>
    %c0_5 = arith.constant 0 : index
    %c0_6 = arith.constant 0 : index
    %c0_7 = arith.constant 0 : index
    %c0_8 = arith.constant 0 : index
    %4 = vector.load %arg3[%c0_5, %c0_6, %c0_7, %c0_8] : memref<4x4x32x32xbf16, #tpu.memory_space<vmem>>, vector<1x1x32x32xbf16>
    %5 = vector.shape_cast %4 : vector<1x1x32x32xbf16> to vector<32x32xbf16>
    %c0_9 = arith.constant 0 : index
    %c1 = arith.constant 1 : index
    %c0_10 = arith.constant 0 : index
    %c0_11 = arith.constant 0 : index
    %6 = vector.load %arg3[%c0_9, %c1, %c0_10, %c0_11] : memref<4x4x32x32xbf16, #tpu.memory_space<vmem>>, vector<1x1x32x32xbf16>
    %7 = vector.shape_cast %6 : vector<1x1x32x32xbf16> to vector<32x32xbf16>
    %c0_12 = arith.constant 0 : index
    %c2 = arith.constant 2 : index
    %c0_13 = arith.constant 0 : index
    %c0_14 = arith.constant 0 : index
    %8 = vector.load %arg3[%c0_12, %c2, %c0_13, %c0_14] : memref<4x4x32x32xbf16, #tpu.memory_space<vmem>>, vector<1x1x32x32xbf16>
    %9 = vector.shape_cast %8 : vector<1x1x32x32xbf16> to vector<32x32xbf16>
    %c0_15 = arith.constant 0 : index
    %c3 = arith.constant 3 : index
    %c0_16 = arith.constant 0 : index
    %c0_17 = arith.constant 0 : index
    %10 = vector.load %arg3[%c0_15, %c3, %c0_16, %c0_17] : memref<4x4x32x32xbf16, #tpu.memory_space<vmem>>, vector<1x1x32x32xbf16>
    %11 = vector.shape_cast %10 : vector<1x1x32x32xbf16> to vector<32x32xbf16>
    %c0_18 = arith.constant 0 : index
    %c0_19 = arith.constant 0 : index
    %c0_20 = arith.constant 0 : index
    %12 = vector.load %arg4[%c0_18, %c0_19, %c0_20] : memref<4x6x32xf32, #tpu.memory_space<vmem>>, vector<1x6x32xf32>
    %13 = vector.shape_cast %12 : vector<1x6x32xf32> to vector<6x32xf32>
    %14 = vector.extract_strided_slice %13 {offsets = [0, 0], sizes = [1, 32], strides = [1, 1]} : vector<6x32xf32> to vector<1x32xf32>
    %15 = vector.extract_strided_slice %13 {offsets = [1, 0], sizes = [1, 32], strides = [1, 1]} : vector<6x32xf32> to vector<1x32xf32>
    %16 = vector.extract_strided_slice %13 {offsets = [2, 0], sizes = [1, 32], strides = [1, 1]} : vector<6x32xf32> to vector<1x32xf32>
    %17 = vector.extract_strided_slice %13 {offsets = [3, 0], sizes = [1, 32], strides = [1, 1]} : vector<6x32xf32> to vector<1x32xf32>
    %18 = vector.extract_strided_slice %13 {offsets = [4, 0], sizes = [1, 32], strides = [1, 1]} : vector<6x32xf32> to vector<1x32xf32>
    %19 = vector.extract_strided_slice %13 {offsets = [5, 0], sizes = [1, 32], strides = [1, 1]} : vector<6x32xf32> to vector<1x32xf32>
    %20 = arith.truncf %1 : vector<16x32xf32> to vector<16x32xbf16>
    %cst = arith.constant dense<0.000000e+00> : vector<16x32xf32>
    %21 = tpu.matmul %20, %5, %cst {dimension_numbers = #tpu.dot_dimension_numbers<[1], [0], [0], [1], [0, 0, 1, 1], [], []>} : vector<16x32xbf16>, vector<32x32xbf16>, vector<16x32xf32> -> vector<16x32xf32>
    %22 = vector.broadcast %14 : vector<1x32xf32> to vector<16x32xf32>
    %23 = arith.addf %21, %22 : vector<16x32xf32>
    %cst_21 = arith.constant 0.176776692 : f32
    %24 = vector.broadcast %cst_21 : f32 to vector<16x32xf32>
    %25 = arith.mulf %23, %24 : vector<16x32xf32>
    %cst_22 = arith.constant dense<0.000000e+00> : vector<16x32xf32>
    %26 = tpu.matmul %20, %7, %cst_22 {dimension_numbers = #tpu.dot_dimension_numbers<[1], [0], [0], [1], [0, 0, 1, 1], [], []>} : vector<16x32xbf16>, vector<32x32xbf16>, vector<16x32xf32> -> vector<16x32xf32>
    %27 = vector.broadcast %15 : vector<1x32xf32> to vector<16x32xf32>
    %28 = arith.addf %26, %27 : vector<16x32xf32>
    %cst_23 = arith.constant dense<0.000000e+00> : vector<16x32xf32>
    %29 = tpu.matmul %20, %9, %cst_23 {dimension_numbers = #tpu.dot_dimension_numbers<[1], [0], [0], [1], [0, 0, 1, 1], [], []>} : vector<16x32xbf16>, vector<32x32xbf16>, vector<16x32xf32> -> vector<16x32xf32>
    %30 = vector.broadcast %16 : vector<1x32xf32> to vector<16x32xf32>
    %31 = arith.addf %29, %30 : vector<16x32xf32>
    %32 = vector.shape_cast %25 : vector<16x32xf32> to vector<2x8x32xf32>
    %33 = arith.truncf %32 : vector<2x8x32xf32> to vector<2x8x32xbf16>
    %34 = vector.shape_cast %28 : vector<16x32xf32> to vector<2x8x32xf32>
    %35 = arith.truncf %34 : vector<2x8x32xf32> to vector<2x8x32xbf16>
    %36 = vector.shape_cast %31 : vector<16x32xf32> to vector<2x8x32xf32>
    %37 = arith.truncf %36 : vector<2x8x32xf32> to vector<2x8x32xbf16>
    "tpu.trace_start"() <{level = 10 : i32, message = "bmc,bnc->bmn"}> : () -> ()
    %cst_24 = arith.constant dense<0.000000e+00> : vector<2x8x8xf32>
    %38 = tpu.matmul %33, %35, %cst_24 {dimension_numbers = #tpu.dot_dimension_numbers<[2], [2], [1], [1], [0, 0, 0, 1, 1, 1], [0], [0]>} : vector<2x8x32xbf16>, vector<2x8x32xbf16>, vector<2x8x8xf32> -> vector<2x8x8xf32>
    "tpu.trace_stop"() : () -> ()
    %cst_25 = arith.constant dense<0xFF800000> : vector<2x8xf32>
    %39 = vector.multi_reduction <maximumf>, %38, %cst_25 [2] : vector<2x8x8xf32> to vector<2x8xf32>
    %40 = vector.shape_cast %39 : vector<2x8xf32> to vector<2x8x1xf32>
    %41 = vector.broadcast %40 : vector<2x8x1xf32> to vector<2x8x8xf32>
    %42 = arith.subf %38, %41 : vector<2x8x8xf32>
    %43 = math.exp %42 : vector<2x8x8xf32>
    %cst_26 = arith.constant dense<0.000000e+00> : vector<2x8xf32>
    %44 = vector.multi_reduction <add>, %43, %cst_26 [2] : vector<2x8x8xf32> to vector<2x8xf32>
    %45 = vector.shape_cast %44 : vector<2x8xf32> to vector<2x8x1xf32>
    %46 = tpu.reciprocal %45 {approx = true} : vector<2x8x1xf32> -> vector<2x8x1xf32>
    %47 = vector.broadcast %46 : vector<2x8x1xf32> to vector<2x8x8xf32>
    %48 = arith.mulf %43, %47 : vector<2x8x8xf32>
    %49 = arith.truncf %48 : vector<2x8x8xf32> to vector<2x8x8xbf16>
    "tpu.trace_start"() <{level = 10 : i32, message = "bmn,bnc->bmc"}> : () -> ()
    %cst_27 = arith.constant dense<0.000000e+00> : vector<2x8x32xf32>
    %50 = tpu.matmul %49, %37, %cst_27 {dimension_numbers = #tpu.dot_dimension_numbers<[2], [1], [1], [2], [0, 0, 0, 1, 1, 2], [0], [0]>} : vector<2x8x8xbf16>, vector<2x8x32xbf16>, vector<2x8x32xf32> -> vector<2x8x32xf32>
    "tpu.trace_stop"() : () -> ()
    %51 = vector.shape_cast %50 : vector<2x8x32xf32> to vector<16x32xf32>
    %52 = arith.truncf %51 : vector<16x32xf32> to vector<16x32xbf16>
    %cst_28 = arith.constant dense<0.000000e+00> : vector<16x32xf32>
    %53 = tpu.matmul %52, %11, %cst_28 {dimension_numbers = #tpu.dot_dimension_numbers<[1], [0], [0], [1], [0, 0, 1, 1], [], []>} : vector<16x32xbf16>, vector<32x32xbf16>, vector<16x32xf32> -> vector<16x32xf32>
    %54 = vector.broadcast %17 : vector<1x32xf32> to vector<16x32xf32>
    %55 = arith.addf %53, %54 : vector<16x32xf32>
    %56 = arith.addf %1, %55 : vector<16x32xf32>
    %cst_29 = arith.constant dense<0.000000e+00> : vector<16xf32>
    %57 = vector.multi_reduction <add>, %56, %cst_29 [1] : vector<16x32xf32> to vector<16xf32>
    %58 = vector.shape_cast %57 : vector<16xf32> to vector<16x1xf32>
    %cst_30 = arith.constant 3.200000e+01 : f32
    %59 = vector.broadcast %cst_30 : f32 to vector<16x1xf32>
    %60 = arith.divf %58, %59 : vector<16x1xf32>
    %61 = vector.broadcast %60 : vector<16x1xf32> to vector<16x32xf32>
    %62 = arith.subf %56, %61 : vector<16x32xf32>
    %63 = arith.mulf %62, %62 : vector<16x32xf32>
    %cst_31 = arith.constant dense<0.000000e+00> : vector<16xf32>
    %64 = vector.multi_reduction <add>, %63, %cst_31 [1] : vector<16x32xf32> to vector<16xf32>
    %65 = vector.shape_cast %64 : vector<16xf32> to vector<16x1xf32>
    %cst_32 = arith.constant 3.200000e+01 : f32
    %66 = vector.broadcast %cst_32 : f32 to vector<16x1xf32>
    %67 = arith.divf %65, %66 : vector<16x1xf32>
    %cst_33 = arith.constant 9.99999974E-6 : f32
    %68 = vector.broadcast %cst_33 : f32 to vector<16x1xf32>
    %69 = arith.addf %67, %68 : vector<16x1xf32>
    %70 = math.rsqrt %69 : vector<16x1xf32>
    %71 = vector.broadcast %70 : vector<16x1xf32> to vector<16x32xf32>
    %72 = arith.mulf %62, %71 : vector<16x32xf32>
    %73 = vector.broadcast %18 : vector<1x32xf32> to vector<16x32xf32>
    %74 = arith.mulf %72, %73 : vector<16x32xf32>
    %75 = vector.broadcast %19 : vector<1x32xf32> to vector<16x32xf32>
    %76 = arith.addf %74, %75 : vector<16x32xf32>
    %c1_34 = arith.constant 1 : index
    %c0_35 = arith.constant 0 : index
    %c0_36 = arith.constant 0 : index
    %c0_37 = arith.constant 0 : index
    %77 = vector.load %arg3[%c1_34, %c0_35, %c0_36, %c0_37] : memref<4x4x32x32xbf16, #tpu.memory_space<vmem>>, vector<1x1x32x32xbf16>
    %78 = vector.shape_cast %77 : vector<1x1x32x32xbf16> to vector<32x32xbf16>
    %c1_38 = arith.constant 1 : index
    %c1_39 = arith.constant 1 : index
    %c0_40 = arith.constant 0 : index
    %c0_41 = arith.constant 0 : index
    %79 = vector.load %arg3[%c1_38, %c1_39, %c0_40, %c0_41] : memref<4x4x32x32xbf16, #tpu.memory_space<vmem>>, vector<1x1x32x32xbf16>
    %80 = vector.shape_cast %79 : vector<1x1x32x32xbf16> to vector<32x32xbf16>
    %c1_42 = arith.constant 1 : index
    %c2_43 = arith.constant 2 : index
    %c0_44 = arith.constant 0 : index
    %c0_45 = arith.constant 0 : index
    %81 = vector.load %arg3[%c1_42, %c2_43, %c0_44, %c0_45] : memref<4x4x32x32xbf16, #tpu.memory_space<vmem>>, vector<1x1x32x32xbf16>
    %82 = vector.shape_cast %81 : vector<1x1x32x32xbf16> to vector<32x32xbf16>
    %c1_46 = arith.constant 1 : index
    %c3_47 = arith.constant 3 : index
    %c0_48 = arith.constant 0 : index
    %c0_49 = arith.constant 0 : index
    %83 = vector.load %arg3[%c1_46, %c3_47, %c0_48, %c0_49] : memref<4x4x32x32xbf16, #tpu.memory_space<vmem>>, vector<1x1x32x32xbf16>
    %84 = vector.shape_cast %83 : vector<1x1x32x32xbf16> to vector<32x32xbf16>
    %c1_50 = arith.constant 1 : index
    %c0_51 = arith.constant 0 : index
    %c0_52 = arith.constant 0 : index
    %85 = vector.load %arg4[%c1_50, %c0_51, %c0_52] : memref<4x6x32xf32, #tpu.memory_space<vmem>>, vector<1x6x32xf32>
    %86 = vector.shape_cast %85 : vector<1x6x32xf32> to vector<6x32xf32>
    %87 = vector.extract_strided_slice %86 {offsets = [0, 0], sizes = [1, 32], strides = [1, 1]} : vector<6x32xf32> to vector<1x32xf32>
    %88 = vector.extract_strided_slice %86 {offsets = [1, 0], sizes = [1, 32], strides = [1, 1]} : vector<6x32xf32> to vector<1x32xf32>
    %89 = vector.extract_strided_slice %86 {offsets = [2, 0], sizes = [1, 32], strides = [1, 1]} : vector<6x32xf32> to vector<1x32xf32>
    %90 = vector.extract_strided_slice %86 {offsets = [3, 0], sizes = [1, 32], strides = [1, 1]} : vector<6x32xf32> to vector<1x32xf32>
    %91 = vector.extract_strided_slice %86 {offsets = [4, 0], sizes = [1, 32], strides = [1, 1]} : vector<6x32xf32> to vector<1x32xf32>
    %92 = vector.extract_strided_slice %86 {offsets = [5, 0], sizes = [1, 32], strides = [1, 1]} : vector<6x32xf32> to vector<1x32xf32>
    %93 = arith.truncf %76 : vector<16x32xf32> to vector<16x32xbf16>
    %94 = arith.truncf %3 : vector<16x32xf32> to vector<16x32xbf16>
    %cst_53 = arith.constant dense<0.000000e+00> : vector<16x32xf32>
    %95 = tpu.matmul %93, %78, %cst_53 {dimension_numbers = #tpu.dot_dimension_numbers<[1], [0], [0], [1], [0, 0, 1, 1], [], []>} : vector<16x32xbf16>, vector<32x32xbf16>, vector<16x32xf32> -> vector<16x32xf32>
    %96 = vector.broadcast %87 : vector<1x32xf32> to vector<16x32xf32>
    %97 = arith.addf %95, %96 : vector<16x32xf32>
    %cst_54 = arith.constant 0.176776692 : f32
    %98 = vector.broadcast %cst_54 : f32 to vector<16x32xf32>
    %99 = arith.mulf %97, %98 : vector<16x32xf32>
    %cst_55 = arith.constant dense<0.000000e+00> : vector<16x32xf32>
    %100 = tpu.matmul %94, %80, %cst_55 {dimension_numbers = #tpu.dot_dimension_numbers<[1], [0], [0], [1], [0, 0, 1, 1], [], []>} : vector<16x32xbf16>, vector<32x32xbf16>, vector<16x32xf32> -> vector<16x32xf32>
    %101 = vector.broadcast %88 : vector<1x32xf32> to vector<16x32xf32>
    %102 = arith.addf %100, %101 : vector<16x32xf32>
    %cst_56 = arith.constant dense<0.000000e+00> : vector<16x32xf32>
    %103 = tpu.matmul %94, %82, %cst_56 {dimension_numbers = #tpu.dot_dimension_numbers<[1], [0], [0], [1], [0, 0, 1, 1], [], []>} : vector<16x32xbf16>, vector<32x32xbf16>, vector<16x32xf32> -> vector<16x32xf32>
    %104 = vector.broadcast %89 : vector<1x32xf32> to vector<16x32xf32>
    %105 = arith.addf %103, %104 : vector<16x32xf32>
    %106 = vector.shape_cast %99 : vector<16x32xf32> to vector<2x8x32xf32>
    %107 = arith.truncf %106 : vector<2x8x32xf32> to vector<2x8x32xbf16>
    %108 = vector.shape_cast %102 : vector<16x32xf32> to vector<2x8x32xf32>
    %109 = arith.truncf %108 : vector<2x8x32xf32> to vector<2x8x32xbf16>
    %110 = vector.shape_cast %105 : vector<16x32xf32> to vector<2x8x32xf32>
    %111 = arith.truncf %110 : vector<2x8x32xf32> to vector<2x8x32xbf16>
    "tpu.trace_start"() <{level = 10 : i32, message = "bmc,bnc->bmn"}> : () -> ()
    %cst_57 = arith.constant dense<0.000000e+00> : vector<2x8x8xf32>
    %112 = tpu.matmul %107, %109, %cst_57 {dimension_numbers = #tpu.dot_dimension_numbers<[2], [2], [1], [1], [0, 0, 0, 1, 1, 1], [0], [0]>} : vector<2x8x32xbf16>, vector<2x8x32xbf16>, vector<2x8x8xf32> -> vector<2x8x8xf32>
    "tpu.trace_stop"() : () -> ()
    %cst_58 = arith.constant dense<0xFF800000> : vector<2x8xf32>
    %113 = vector.multi_reduction <maximumf>, %112, %cst_58 [2] : vector<2x8x8xf32> to vector<2x8xf32>
    %114 = vector.shape_cast %113 : vector<2x8xf32> to vector<2x8x1xf32>
    %115 = vector.broadcast %114 : vector<2x8x1xf32> to vector<2x8x8xf32>
    %116 = arith.subf %112, %115 : vector<2x8x8xf32>
    %117 = math.exp %116 : vector<2x8x8xf32>
    %cst_59 = arith.constant dense<0.000000e+00> : vector<2x8xf32>
    %118 = vector.multi_reduction <add>, %117, %cst_59 [2] : vector<2x8x8xf32> to vector<2x8xf32>
    %119 = vector.shape_cast %118 : vector<2x8xf32> to vector<2x8x1xf32>
    %120 = tpu.reciprocal %119 {approx = true} : vector<2x8x1xf32> -> vector<2x8x1xf32>
    %121 = vector.broadcast %120 : vector<2x8x1xf32> to vector<2x8x8xf32>
    %122 = arith.mulf %117, %121 : vector<2x8x8xf32>
    %123 = arith.truncf %122 : vector<2x8x8xf32> to vector<2x8x8xbf16>
    "tpu.trace_start"() <{level = 10 : i32, message = "bmn,bnc->bmc"}> : () -> ()
    %cst_60 = arith.constant dense<0.000000e+00> : vector<2x8x32xf32>
    %124 = tpu.matmul %123, %111, %cst_60 {dimension_numbers = #tpu.dot_dimension_numbers<[2], [1], [1], [2], [0, 0, 0, 1, 1, 2], [0], [0]>} : vector<2x8x8xbf16>, vector<2x8x32xbf16>, vector<2x8x32xf32> -> vector<2x8x32xf32>
    "tpu.trace_stop"() : () -> ()
    %125 = vector.shape_cast %124 : vector<2x8x32xf32> to vector<16x32xf32>
    %126 = arith.truncf %125 : vector<16x32xf32> to vector<16x32xbf16>
    %cst_61 = arith.constant dense<0.000000e+00> : vector<16x32xf32>
    %127 = tpu.matmul %126, %84, %cst_61 {dimension_numbers = #tpu.dot_dimension_numbers<[1], [0], [0], [1], [0, 0, 1, 1], [], []>} : vector<16x32xbf16>, vector<32x32xbf16>, vector<16x32xf32> -> vector<16x32xf32>
    %128 = vector.broadcast %90 : vector<1x32xf32> to vector<16x32xf32>
    %129 = arith.addf %127, %128 : vector<16x32xf32>
    %130 = arith.addf %76, %129 : vector<16x32xf32>
    %cst_62 = arith.constant dense<0.000000e+00> : vector<16xf32>
    %131 = vector.multi_reduction <add>, %130, %cst_62 [1] : vector<16x32xf32> to vector<16xf32>
    %132 = vector.shape_cast %131 : vector<16xf32> to vector<16x1xf32>
    %cst_63 = arith.constant 3.200000e+01 : f32
    %133 = vector.broadcast %cst_63 : f32 to vector<16x1xf32>
    %134 = arith.divf %132, %133 : vector<16x1xf32>
    %135 = vector.broadcast %134 : vector<16x1xf32> to vector<16x32xf32>
    %136 = arith.subf %130, %135 : vector<16x32xf32>
    %137 = arith.mulf %136, %136 : vector<16x32xf32>
    %cst_64 = arith.constant dense<0.000000e+00> : vector<16xf32>
    %138 = vector.multi_reduction <add>, %137, %cst_64 [1] : vector<16x32xf32> to vector<16xf32>
    %139 = vector.shape_cast %138 : vector<16xf32> to vector<16x1xf32>
    %cst_65 = arith.constant 3.200000e+01 : f32
    %140 = vector.broadcast %cst_65 : f32 to vector<16x1xf32>
    %141 = arith.divf %139, %140 : vector<16x1xf32>
    %cst_66 = arith.constant 9.99999974E-6 : f32
    %142 = vector.broadcast %cst_66 : f32 to vector<16x1xf32>
    %143 = arith.addf %141, %142 : vector<16x1xf32>
    %144 = math.rsqrt %143 : vector<16x1xf32>
    %145 = vector.broadcast %144 : vector<16x1xf32> to vector<16x32xf32>
    %146 = arith.mulf %136, %145 : vector<16x32xf32>
    %147 = vector.broadcast %91 : vector<1x32xf32> to vector<16x32xf32>
    %148 = arith.mulf %146, %147 : vector<16x32xf32>
    %149 = vector.broadcast %92 : vector<1x32xf32> to vector<16x32xf32>
    %150 = arith.addf %148, %149 : vector<16x32xf32>
    %c2_67 = arith.constant 2 : index
    %c0_68 = arith.constant 0 : index
    %c0_69 = arith.constant 0 : index
    %c0_70 = arith.constant 0 : index
    %151 = vector.load %arg3[%c2_67, %c0_68, %c0_69, %c0_70] : memref<4x4x32x32xbf16, #tpu.memory_space<vmem>>, vector<1x1x32x32xbf16>
    %152 = vector.shape_cast %151 : vector<1x1x32x32xbf16> to vector<32x32xbf16>
    %c2_71 = arith.constant 2 : index
    %c1_72 = arith.constant 1 : index
    %c0_73 = arith.constant 0 : index
    %c0_74 = arith.constant 0 : index
    %153 = vector.load %arg3[%c2_71, %c1_72, %c0_73, %c0_74] : memref<4x4x32x32xbf16, #tpu.memory_space<vmem>>, vector<1x1x32x32xbf16>
    %154 = vector.shape_cast %153 : vector<1x1x32x32xbf16> to vector<32x32xbf16>
    %c2_75 = arith.constant 2 : index
    %c2_76 = arith.constant 2 : index
    %c0_77 = arith.constant 0 : index
    %c0_78 = arith.constant 0 : index
    %155 = vector.load %arg3[%c2_75, %c2_76, %c0_77, %c0_78] : memref<4x4x32x32xbf16, #tpu.memory_space<vmem>>, vector<1x1x32x32xbf16>
    %156 = vector.shape_cast %155 : vector<1x1x32x32xbf16> to vector<32x32xbf16>
    %c2_79 = arith.constant 2 : index
    %c3_80 = arith.constant 3 : index
    %c0_81 = arith.constant 0 : index
    %c0_82 = arith.constant 0 : index
    %157 = vector.load %arg3[%c2_79, %c3_80, %c0_81, %c0_82] : memref<4x4x32x32xbf16, #tpu.memory_space<vmem>>, vector<1x1x32x32xbf16>
    %158 = vector.shape_cast %157 : vector<1x1x32x32xbf16> to vector<32x32xbf16>
    %c2_83 = arith.constant 2 : index
    %c0_84 = arith.constant 0 : index
    %c0_85 = arith.constant 0 : index
    %159 = vector.load %arg4[%c2_83, %c0_84, %c0_85] : memref<4x6x32xf32, #tpu.memory_space<vmem>>, vector<1x6x32xf32>
    %160 = vector.shape_cast %159 : vector<1x6x32xf32> to vector<6x32xf32>
    %161 = vector.extract_strided_slice %160 {offsets = [0, 0], sizes = [1, 32], strides = [1, 1]} : vector<6x32xf32> to vector<1x32xf32>
    %162 = vector.extract_strided_slice %160 {offsets = [1, 0], sizes = [1, 32], strides = [1, 1]} : vector<6x32xf32> to vector<1x32xf32>
    %163 = vector.extract_strided_slice %160 {offsets = [2, 0], sizes = [1, 32], strides = [1, 1]} : vector<6x32xf32> to vector<1x32xf32>
    %164 = vector.extract_strided_slice %160 {offsets = [3, 0], sizes = [1, 32], strides = [1, 1]} : vector<6x32xf32> to vector<1x32xf32>
    %165 = vector.extract_strided_slice %160 {offsets = [4, 0], sizes = [1, 32], strides = [1, 1]} : vector<6x32xf32> to vector<1x32xf32>
    %166 = vector.extract_strided_slice %160 {offsets = [5, 0], sizes = [1, 32], strides = [1, 1]} : vector<6x32xf32> to vector<1x32xf32>
    %167 = arith.truncf %150 : vector<16x32xf32> to vector<16x32xbf16>
    %cst_86 = arith.constant dense<0.000000e+00> : vector<16x32xf32>
    %168 = tpu.matmul %167, %152, %cst_86 {dimension_numbers = #tpu.dot_dimension_numbers<[1], [0], [0], [1], [0, 0, 1, 1], [], []>} : vector<16x32xbf16>, vector<32x32xbf16>, vector<16x32xf32> -> vector<16x32xf32>
    %169 = vector.broadcast %161 : vector<1x32xf32> to vector<16x32xf32>
    %170 = arith.addf %168, %169 : vector<16x32xf32>
    %cst_87 = arith.constant 0.176776692 : f32
    %171 = vector.broadcast %cst_87 : f32 to vector<16x32xf32>
    %172 = arith.mulf %170, %171 : vector<16x32xf32>
    %cst_88 = arith.constant dense<0.000000e+00> : vector<16x32xf32>
    %173 = tpu.matmul %167, %154, %cst_88 {dimension_numbers = #tpu.dot_dimension_numbers<[1], [0], [0], [1], [0, 0, 1, 1], [], []>} : vector<16x32xbf16>, vector<32x32xbf16>, vector<16x32xf32> -> vector<16x32xf32>
    %174 = vector.broadcast %162 : vector<1x32xf32> to vector<16x32xf32>
    %175 = arith.addf %173, %174 : vector<16x32xf32>
    %cst_89 = arith.constant dense<0.000000e+00> : vector<16x32xf32>
    %176 = tpu.matmul %167, %156, %cst_89 {dimension_numbers = #tpu.dot_dimension_numbers<[1], [0], [0], [1], [0, 0, 1, 1], [], []>} : vector<16x32xbf16>, vector<32x32xbf16>, vector<16x32xf32> -> vector<16x32xf32>
    %177 = vector.broadcast %163 : vector<1x32xf32> to vector<16x32xf32>
    %178 = arith.addf %176, %177 : vector<16x32xf32>
    %179 = vector.shape_cast %172 : vector<16x32xf32> to vector<2x8x32xf32>
    %180 = arith.truncf %179 : vector<2x8x32xf32> to vector<2x8x32xbf16>
    %181 = vector.shape_cast %175 : vector<16x32xf32> to vector<2x8x32xf32>
    %182 = arith.truncf %181 : vector<2x8x32xf32> to vector<2x8x32xbf16>
    %183 = vector.shape_cast %178 : vector<16x32xf32> to vector<2x8x32xf32>
    %184 = arith.truncf %183 : vector<2x8x32xf32> to vector<2x8x32xbf16>
    "tpu.trace_start"() <{level = 10 : i32, message = "bmc,bnc->bmn"}> : () -> ()
    %cst_90 = arith.constant dense<0.000000e+00> : vector<2x8x8xf32>
    %185 = tpu.matmul %180, %182, %cst_90 {dimension_numbers = #tpu.dot_dimension_numbers<[2], [2], [1], [1], [0, 0, 0, 1, 1, 1], [0], [0]>} : vector<2x8x32xbf16>, vector<2x8x32xbf16>, vector<2x8x8xf32> -> vector<2x8x8xf32>
    "tpu.trace_stop"() : () -> ()
    %cst_91 = arith.constant dense<0xFF800000> : vector<2x8xf32>
    %186 = vector.multi_reduction <maximumf>, %185, %cst_91 [2] : vector<2x8x8xf32> to vector<2x8xf32>
    %187 = vector.shape_cast %186 : vector<2x8xf32> to vector<2x8x1xf32>
    %188 = vector.broadcast %187 : vector<2x8x1xf32> to vector<2x8x8xf32>
    %189 = arith.subf %185, %188 : vector<2x8x8xf32>
    %190 = math.exp %189 : vector<2x8x8xf32>
    %cst_92 = arith.constant dense<0.000000e+00> : vector<2x8xf32>
    %191 = vector.multi_reduction <add>, %190, %cst_92 [2] : vector<2x8x8xf32> to vector<2x8xf32>
    %192 = vector.shape_cast %191 : vector<2x8xf32> to vector<2x8x1xf32>
    %193 = tpu.reciprocal %192 {approx = true} : vector<2x8x1xf32> -> vector<2x8x1xf32>
    %194 = vector.broadcast %193 : vector<2x8x1xf32> to vector<2x8x8xf32>
    %195 = arith.mulf %190, %194 : vector<2x8x8xf32>
    %196 = arith.truncf %195 : vector<2x8x8xf32> to vector<2x8x8xbf16>
    "tpu.trace_start"() <{level = 10 : i32, message = "bmn,bnc->bmc"}> : () -> ()
    %cst_93 = arith.constant dense<0.000000e+00> : vector<2x8x32xf32>
    %197 = tpu.matmul %196, %184, %cst_93 {dimension_numbers = #tpu.dot_dimension_numbers<[2], [1], [1], [2], [0, 0, 0, 1, 1, 2], [0], [0]>} : vector<2x8x8xbf16>, vector<2x8x32xbf16>, vector<2x8x32xf32> -> vector<2x8x32xf32>
    "tpu.trace_stop"() : () -> ()
    %198 = vector.shape_cast %197 : vector<2x8x32xf32> to vector<16x32xf32>
    %199 = arith.truncf %198 : vector<16x32xf32> to vector<16x32xbf16>
    %cst_94 = arith.constant dense<0.000000e+00> : vector<16x32xf32>
    %200 = tpu.matmul %199, %158, %cst_94 {dimension_numbers = #tpu.dot_dimension_numbers<[1], [0], [0], [1], [0, 0, 1, 1], [], []>} : vector<16x32xbf16>, vector<32x32xbf16>, vector<16x32xf32> -> vector<16x32xf32>
    %201 = vector.broadcast %164 : vector<1x32xf32> to vector<16x32xf32>
    %202 = arith.addf %200, %201 : vector<16x32xf32>
    %203 = arith.addf %150, %202 : vector<16x32xf32>
    %cst_95 = arith.constant dense<0.000000e+00> : vector<16xf32>
    %204 = vector.multi_reduction <add>, %203, %cst_95 [1] : vector<16x32xf32> to vector<16xf32>
    %205 = vector.shape_cast %204 : vector<16xf32> to vector<16x1xf32>
    %cst_96 = arith.constant 3.200000e+01 : f32
    %206 = vector.broadcast %cst_96 : f32 to vector<16x1xf32>
    %207 = arith.divf %205, %206 : vector<16x1xf32>
    %208 = vector.broadcast %207 : vector<16x1xf32> to vector<16x32xf32>
    %209 = arith.subf %203, %208 : vector<16x32xf32>
    %210 = arith.mulf %209, %209 : vector<16x32xf32>
    %cst_97 = arith.constant dense<0.000000e+00> : vector<16xf32>
    %211 = vector.multi_reduction <add>, %210, %cst_97 [1] : vector<16x32xf32> to vector<16xf32>
    %212 = vector.shape_cast %211 : vector<16xf32> to vector<16x1xf32>
    %cst_98 = arith.constant 3.200000e+01 : f32
    %213 = vector.broadcast %cst_98 : f32 to vector<16x1xf32>
    %214 = arith.divf %212, %213 : vector<16x1xf32>
    %cst_99 = arith.constant 9.99999974E-6 : f32
    %215 = vector.broadcast %cst_99 : f32 to vector<16x1xf32>
    %216 = arith.addf %214, %215 : vector<16x1xf32>
    %217 = math.rsqrt %216 : vector<16x1xf32>
    %218 = vector.broadcast %217 : vector<16x1xf32> to vector<16x32xf32>
    %219 = arith.mulf %209, %218 : vector<16x32xf32>
    %220 = vector.broadcast %165 : vector<1x32xf32> to vector<16x32xf32>
    %221 = arith.mulf %219, %220 : vector<16x32xf32>
    %222 = vector.broadcast %166 : vector<1x32xf32> to vector<16x32xf32>
    %223 = arith.addf %221, %222 : vector<16x32xf32>
    %c3_100 = arith.constant 3 : index
    %c0_101 = arith.constant 0 : index
    %c0_102 = arith.constant 0 : index
    %c0_103 = arith.constant 0 : index
    %224 = vector.load %arg3[%c3_100, %c0_101, %c0_102, %c0_103] : memref<4x4x32x32xbf16, #tpu.memory_space<vmem>>, vector<1x1x32x32xbf16>
    %225 = vector.shape_cast %224 : vector<1x1x32x32xbf16> to vector<32x32xbf16>
    %c3_104 = arith.constant 3 : index
    %c1_105 = arith.constant 1 : index
    %c0_106 = arith.constant 0 : index
    %c0_107 = arith.constant 0 : index
    %226 = vector.load %arg3[%c3_104, %c1_105, %c0_106, %c0_107] : memref<4x4x32x32xbf16, #tpu.memory_space<vmem>>, vector<1x1x32x32xbf16>
    %227 = vector.shape_cast %226 : vector<1x1x32x32xbf16> to vector<32x32xbf16>
    %c3_108 = arith.constant 3 : index
    %c2_109 = arith.constant 2 : index
    %c0_110 = arith.constant 0 : index
    %c0_111 = arith.constant 0 : index
    %228 = vector.load %arg3[%c3_108, %c2_109, %c0_110, %c0_111] : memref<4x4x32x32xbf16, #tpu.memory_space<vmem>>, vector<1x1x32x32xbf16>
    %229 = vector.shape_cast %228 : vector<1x1x32x32xbf16> to vector<32x32xbf16>
    %c3_112 = arith.constant 3 : index
    %c3_113 = arith.constant 3 : index
    %c0_114 = arith.constant 0 : index
    %c0_115 = arith.constant 0 : index
    %230 = vector.load %arg3[%c3_112, %c3_113, %c0_114, %c0_115] : memref<4x4x32x32xbf16, #tpu.memory_space<vmem>>, vector<1x1x32x32xbf16>
    %231 = vector.shape_cast %230 : vector<1x1x32x32xbf16> to vector<32x32xbf16>
    %c3_116 = arith.constant 3 : index
    %c0_117 = arith.constant 0 : index
    %c0_118 = arith.constant 0 : index
    %232 = vector.load %arg4[%c3_116, %c0_117, %c0_118] : memref<4x6x32xf32, #tpu.memory_space<vmem>>, vector<1x6x32xf32>
    %233 = vector.shape_cast %232 : vector<1x6x32xf32> to vector<6x32xf32>
    %234 = vector.extract_strided_slice %233 {offsets = [0, 0], sizes = [1, 32], strides = [1, 1]} : vector<6x32xf32> to vector<1x32xf32>
    %235 = vector.extract_strided_slice %233 {offsets = [1, 0], sizes = [1, 32], strides = [1, 1]} : vector<6x32xf32> to vector<1x32xf32>
    %236 = vector.extract_strided_slice %233 {offsets = [2, 0], sizes = [1, 32], strides = [1, 1]} : vector<6x32xf32> to vector<1x32xf32>
    %237 = vector.extract_strided_slice %233 {offsets = [3, 0], sizes = [1, 32], strides = [1, 1]} : vector<6x32xf32> to vector<1x32xf32>
    %238 = vector.extract_strided_slice %233 {offsets = [4, 0], sizes = [1, 32], strides = [1, 1]} : vector<6x32xf32> to vector<1x32xf32>
    %239 = vector.extract_strided_slice %233 {offsets = [5, 0], sizes = [1, 32], strides = [1, 1]} : vector<6x32xf32> to vector<1x32xf32>
    %240 = arith.truncf %223 : vector<16x32xf32> to vector<16x32xbf16>
    %241 = arith.truncf %3 : vector<16x32xf32> to vector<16x32xbf16>
    %cst_119 = arith.constant dense<0.000000e+00> : vector<16x32xf32>
    %242 = tpu.matmul %240, %225, %cst_119 {dimension_numbers = #tpu.dot_dimension_numbers<[1], [0], [0], [1], [0, 0, 1, 1], [], []>} : vector<16x32xbf16>, vector<32x32xbf16>, vector<16x32xf32> -> vector<16x32xf32>
    %243 = vector.broadcast %234 : vector<1x32xf32> to vector<16x32xf32>
    %244 = arith.addf %242, %243 : vector<16x32xf32>
    %cst_120 = arith.constant 0.176776692 : f32
    %245 = vector.broadcast %cst_120 : f32 to vector<16x32xf32>
    %246 = arith.mulf %244, %245 : vector<16x32xf32>
    %cst_121 = arith.constant dense<0.000000e+00> : vector<16x32xf32>
    %247 = tpu.matmul %241, %227, %cst_121 {dimension_numbers = #tpu.dot_dimension_numbers<[1], [0], [0], [1], [0, 0, 1, 1], [], []>} : vector<16x32xbf16>, vector<32x32xbf16>, vector<16x32xf32> -> vector<16x32xf32>
    %248 = vector.broadcast %235 : vector<1x32xf32> to vector<16x32xf32>
    %249 = arith.addf %247, %248 : vector<16x32xf32>
    %cst_122 = arith.constant dense<0.000000e+00> : vector<16x32xf32>
    %250 = tpu.matmul %241, %229, %cst_122 {dimension_numbers = #tpu.dot_dimension_numbers<[1], [0], [0], [1], [0, 0, 1, 1], [], []>} : vector<16x32xbf16>, vector<32x32xbf16>, vector<16x32xf32> -> vector<16x32xf32>
    %251 = vector.broadcast %236 : vector<1x32xf32> to vector<16x32xf32>
    %252 = arith.addf %250, %251 : vector<16x32xf32>
    %253 = vector.shape_cast %246 : vector<16x32xf32> to vector<2x8x32xf32>
    %254 = arith.truncf %253 : vector<2x8x32xf32> to vector<2x8x32xbf16>
    %255 = vector.shape_cast %249 : vector<16x32xf32> to vector<2x8x32xf32>
    %256 = arith.truncf %255 : vector<2x8x32xf32> to vector<2x8x32xbf16>
    %257 = vector.shape_cast %252 : vector<16x32xf32> to vector<2x8x32xf32>
    %258 = arith.truncf %257 : vector<2x8x32xf32> to vector<2x8x32xbf16>
    "tpu.trace_start"() <{level = 10 : i32, message = "bmc,bnc->bmn"}> : () -> ()
    %cst_123 = arith.constant dense<0.000000e+00> : vector<2x8x8xf32>
    %259 = tpu.matmul %254, %256, %cst_123 {dimension_numbers = #tpu.dot_dimension_numbers<[2], [2], [1], [1], [0, 0, 0, 1, 1, 1], [0], [0]>} : vector<2x8x32xbf16>, vector<2x8x32xbf16>, vector<2x8x8xf32> -> vector<2x8x8xf32>
    "tpu.trace_stop"() : () -> ()
    %cst_124 = arith.constant dense<0xFF800000> : vector<2x8xf32>
    %260 = vector.multi_reduction <maximumf>, %259, %cst_124 [2] : vector<2x8x8xf32> to vector<2x8xf32>
    %261 = vector.shape_cast %260 : vector<2x8xf32> to vector<2x8x1xf32>
    %262 = vector.broadcast %261 : vector<2x8x1xf32> to vector<2x8x8xf32>
    %263 = arith.subf %259, %262 : vector<2x8x8xf32>
    %264 = math.exp %263 : vector<2x8x8xf32>
    %cst_125 = arith.constant dense<0.000000e+00> : vector<2x8xf32>
    %265 = vector.multi_reduction <add>, %264, %cst_125 [2] : vector<2x8x8xf32> to vector<2x8xf32>
    %266 = vector.shape_cast %265 : vector<2x8xf32> to vector<2x8x1xf32>
    %267 = tpu.reciprocal %266 {approx = true} : vector<2x8x1xf32> -> vector<2x8x1xf32>
    %268 = vector.broadcast %267 : vector<2x8x1xf32> to vector<2x8x8xf32>
    %269 = arith.mulf %264, %268 : vector<2x8x8xf32>
    %270 = arith.truncf %269 : vector<2x8x8xf32> to vector<2x8x8xbf16>
    "tpu.trace_start"() <{level = 10 : i32, message = "bmn,bnc->bmc"}> : () -> ()
    %cst_126 = arith.constant dense<0.000000e+00> : vector<2x8x32xf32>
    %271 = tpu.matmul %270, %258, %cst_126 {dimension_numbers = #tpu.dot_dimension_numbers<[2], [1], [1], [2], [0, 0, 0, 1, 1, 2], [0], [0]>} : vector<2x8x8xbf16>, vector<2x8x32xbf16>, vector<2x8x32xf32> -> vector<2x8x32xf32>
    "tpu.trace_stop"() : () -> ()
    %272 = vector.shape_cast %271 : vector<2x8x32xf32> to vector<16x32xf32>
    %273 = arith.truncf %272 : vector<16x32xf32> to vector<16x32xbf16>
    %cst_127 = arith.constant dense<0.000000e+00> : vector<16x32xf32>
    %274 = tpu.matmul %273, %231, %cst_127 {dimension_numbers = #tpu.dot_dimension_numbers<[1], [0], [0], [1], [0, 0, 1, 1], [], []>} : vector<16x32xbf16>, vector<32x32xbf16>, vector<16x32xf32> -> vector<16x32xf32>
    %275 = vector.broadcast %237 : vector<1x32xf32> to vector<16x32xf32>
    %276 = arith.addf %274, %275 : vector<16x32xf32>
    %277 = arith.addf %223, %276 : vector<16x32xf32>
    %cst_128 = arith.constant dense<0.000000e+00> : vector<16xf32>
    %278 = vector.multi_reduction <add>, %277, %cst_128 [1] : vector<16x32xf32> to vector<16xf32>
    %279 = vector.shape_cast %278 : vector<16xf32> to vector<16x1xf32>
    %cst_129 = arith.constant 3.200000e+01 : f32
    %280 = vector.broadcast %cst_129 : f32 to vector<16x1xf32>
    %281 = arith.divf %279, %280 : vector<16x1xf32>
    %282 = vector.broadcast %281 : vector<16x1xf32> to vector<16x32xf32>
    %283 = arith.subf %277, %282 : vector<16x32xf32>
    %284 = arith.mulf %283, %283 : vector<16x32xf32>
    %cst_130 = arith.constant dense<0.000000e+00> : vector<16xf32>
    %285 = vector.multi_reduction <add>, %284, %cst_130 [1] : vector<16x32xf32> to vector<16xf32>
    %286 = vector.shape_cast %285 : vector<16xf32> to vector<16x1xf32>
    %cst_131 = arith.constant 3.200000e+01 : f32
    %287 = vector.broadcast %cst_131 : f32 to vector<16x1xf32>
    %288 = arith.divf %286, %287 : vector<16x1xf32>
    %cst_132 = arith.constant 9.99999974E-6 : f32
    %289 = vector.broadcast %cst_132 : f32 to vector<16x1xf32>
    %290 = arith.addf %288, %289 : vector<16x1xf32>
    %291 = math.rsqrt %290 : vector<16x1xf32>
    %292 = vector.broadcast %291 : vector<16x1xf32> to vector<16x32xf32>
    %293 = arith.mulf %283, %292 : vector<16x32xf32>
    %294 = vector.broadcast %238 : vector<1x32xf32> to vector<16x32xf32>
    %295 = arith.mulf %293, %294 : vector<16x32xf32>
    %296 = vector.broadcast %239 : vector<1x32xf32> to vector<16x32xf32>
    %297 = arith.addf %295, %296 : vector<16x32xf32>
    %298 = vector.shape_cast %297 : vector<16x32xf32> to vector<2x8x32xf32>
    %c0_133 = arith.constant 0 : index
    %c0_134 = arith.constant 0 : index
    %c0_135 = arith.constant 0 : index
    %299 = vector.load %arg5[%c0_133, %c0_134, %c0_135] : memref<2x8x32xf32, #tpu.memory_space<vmem>>, vector<2x8x32xf32>
    tpu.vector_store %arg5[%c0_133, %c0_134, %c0_135], %298 {strides = array<i32>} : memref<2x8x32xf32, #tpu.memory_space<vmem>>, vector<2x8x32xf32>,
    return
  }
  func.func @transform_0(%arg0: i32) -> (i32, i32, i32) {
    %c0_i32 = arith.constant 0 : i32
    %c0_i32_0 = arith.constant 0 : i32
    %c0_i32_1 = arith.constant 0 : i32
    return %arg0, %c0_i32, %c0_i32_0 : i32, i32, i32
  }
  func.func @transform_1(%arg0: i32) -> (i32, i32, i32) {
    %c0_i32 = arith.constant 0 : i32
    %c0_i32_0 = arith.constant 0 : i32
    %c0_i32_1 = arith.constant 0 : i32
    return %arg0, %c0_i32, %c0_i32_0 : i32, i32, i32
  }
  func.func @transform_2(%arg0: i32) -> (i32, i32, i32, i32) {
    %c0_i32 = arith.constant 0 : i32
    %c0_i32_0 = arith.constant 0 : i32
    %c0_i32_1 = arith.constant 0 : i32
    %c0_i32_2 = arith.constant 0 : i32
    %c0_i32_3 = arith.constant 0 : i32
    return %c0_i32, %c0_i32_0, %c0_i32_1, %c0_i32_2 : i32, i32, i32, i32
  }
  func.func @transform_3(%arg0: i32) -> (i32, i32, i32) {
    %c0_i32 = arith.constant 0 : i32
    %c0_i32_0 = arith.constant 0 : i32
    %c0_i32_1 = arith.constant 0 : i32
    %c0_i32_2 = arith.constant 0 : i32
    return %c0_i32, %c0_i32_0, %c0_i32_1 : i32, i32, i32
  }
  func.func @transform_4(%arg0: i32) -> (i32, i32, i32) {
    %c0_i32 = arith.constant 0 : i32
    %c0_i32_0 = arith.constant 0 : i32
    %c0_i32_1 = arith.constant 0 : i32
    return %arg0, %c0_i32, %c0_i32_0 : i32, i32, i32
  }
}

module attributes {stable_mosaic.version = 11 : i64} {
  func.func @_denoiser_kernel(%arg0: i32, %arg1: memref<2x8x32xf32, #tpu.memory_space<vmem>>, %arg2: memref<2x8x32xf32, #tpu.memory_space<vmem>>, %arg3: memref<4x4x32x32xbf16, #tpu.memory_space<vmem>>, %arg4: memref<4x6x32xf32, #tpu.memory_space<vmem>>, %arg5: memref<2x8x32xf32, #tpu.memory_space<vmem>>) attributes {dimension_semantics = [#tpu.dimension_semantics<parallel>], iteration_bounds = array<i64: 1>, scalar_prefetch = 0 : i64, scratch_operands = 0 : i64, tpu.core_type = #tpu.core_type<tc>, window_params = [{transform_indices = @transform_0, window_bounds = array<i64: 2, 8, 32>}, {transform_indices = @transform_1, window_bounds = array<i64: 2, 8, 32>}, {pipeline_mode = #tpu.pipeline_mode<synchronous>, transform_indices = @transform_2, window_bounds = array<i64: 4, 4, 32, 32>}, {pipeline_mode = #tpu.pipeline_mode<synchronous>, transform_indices = @transform_3, window_bounds = array<i64: 4, 6, 32>}, {transform_indices = @transform_4, window_bounds = array<i64: 2, 8, 32>}]} {
    %c0 = arith.constant 0 : index
    %c0_0 = arith.constant 0 : index
    %c0_1 = arith.constant 0 : index
    %0 = vector.load %arg1[%c0, %c0_0, %c0_1] : memref<2x8x32xf32, #tpu.memory_space<vmem>>, vector<2x8x32xf32>
    %1 = vector.shape_cast %0 : vector<2x8x32xf32> to vector<16x32xf32>
    %c0_2 = arith.constant 0 : index
    %c0_3 = arith.constant 0 : index
    %c0_4 = arith.constant 0 : index
    %2 = vector.load %arg2[%c0_2, %c0_3, %c0_4] : memref<2x8x32xf32, #tpu.memory_space<vmem>>, vector<2x8x32xf32>
    %3 = vector.shape_cast %2 : vector<2x8x32xf32> to vector<16x32xf32>
    %c0_5 = arith.constant 0 : index
    %c0_6 = arith.constant 0 : index
    %c0_7 = arith.constant 0 : index
    %c0_8 = arith.constant 0 : index
    %4 = vector.load %arg3[%c0_5, %c0_6, %c0_7, %c0_8] : memref<4x4x32x32xbf16, #tpu.memory_space<vmem>>, vector<1x1x32x32xbf16>
    %5 = vector.shape_cast %4 : vector<1x1x32x32xbf16> to vector<32x32xbf16>
    %c0_9 = arith.constant 0 : index
    %c1 = arith.constant 1 : index
    %c0_10 = arith.constant 0 : index
    %c0_11 = arith.constant 0 : index
    %6 = vector.load %arg3[%c0_9, %c1, %c0_10, %c0_11] : memref<4x4x32x32xbf16, #tpu.memory_space<vmem>>, vector<1x1x32x32xbf16>
    %7 = vector.shape_cast %6 : vector<1x1x32x32xbf16> to vector<32x32xbf16>
    %c0_12 = arith.constant 0 : index
    %c2 = arith.constant 2 : index
    %c0_13 = arith.constant 0 : index
    %c0_14 = arith.constant 0 : index
    %8 = vector.load %arg3[%c0_12, %c2, %c0_13, %c0_14] : memref<4x4x32x32xbf16, #tpu.memory_space<vmem>>, vector<1x1x32x32xbf16>
    %9 = vector.shape_cast %8 : vector<1x1x32x32xbf16> to vector<32x32xbf16>
    %c0_15 = arith.constant 0 : index
    %c3 = arith.constant 3 : index
    %c0_16 = arith.constant 0 : index
    %c0_17 = arith.constant 0 : index
    %10 = vector.load %arg3[%c0_15, %c3, %c0_16, %c0_17] : memref<4x4x32x32xbf16, #tpu.memory_space<vmem>>, vector<1x1x32x32xbf16>
    %11 = vector.shape_cast %10 : vector<1x1x32x32xbf16> to vector<32x32xbf16>
    %c0_18 = arith.constant 0 : index
    %c0_19 = arith.constant 0 : index
    %c0_20 = arith.constant 0 : index
    %12 = vector.load %arg4[%c0_18, %c0_19, %c0_20] : memref<4x6x32xf32, #tpu.memory_space<vmem>>, vector<1x6x32xf32>
    %13 = vector.shape_cast %12 : vector<1x6x32xf32> to vector<6x32xf32>
    %14 = vector.extract_strided_slice %13 {offsets = [0, 0], sizes = [1, 32], strides = [1, 1]} : vector<6x32xf32> to vector<1x32xf32>
    %15 = vector.extract_strided_slice %13 {offsets = [1, 0], sizes = [1, 32], strides = [1, 1]} : vector<6x32xf32> to vector<1x32xf32>
    %16 = vector.extract_strided_slice %13 {offsets = [2, 0], sizes = [1, 32], strides = [1, 1]} : vector<6x32xf32> to vector<1x32xf32>
    %17 = vector.extract_strided_slice %13 {offsets = [3, 0], sizes = [1, 32], strides = [1, 1]} : vector<6x32xf32> to vector<1x32xf32>
    %18 = vector.extract_strided_slice %13 {offsets = [4, 0], sizes = [1, 32], strides = [1, 1]} : vector<6x32xf32> to vector<1x32xf32>
    %19 = vector.extract_strided_slice %13 {offsets = [5, 0], sizes = [1, 32], strides = [1, 1]} : vector<6x32xf32> to vector<1x32xf32>
    %20 = arith.truncf %1 : vector<16x32xf32> to vector<16x32xbf16>
    %cst = arith.constant dense<0.000000e+00> : vector<16x32xf32>
    %21 = tpu.matmul %20, %5, %cst {dimension_numbers = #tpu.dot_dimension_numbers<[1], [0], [0], [1], [0, 0, 1, 1], [], []>} : vector<16x32xbf16>, vector<32x32xbf16>, vector<16x32xf32> -> vector<16x32xf32>
    %22 = vector.broadcast %14 : vector<1x32xf32> to vector<16x32xf32>
    %23 = arith.addf %21, %22 : vector<16x32xf32>
    %cst_21 = arith.constant 0.176776692 : f32
    %24 = vector.broadcast %cst_21 : f32 to vector<16x32xf32>
    %25 = arith.mulf %23, %24 : vector<16x32xf32>
    %cst_22 = arith.constant dense<0.000000e+00> : vector<16x32xf32>
    %26 = tpu.matmul %20, %7, %cst_22 {dimension_numbers = #tpu.dot_dimension_numbers<[1], [0], [0], [1], [0, 0, 1, 1], [], []>} : vector<16x32xbf16>, vector<32x32xbf16>, vector<16x32xf32> -> vector<16x32xf32>
    %27 = vector.broadcast %15 : vector<1x32xf32> to vector<16x32xf32>
    %28 = arith.addf %26, %27 : vector<16x32xf32>
    %cst_23 = arith.constant dense<0.000000e+00> : vector<16x32xf32>
    %29 = tpu.matmul %20, %9, %cst_23 {dimension_numbers = #tpu.dot_dimension_numbers<[1], [0], [0], [1], [0, 0, 1, 1], [], []>} : vector<16x32xbf16>, vector<32x32xbf16>, vector<16x32xf32> -> vector<16x32xf32>
    %30 = vector.broadcast %16 : vector<1x32xf32> to vector<16x32xf32>
    %31 = arith.addf %29, %30 : vector<16x32xf32>
    %32 = vector.shape_cast %25 : vector<16x32xf32> to vector<2x8x32xf32>
    %33 = arith.truncf %32 : vector<2x8x32xf32> to vector<2x8x32xbf16>
    %34 = vector.shape_cast %28 : vector<16x32xf32> to vector<2x8x32xf32>
    %35 = arith.truncf %34 : vector<2x8x32xf32> to vector<2x8x32xbf16>
    %36 = vector.shape_cast %31 : vector<16x32xf32> to vector<2x8x32xf32>
    %37 = arith.truncf %36 : vector<2x8x32xf32> to vector<2x8x32xbf16>
    "tpu.trace_start"() <{level = 10 : i32, message = "bmc,bnc->bmn"}> : () -> ()
    %cst_24 = arith.constant dense<0.000000e+00> : vector<2x8x8xf32>
    %38 = tpu.matmul %33, %35, %cst_24 {dimension_numbers = #tpu.dot_dimension_numbers<[2], [2], [1], [1], [0, 0, 0, 1, 1, 1], [0], [0]>} : vector<2x8x32xbf16>, vector<2x8x32xbf16>, vector<2x8x8xf32> -> vector<2x8x8xf32>
    "tpu.trace_stop"() : () -> ()
    %cst_25 = arith.constant dense<0xFF800000> : vector<2x8xf32>
    %39 = vector.multi_reduction <maximumf>, %38, %cst_25 [2] : vector<2x8x8xf32> to vector<2x8xf32>
    %40 = vector.shape_cast %39 : vector<2x8xf32> to vector<2x8x1xf32>
    %41 = vector.broadcast %40 : vector<2x8x1xf32> to vector<2x8x8xf32>
    %42 = arith.subf %38, %41 : vector<2x8x8xf32>
    %43 = math.exp %42 : vector<2x8x8xf32>
    %cst_26 = arith.constant dense<0.000000e+00> : vector<2x8xf32>
    %44 = vector.multi_reduction <add>, %43, %cst_26 [2] : vector<2x8x8xf32> to vector<2x8xf32>
    %45 = vector.shape_cast %44 : vector<2x8xf32> to vector<2x8x1xf32>
    %46 = tpu.reciprocal %45 {approx = true} : vector<2x8x1xf32> -> vector<2x8x1xf32>
    %47 = vector.broadcast %46 : vector<2x8x1xf32> to vector<2x8x8xf32>
    %48 = arith.mulf %43, %47 : vector<2x8x8xf32>
    %49 = arith.truncf %48 : vector<2x8x8xf32> to vector<2x8x8xbf16>
    "tpu.trace_start"() <{level = 10 : i32, message = "bmn,bnc->bmc"}> : () -> ()
    %cst_27 = arith.constant dense<0.000000e+00> : vector<2x8x32xf32>
    %50 = tpu.matmul %49, %37, %cst_27 {dimension_numbers = #tpu.dot_dimension_numbers<[2], [1], [1], [2], [0, 0, 0, 1, 1, 2], [0], [0]>} : vector<2x8x8xbf16>, vector<2x8x32xbf16>, vector<2x8x32xf32> -> vector<2x8x32xf32>
    "tpu.trace_stop"() : () -> ()
    %51 = vector.shape_cast %50 : vector<2x8x32xf32> to vector<16x32xf32>
    %52 = arith.truncf %51 : vector<16x32xf32> to vector<16x32xbf16>
    %cst_28 = arith.constant dense<0.000000e+00> : vector<16x32xf32>
    %53 = tpu.matmul %52, %11, %cst_28 {dimension_numbers = #tpu.dot_dimension_numbers<[1], [0], [0], [1], [0, 0, 1, 1], [], []>} : vector<16x32xbf16>, vector<32x32xbf16>, vector<16x32xf32> -> vector<16x32xf32>
    %54 = vector.broadcast %17 : vector<1x32xf32> to vector<16x32xf32>
    %55 = arith.addf %53, %54 : vector<16x32xf32>
    %56 = arith.addf %1, %55 : vector<16x32xf32>
    %cst_29 = arith.constant dense<0.000000e+00> : vector<16xf32>
    %57 = vector.multi_reduction <add>, %56, %cst_29 [1] : vector<16x32xf32> to vector<16xf32>
    %58 = vector.shape_cast %57 : vector<16xf32> to vector<16x1xf32>
    %cst_30 = arith.constant 3.200000e+01 : f32
    %59 = vector.broadcast %cst_30 : f32 to vector<16x1xf32>
    %60 = arith.divf %58, %59 : vector<16x1xf32>
    %61 = vector.broadcast %60 : vector<16x1xf32> to vector<16x32xf32>
    %62 = arith.subf %56, %61 : vector<16x32xf32>
    %63 = arith.mulf %62, %62 : vector<16x32xf32>
    %cst_31 = arith.constant dense<0.000000e+00> : vector<16xf32>
    %64 = vector.multi_reduction <add>, %63, %cst_31 [1] : vector<16x32xf32> to vector<16xf32>
    %65 = vector.shape_cast %64 : vector<16xf32> to vector<16x1xf32>
    %cst_32 = arith.constant 3.200000e+01 : f32
    %66 = vector.broadcast %cst_32 : f32 to vector<16x1xf32>
    %67 = arith.divf %65, %66 : vector<16x1xf32>
    %cst_33 = arith.constant 9.99999974E-6 : f32
    %68 = vector.broadcast %cst_33 : f32 to vector<16x1xf32>
    %69 = arith.addf %67, %68 : vector<16x1xf32>
    %70 = math.rsqrt %69 : vector<16x1xf32>
    %71 = vector.broadcast %70 : vector<16x1xf32> to vector<16x32xf32>
    %72 = arith.mulf %62, %71 : vector<16x32xf32>
    %73 = vector.broadcast %18 : vector<1x32xf32> to vector<16x32xf32>
    %74 = arith.mulf %72, %73 : vector<16x32xf32>
    %75 = vector.broadcast %19 : vector<1x32xf32> to vector<16x32xf32>
    %76 = arith.addf %74, %75 : vector<16x32xf32>
    %c1_34 = arith.constant 1 : index
    %c0_35 = arith.constant 0 : index
    %c0_36 = arith.constant 0 : index
    %c0_37 = arith.constant 0 : index
    %77 = vector.load %arg3[%c1_34, %c0_35, %c0_36, %c0_37] : memref<4x4x32x32xbf16, #tpu.memory_space<vmem>>, vector<1x1x32x32xbf16>
    %78 = vector.shape_cast %77 : vector<1x1x32x32xbf16> to vector<32x32xbf16>
    %c1_38 = arith.constant 1 : index
    %c1_39 = arith.constant 1 : index
    %c0_40 = arith.constant 0 : index
    %c0_41 = arith.constant 0 : index
    %79 = vector.load %arg3[%c1_38, %c1_39, %c0_40, %c0_41] : memref<4x4x32x32xbf16, #tpu.memory_space<vmem>>, vector<1x1x32x32xbf16>
    %80 = vector.shape_cast %79 : vector<1x1x32x32xbf16> to vector<32x32xbf16>
    %c1_42 = arith.constant 1 : index
    %c2_43 = arith.constant 2 : index
    %c0_44 = arith.constant 0 : index
    %c0_45 = arith.constant 0 : index
    %81 = vector.load %arg3[%c1_42, %c2_43, %c0_44, %c0_45] : memref<4x4x32x32xbf16, #tpu.memory_space<vmem>>, vector<1x1x32x32xbf16>
    %82 = vector.shape_cast %81 : vector<1x1x32x32xbf16> to vector<32x32xbf16>
    %c1_46 = arith.constant 1 : index
    %c3_47 = arith.constant 3 : index
    %c0_48 = arith.constant 0 : index
    %c0_49 = arith.constant 0 : index
    %83 = vector.load %arg3[%c1_46, %c3_47, %c0_48, %c0_49] : memref<4x4x32x32xbf16, #tpu.memory_space<vmem>>, vector<1x1x32x32xbf16>
    %84 = vector.shape_cast %83 : vector<1x1x32x32xbf16> to vector<32x32xbf16>
    %c1_50 = arith.constant 1 : index
    %c0_51 = arith.constant 0 : index
    %c0_52 = arith.constant 0 : index
    %85 = vector.load %arg4[%c1_50, %c0_51, %c0_52] : memref<4x6x32xf32, #tpu.memory_space<vmem>>, vector<1x6x32xf32>
    %86 = vector.shape_cast %85 : vector<1x6x32xf32> to vector<6x32xf32>
    %87 = vector.extract_strided_slice %86 {offsets = [0, 0], sizes = [1, 32], strides = [1, 1]} : vector<6x32xf32> to vector<1x32xf32>
    %88 = vector.extract_strided_slice %86 {offsets = [1, 0], sizes = [1, 32], strides = [1, 1]} : vector<6x32xf32> to vector<1x32xf32>
    %89 = vector.extract_strided_slice %86 {offsets = [2, 0], sizes = [1, 32], strides = [1, 1]} : vector<6x32xf32> to vector<1x32xf32>
    %90 = vector.extract_strided_slice %86 {offsets = [3, 0], sizes = [1, 32], strides = [1, 1]} : vector<6x32xf32> to vector<1x32xf32>
    %91 = vector.extract_strided_slice %86 {offsets = [4, 0], sizes = [1, 32], strides = [1, 1]} : vector<6x32xf32> to vector<1x32xf32>
    %92 = vector.extract_strided_slice %86 {offsets = [5, 0], sizes = [1, 32], strides = [1, 1]} : vector<6x32xf32> to vector<1x32xf32>
    %93 = arith.truncf %76 : vector<16x32xf32> to vector<16x32xbf16>
    %94 = arith.truncf %3 : vector<16x32xf32> to vector<16x32xbf16>
    %cst_53 = arith.constant dense<0.000000e+00> : vector<16x32xf32>
    %95 = tpu.matmul %93, %78, %cst_53 {dimension_numbers = #tpu.dot_dimension_numbers<[1], [0], [0], [1], [0, 0, 1, 1], [], []>} : vector<16x32xbf16>, vector<32x32xbf16>, vector<16x32xf32> -> vector<16x32xf32>
    %96 = vector.broadcast %87 : vector<1x32xf32> to vector<16x32xf32>
    %97 = arith.addf %95, %96 : vector<16x32xf32>
    %cst_54 = arith.constant 0.176776692 : f32
    %98 = vector.broadcast %cst_54 : f32 to vector<16x32xf32>
    %99 = arith.mulf %97, %98 : vector<16x32xf32>
    %cst_55 = arith.constant dense<0.000000e+00> : vector<16x32xf32>
    %100 = tpu.matmul %94, %80, %cst_55 {dimension_numbers = #tpu.dot_dimension_numbers<[1], [0], [0], [1], [0, 0, 1, 1], [], []>} : vector<16x32xbf16>, vector<32x32xbf16>, vector<16x32xf32> -> vector<16x32xf32>
    %101 = vector.broadcast %88 : vector<1x32xf32> to vector<16x32xf32>
    %102 = arith.addf %100, %101 : vector<16x32xf32>
    %cst_56 = arith.constant dense<0.000000e+00> : vector<16x32xf32>
    %103 = tpu.matmul %94, %82, %cst_56 {dimension_numbers = #tpu.dot_dimension_numbers<[1], [0], [0], [1], [0, 0, 1, 1], [], []>} : vector<16x32xbf16>, vector<32x32xbf16>, vector<16x32xf32> -> vector<16x32xf32>
    %104 = vector.broadcast %89 : vector<1x32xf32> to vector<16x32xf32>
    %105 = arith.addf %103, %104 : vector<16x32xf32>
    %106 = vector.shape_cast %99 : vector<16x32xf32> to vector<2x8x32xf32>
    %107 = arith.truncf %106 : vector<2x8x32xf32> to vector<2x8x32xbf16>
    %108 = vector.shape_cast %102 : vector<16x32xf32> to vector<2x8x32xf32>
    %109 = arith.truncf %108 : vector<2x8x32xf32> to vector<2x8x32xbf16>
    %110 = vector.shape_cast %105 : vector<16x32xf32> to vector<2x8x32xf32>
    %111 = arith.truncf %110 : vector<2x8x32xf32> to vector<2x8x32xbf16>
    "tpu.trace_start"() <{level = 10 : i32, message = "bmc,bnc->bmn"}> : () -> ()
    %cst_57 = arith.constant dense<0.000000e+00> : vector<2x8x8xf32>
    %112 = tpu.matmul %107, %109, %cst_57 {dimension_numbers = #tpu.dot_dimension_numbers<[2], [2], [1], [1], [0, 0, 0, 1, 1, 1], [0], [0]>} : vector<2x8x32xbf16>, vector<2x8x32xbf16>, vector<2x8x8xf32> -> vector<2x8x8xf32>
    "tpu.trace_stop"() : () -> ()
    %cst_58 = arith.constant dense<0xFF800000> : vector<2x8xf32>
    %113 = vector.multi_reduction <maximumf>, %112, %cst_58 [2] : vector<2x8x8xf32> to vector<2x8xf32>
    %114 = vector.shape_cast %113 : vector<2x8xf32> to vector<2x8x1xf32>
    %115 = vector.broadcast %114 : vector<2x8x1xf32> to vector<2x8x8xf32>
    %116 = arith.subf %112, %115 : vector<2x8x8xf32>
    %117 = math.exp %116 : vector<2x8x8xf32>
    %cst_59 = arith.constant dense<0.000000e+00> : vector<2x8xf32>
    %118 = vector.multi_reduction <add>, %117, %cst_59 [2] : vector<2x8x8xf32> to vector<2x8xf32>
    %119 = vector.shape_cast %118 : vector<2x8xf32> to vector<2x8x1xf32>
    %120 = tpu.reciprocal %119 {approx = true} : vector<2x8x1xf32> -> vector<2x8x1xf32>
    %121 = vector.broadcast %120 : vector<2x8x1xf32> to vector<2x8x8xf32>
    %122 = arith.mulf %117, %121 : vector<2x8x8xf32>
    %123 = arith.truncf %122 : vector<2x8x8xf32> to vector<2x8x8xbf16>
    "tpu.trace_start"() <{level = 10 : i32, message = "bmn,bnc->bmc"}> : () -> ()
    %cst_60 = arith.constant dense<0.000000e+00> : vector<2x8x32xf32>
    %124 = tpu.matmul %123, %111, %cst_60 {dimension_numbers = #tpu.dot_dimension_numbers<[2], [1], [1], [2], [0, 0, 0, 1, 1, 2], [0], [0]>} : vector<2x8x8xbf16>, vector<2x8x32xbf16>, vector<2x8x32xf32> -> vector<2x8x32xf32>
    "tpu.trace_stop"() : () -> ()
    %125 = vector.shape_cast %124 : vector<2x8x32xf32> to vector<16x32xf32>
    %126 = arith.truncf %125 : vector<16x32xf32> to vector<16x32xbf16>
    %cst_61 = arith.constant dense<0.000000e+00> : vector<16x32xf32>
    %127 = tpu.matmul %126, %84, %cst_61 {dimension_numbers = #tpu.dot_dimension_numbers<[1], [0], [0], [1], [0, 0, 1, 1], [], []>} : vector<16x32xbf16>, vector<32x32xbf16>, vector<16x32xf32> -> vector<16x32xf32>
    %128 = vector.broadcast %90 : vector<1x32xf32> to vector<16x32xf32>
    %129 = arith.addf %127, %128 : vector<16x32xf32>
    %130 = arith.addf %76, %129 : vector<16x32xf32>
    %cst_62 = arith.constant dense<0.000000e+00> : vector<16xf32>
    %131 = vector.multi_reduction <add>, %130, %cst_62 [1] : vector<16x32xf32> to vector<16xf32>
    %132 = vector.shape_cast %131 : vector<16xf32> to vector<16x1xf32>
    %cst_63 = arith.constant 3.200000e+01 : f32
    %133 = vector.broadcast %cst_63 : f32 to vector<16x1xf32>
    %134 = arith.divf %132, %133 : vector<16x1xf32>
    %135 = vector.broadcast %134 : vector<16x1xf32> to vector<16x32xf32>
    %136 = arith.subf %130, %135 : vector<16x32xf32>
    %137 = arith.mulf %136, %136 : vector<16x32xf32>
    %cst_64 = arith.constant dense<0.000000e+00> : vector<16xf32>
    %138 = vector.multi_reduction <add>, %137, %cst_64 [1] : vector<16x32xf32> to vector<16xf32>
    %139 = vector.shape_cast %138 : vector<16xf32> to vector<16x1xf32>
    %cst_65 = arith.constant 3.200000e+01 : f32
    %140 = vector.broadcast %cst_65 : f32 to vector<16x1xf32>
    %141 = arith.divf %139, %140 : vector<16x1xf32>
    %cst_66 = arith.constant 9.99999974E-6 : f32
    %142 = vector.broadcast %cst_66 : f32 to vector<16x1xf32>
    %143 = arith.addf %141, %142 : vector<16x1xf32>
    %144 = math.rsqrt %143 : vector<16x1xf32>
    %145 = vector.broadcast %144 : vector<16x1xf32> to vector<16x32xf32>
    %146 = arith.mulf %136, %145 : vector<16x32xf32>
    %147 = vector.broadcast %91 : vector<1x32xf32> to vector<16x32xf32>
    %148 = arith.mulf %146, %147 : vector<16x32xf32>
    %149 = vector.broadcast %92 : vector<1x32xf32> to vector<16x32xf32>
    %150 = arith.addf %148, %149 : vector<16x32xf32>
    %c2_67 = arith.constant 2 : index
    %c0_68 = arith.constant 0 : index
    %c0_69 = arith.constant 0 : index
    %c0_70 = arith.constant 0 : index
    %151 = vector.load %arg3[%c2_67, %c0_68, %c0_69, %c0_70] : memref<4x4x32x32xbf16, #tpu.memory_space<vmem>>, vector<1x1x32x32xbf16>
    %152 = vector.shape_cast %151 : vector<1x1x32x32xbf16> to vector<32x32xbf16>
    %c2_71 = arith.constant 2 : index
    %c1_72 = arith.constant 1 : index
    %c0_73 = arith.constant 0 : index
    %c0_74 = arith.constant 0 : index
    %153 = vector.load %arg3[%c2_71, %c1_72, %c0_73, %c0_74] : memref<4x4x32x32xbf16, #tpu.memory_space<vmem>>, vector<1x1x32x32xbf16>
    %154 = vector.shape_cast %153 : vector<1x1x32x32xbf16> to vector<32x32xbf16>
    %c2_75 = arith.constant 2 : index
    %c2_76 = arith.constant 2 : index
    %c0_77 = arith.constant 0 : index
    %c0_78 = arith.constant 0 : index
    %155 = vector.load %arg3[%c2_75, %c2_76, %c0_77, %c0_78] : memref<4x4x32x32xbf16, #tpu.memory_space<vmem>>, vector<1x1x32x32xbf16>
    %156 = vector.shape_cast %155 : vector<1x1x32x32xbf16> to vector<32x32xbf16>
    %c2_79 = arith.constant 2 : index
    %c3_80 = arith.constant 3 : index
    %c0_81 = arith.constant 0 : index
    %c0_82 = arith.constant 0 : index
    %157 = vector.load %arg3[%c2_79, %c3_80, %c0_81, %c0_82] : memref<4x4x32x32xbf16, #tpu.memory_space<vmem>>, vector<1x1x32x32xbf16>
    %158 = vector.shape_cast %157 : vector<1x1x32x32xbf16> to vector<32x32xbf16>
    %c2_83 = arith.constant 2 : index
    %c0_84 = arith.constant 0 : index
    %c0_85 = arith.constant 0 : index
    %159 = vector.load %arg4[%c2_83, %c0_84, %c0_85] : memref<4x6x32xf32, #tpu.memory_space<vmem>>, vector<1x6x32xf32>
    %160 = vector.shape_cast %159 : vector<1x6x32xf32> to vector<6x32xf32>
    %161 = vector.extract_strided_slice %160 {offsets = [0, 0], sizes = [1, 32], strides = [1, 1]} : vector<6x32xf32> to vector<1x32xf32>
    %162 = vector.extract_strided_slice %160 {offsets = [1, 0], sizes = [1, 32], strides = [1, 1]} : vector<6x32xf32> to vector<1x32xf32>
    %163 = vector.extract_strided_slice %160 {offsets = [2, 0], sizes = [1, 32], strides = [1, 1]} : vector<6x32xf32> to vector<1x32xf32>
    %164 = vector.extract_strided_slice %160 {offsets = [3, 0], sizes = [1, 32], strides = [1, 1]} : vector<6x32xf32> to vector<1x32xf32>
    %165 = vector.extract_strided_slice %160 {offsets = [4, 0], sizes = [1, 32], strides = [1, 1]} : vector<6x32xf32> to vector<1x32xf32>
    %166 = vector.extract_strided_slice %160 {offsets = [5, 0], sizes = [1, 32], strides = [1, 1]} : vector<6x32xf32> to vector<1x32xf32>
    %167 = arith.truncf %150 : vector<16x32xf32> to vector<16x32xbf16>
    %cst_86 = arith.constant dense<0.000000e+00> : vector<16x32xf32>
    %168 = tpu.matmul %167, %152, %cst_86 {dimension_numbers = #tpu.dot_dimension_numbers<[1], [0], [0], [1], [0, 0, 1, 1], [], []>} : vector<16x32xbf16>, vector<32x32xbf16>, vector<16x32xf32> -> vector<16x32xf32>
    %169 = vector.broadcast %161 : vector<1x32xf32> to vector<16x32xf32>
    %170 = arith.addf %168, %169 : vector<16x32xf32>
    %cst_87 = arith.constant 0.176776692 : f32
    %171 = vector.broadcast %cst_87 : f32 to vector<16x32xf32>
    %172 = arith.mulf %170, %171 : vector<16x32xf32>
    %cst_88 = arith.constant dense<0.000000e+00> : vector<16x32xf32>
    %173 = tpu.matmul %167, %154, %cst_88 {dimension_numbers = #tpu.dot_dimension_numbers<[1], [0], [0], [1], [0, 0, 1, 1], [], []>} : vector<16x32xbf16>, vector<32x32xbf16>, vector<16x32xf32> -> vector<16x32xf32>
    %174 = vector.broadcast %162 : vector<1x32xf32> to vector<16x32xf32>
    %175 = arith.addf %173, %174 : vector<16x32xf32>
    %cst_89 = arith.constant dense<0.000000e+00> : vector<16x32xf32>
    %176 = tpu.matmul %167, %156, %cst_89 {dimension_numbers = #tpu.dot_dimension_numbers<[1], [0], [0], [1], [0, 0, 1, 1], [], []>} : vector<16x32xbf16>, vector<32x32xbf16>, vector<16x32xf32> -> vector<16x32xf32>
    %177 = vector.broadcast %163 : vector<1x32xf32> to vector<16x32xf32>
    %178 = arith.addf %176, %177 : vector<16x32xf32>
    %179 = vector.shape_cast %172 : vector<16x32xf32> to vector<2x8x32xf32>
    %180 = arith.truncf %179 : vector<2x8x32xf32> to vector<2x8x32xbf16>
    %181 = vector.shape_cast %175 : vector<16x32xf32> to vector<2x8x32xf32>
    %182 = arith.truncf %181 : vector<2x8x32xf32> to vector<2x8x32xbf16>
    %183 = vector.shape_cast %178 : vector<16x32xf32> to vector<2x8x32xf32>
    %184 = arith.truncf %183 : vector<2x8x32xf32> to vector<2x8x32xbf16>
    "tpu.trace_start"() <{level = 10 : i32, message = "bmc,bnc->bmn"}> : () -> ()
    %cst_90 = arith.constant dense<0.000000e+00> : vector<2x8x8xf32>
    %185 = tpu.matmul %180, %182, %cst_90 {dimension_numbers = #tpu.dot_dimension_numbers<[2], [2], [1], [1], [0, 0, 0, 1, 1, 1], [0], [0]>} : vector<2x8x32xbf16>, vector<2x8x32xbf16>, vector<2x8x8xf32> -> vector<2x8x8xf32>
    "tpu.trace_stop"() : () -> ()
    %cst_91 = arith.constant dense<0xFF800000> : vector<2x8xf32>
    %186 = vector.multi_reduction <maximumf>, %185, %cst_91 [2] : vector<2x8x8xf32> to vector<2x8xf32>
    %187 = vector.shape_cast %186 : vector<2x8xf32> to vector<2x8x1xf32>
    %188 = vector.broadcast %187 : vector<2x8x1xf32> to vector<2x8x8xf32>
    %189 = arith.subf %185, %188 : vector<2x8x8xf32>
    %190 = math.exp %189 : vector<2x8x8xf32>
    %cst_92 = arith.constant dense<0.000000e+00> : vector<2x8xf32>
    %191 = vector.multi_reduction <add>, %190, %cst_92 [2] : vector<2x8x8xf32> to vector<2x8xf32>
    %192 = vector.shape_cast %191 : vector<2x8xf32> to vector<2x8x1xf32>
    %193 = tpu.reciprocal %192 {approx = true} : vector<2x8x1xf32> -> vector<2x8x1xf32>
    %194 = vector.broadcast %193 : vector<2x8x1xf32> to vector<2x8x8xf32>
    %195 = arith.mulf %190, %194 : vector<2x8x8xf32>
    %196 = arith.truncf %195 : vector<2x8x8xf32> to vector<2x8x8xbf16>
    "tpu.trace_start"() <{level = 10 : i32, message = "bmn,bnc->bmc"}> : () -> ()
    %cst_93 = arith.constant dense<0.000000e+00> : vector<2x8x32xf32>
    %197 = tpu.matmul %196, %184, %cst_93 {dimension_numbers = #tpu.dot_dimension_numbers<[2], [1], [1], [2], [0, 0, 0, 1, 1, 2], [0], [0]>} : vector<2x8x8xbf16>, vector<2x8x32xbf16>, vector<2x8x32xf32> -> vector<2x8x32xf32>
    "tpu.trace_stop"() : () -> ()
    %198 = vector.shape_cast %197 : vector<2x8x32xf32> to vector<16x32xf32>
    %199 = arith.truncf %198 : vector<16x32xf32> to vector<16x32xbf16>
    %cst_94 = arith.constant dense<0.000000e+00> : vector<16x32xf32>
    %200 = tpu.matmul %199, %158, %cst_94 {dimension_numbers = #tpu.dot_dimension_numbers<[1], [0], [0], [1], [0, 0, 1, 1], [], []>} : vector<16x32xbf16>, vector<32x32xbf16>, vector<16x32xf32> -> vector<16x32xf32>
    %201 = vector.broadcast %164 : vector<1x32xf32> to vector<16x32xf32>
    %202 = arith.addf %200, %201 : vector<16x32xf32>
    %203 = arith.addf %150, %202 : vector<16x32xf32>
    %cst_95 = arith.constant dense<0.000000e+00> : vector<16xf32>
    %204 = vector.multi_reduction <add>, %203, %cst_95 [1] : vector<16x32xf32> to vector<16xf32>
    %205 = vector.shape_cast %204 : vector<16xf32> to vector<16x1xf32>
    %cst_96 = arith.constant 3.200000e+01 : f32
    %206 = vector.broadcast %cst_96 : f32 to vector<16x1xf32>
    %207 = arith.divf %205, %206 : vector<16x1xf32>
    %208 = vector.broadcast %207 : vector<16x1xf32> to vector<16x32xf32>
    %209 = arith.subf %203, %208 : vector<16x32xf32>
    %210 = arith.mulf %209, %209 : vector<16x32xf32>
    %cst_97 = arith.constant dense<0.000000e+00> : vector<16xf32>
    %211 = vector.multi_reduction <add>, %210, %cst_97 [1] : vector<16x32xf32> to vector<16xf32>
    %212 = vector.shape_cast %211 : vector<16xf32> to vector<16x1xf32>
    %cst_98 = arith.constant 3.200000e+01 : f32
    %213 = vector.broadcast %cst_98 : f32 to vector<16x1xf32>
    %214 = arith.divf %212, %213 : vector<16x1xf32>
    %cst_99 = arith.constant 9.99999974E-6 : f32
    %215 = vector.broadcast %cst_99 : f32 to vector<16x1xf32>
    %216 = arith.addf %214, %215 : vector<16x1xf32>
    %217 = math.rsqrt %216 : vector<16x1xf32>
    %218 = vector.broadcast %217 : vector<16x1xf32> to vector<16x32xf32>
    %219 = arith.mulf %209, %218 : vector<16x32xf32>
    %220 = vector.broadcast %165 : vector<1x32xf32> to vector<16x32xf32>
    %221 = arith.mulf %219, %220 : vector<16x32xf32>
    %222 = vector.broadcast %166 : vector<1x32xf32> to vector<16x32xf32>
    %223 = arith.addf %221, %222 : vector<16x32xf32>
    %c3_100 = arith.constant 3 : index
    %c0_101 = arith.constant 0 : index
    %c0_102 = arith.constant 0 : index
    %c0_103 = arith.constant 0 : index
    %224 = vector.load %arg3[%c3_100, %c0_101, %c0_102, %c0_103] : memref<4x4x32x32xbf16, #tpu.memory_space<vmem>>, vector<1x1x32x32xbf16>
    %225 = vector.shape_cast %224 : vector<1x1x32x32xbf16> to vector<32x32xbf16>
    %c3_104 = arith.constant 3 : index
    %c1_105 = arith.constant 1 : index
    %c0_106 = arith.constant 0 : index
    %c0_107 = arith.constant 0 : index
    %226 = vector.load %arg3[%c3_104, %c1_105, %c0_106, %c0_107] : memref<4x4x32x32xbf16, #tpu.memory_space<vmem>>, vector<1x1x32x32xbf16>
    %227 = vector.shape_cast %226 : vector<1x1x32x32xbf16> to vector<32x32xbf16>
    %c3_108 = arith.constant 3 : index
    %c2_109 = arith.constant 2 : index
    %c0_110 = arith.constant 0 : index
    %c0_111 = arith.constant 0 : index
    %228 = vector.load %arg3[%c3_108, %c2_109, %c0_110, %c0_111] : memref<4x4x32x32xbf16, #tpu.memory_space<vmem>>, vector<1x1x32x32xbf16>
    %229 = vector.shape_cast %228 : vector<1x1x32x32xbf16> to vector<32x32xbf16>
    %c3_112 = arith.constant 3 : index
    %c3_113 = arith.constant 3 : index
    %c0_114 = arith.constant 0 : index
    %c0_115 = arith.constant 0 : index
    %230 = vector.load %arg3[%c3_112, %c3_113, %c0_114, %c0_115] : memref<4x4x32x32xbf16, #tpu.memory_space<vmem>>, vector<1x1x32x32xbf16>
    %231 = vector.shape_cast %230 : vector<1x1x32x32xbf16> to vector<32x32xbf16>
    %c3_116 = arith.constant 3 : index
    %c0_117 = arith.constant 0 : index
    %c0_118 = arith.constant 0 : index
    %232 = vector.load %arg4[%c3_116, %c0_117, %c0_118] : memref<4x6x32xf32, #tpu.memory_space<vmem>>, vector<1x6x32xf32>
    %233 = vector.shape_cast %232 : vector<1x6x32xf32> to vector<6x32xf32>
    %234 = vector.extract_strided_slice %233 {offsets = [0, 0], sizes = [1, 32], strides = [1, 1]} : vector<6x32xf32> to vector<1x32xf32>
    %235 = vector.extract_strided_slice %233 {offsets = [1, 0], sizes = [1, 32], strides = [1, 1]} : vector<6x32xf32> to vector<1x32xf32>
    %236 = vector.extract_strided_slice %233 {offsets = [2, 0], sizes = [1, 32], strides = [1, 1]} : vector<6x32xf32> to vector<1x32xf32>
    %237 = vector.extract_strided_slice %233 {offsets = [3, 0], sizes = [1, 32], strides = [1, 1]} : vector<6x32xf32> to vector<1x32xf32>
    %238 = vector.extract_strided_slice %233 {offsets = [4, 0], sizes = [1, 32], strides = [1, 1]} : vector<6x32xf32> to vector<1x32xf32>
    %239 = vector.extract_strided_slice %233 {offsets = [5, 0], sizes = [1, 32], strides = [1, 1]} : vector<6x32xf32> to vector<1x32xf32>
    %240 = arith.truncf %223 : vector<16x32xf32> to vector<16x32xbf16>
    %241 = arith.truncf %3 : vector<16x32xf32> to vector<16x32xbf16>
    %cst_119 = arith.constant dense<0.000000e+00> : vector<16x32xf32>
    %242 = tpu.matmul %240, %225, %cst_119 {dimension_numbers = #tpu.dot_dimension_numbers<[1], [0], [0], [1], [0, 0, 1, 1], [], []>} : vector<16x32xbf16>, vector<32x32xbf16>, vector<16x32xf32> -> vector<16x32xf32>
    %243 = vector.broadcast %234 : vector<1x32xf32> to vector<16x32xf32>
    %244 = arith.addf %242, %243 : vector<16x32xf32>
    %cst_120 = arith.constant 0.176776692 : f32
    %245 = vector.broadcast %cst_120 : f32 to vector<16x32xf32>
    %246 = arith.mulf %244, %245 : vector<16x32xf32>
    %cst_121 = arith.constant dense<0.000000e+00> : vector<16x32xf32>
    %247 = tpu.matmul %241, %227, %cst_121 {dimension_numbers = #tpu.dot_dimension_numbers<[1], [0], [0], [1], [0, 0, 1, 1], [], []>} : vector<16x32xbf16>, vector<32x32xbf16>, vector<16x32xf32> -> vector<16x32xf32>
    %248 = vector.broadcast %235 : vector<1x32xf32> to vector<16x32xf32>
    %249 = arith.addf %247, %248 : vector<16x32xf32>
    %cst_122 = arith.constant dense<0.000000e+00> : vector<16x32xf32>
    %250 = tpu.matmul %241, %229, %cst_122 {dimension_numbers = #tpu.dot_dimension_numbers<[1], [0], [0], [1], [0, 0, 1, 1], [], []>} : vector<16x32xbf16>, vector<32x32xbf16>, vector<16x32xf32> -> vector<16x32xf32>
    %251 = vector.broadcast %236 : vector<1x32xf32> to vector<16x32xf32>
    %252 = arith.addf %250, %251 : vector<16x32xf32>
    %253 = vector.shape_cast %246 : vector<16x32xf32> to vector<2x8x32xf32>
    %254 = arith.truncf %253 : vector<2x8x32xf32> to vector<2x8x32xbf16>
    %255 = vector.shape_cast %249 : vector<16x32xf32> to vector<2x8x32xf32>
    %256 = arith.truncf %255 : vector<2x8x32xf32> to vector<2x8x32xbf16>
    %257 = vector.shape_cast %252 : vector<16x32xf32> to vector<2x8x32xf32>
    %258 = arith.truncf %257 : vector<2x8x32xf32> to vector<2x8x32xbf16>
    "tpu.trace_start"() <{level = 10 : i32, message = "bmc,bnc->bmn"}> : () -> ()
    %cst_123 = arith.constant dense<0.000000e+00> : vector<2x8x8xf32>
    %259 = tpu.matmul %254, %256, %cst_123 {dimension_numbers = #tpu.dot_dimension_numbers<[2], [2], [1], [1], [0, 0, 0, 1, 1, 1], [0], [0]>} : vector<2x8x32xbf16>, vector<2x8x32xbf16>, vector<2x8x8xf32> -> vector<2x8x8xf32>
    "tpu.trace_stop"() : () -> ()
    %cst_124 = arith.constant dense<0xFF800000> : vector<2x8xf32>
    %260 = vector.multi_reduction <maximumf>, %259, %cst_124 [2] : vector<2x8x8xf32> to vector<2x8xf32>
    %261 = vector.shape_cast %260 : vector<2x8xf32> to vector<2x8x1xf32>
    %262 = vector.broadcast %261 : vector<2x8x1xf32> to vector<2x8x8xf32>
    %263 = arith.subf %259, %262 : vector<2x8x8xf32>
    %264 = math.exp %263 : vector<2x8x8xf32>
    %cst_125 = arith.constant dense<0.000000e+00> : vector<2x8xf32>
    %265 = vector.multi_reduction <add>, %264, %cst_125 [2] : vector<2x8x8xf32> to vector<2x8xf32>
    %266 = vector.shape_cast %265 : vector<2x8xf32> to vector<2x8x1xf32>
    %267 = tpu.reciprocal %266 {approx = true} : vector<2x8x1xf32> -> vector<2x8x1xf32>
    %268 = vector.broadcast %267 : vector<2x8x1xf32> to vector<2x8x8xf32>
    %269 = arith.mulf %264, %268 : vector<2x8x8xf32>
    %270 = arith.truncf %269 : vector<2x8x8xf32> to vector<2x8x8xbf16>
    "tpu.trace_start"() <{level = 10 : i32, message = "bmn,bnc->bmc"}> : () -> ()
    %cst_126 = arith.constant dense<0.000000e+00> : vector<2x8x32xf32>
    %271 = tpu.matmul %270, %258, %cst_126 {dimension_numbers = #tpu.dot_dimension_numbers<[2], [1], [1], [2], [0, 0, 0, 1, 1, 2], [0], [0]>} : vector<2x8x8xbf16>, vector<2x8x32xbf16>, vector<2x8x32xf32> -> vector<2x8x32xf32>
    "tpu.trace_stop"() : () -> ()
    %272 = vector.shape_cast %271 : vector<2x8x32xf32> to vector<16x32xf32>
    %273 = arith.truncf %272 : vector<16x32xf32> to vector<16x32xbf16>
    %cst_127 = arith.constant dense<0.000000e+00> : vector<16x32xf32>
    %274 = tpu.matmul %273, %231, %cst_127 {dimension_numbers = #tpu.dot_dimension_numbers<[1], [0], [0], [1], [0, 0, 1, 1], [], []>} : vector<16x32xbf16>, vector<32x32xbf16>, vector<16x32xf32> -> vector<16x32xf32>
    %275 = vector.broadcast %237 : vector<1x32xf32> to vector<16x32xf32>
    %276 = arith.addf %274, %275 : vector<16x32xf32>
    %277 = arith.addf %223, %276 : vector<16x32xf32>
    %cst_128 = arith.constant dense<0.000000e+00> : vector<16xf32>
    %278 = vector.multi_reduction <add>, %277, %cst_128 [1] : vector<16x32xf32> to vector<16xf32>
    %279 = vector.shape_cast %278 : vector<16xf32> to vector<16x1xf32>
    %cst_129 = arith.constant 3.200000e+01 : f32
    %280 = vector.broadcast %cst_129 : f32 to vector<16x1xf32>
    %281 = arith.divf %279, %280 : vector<16x1xf32>
    %282 = vector.broadcast %281 : vector<16x1xf32> to vector<16x32xf32>
    %283 = arith.subf %277, %282 : vector<16x32xf32>
    %284 = arith.mulf %283, %283 : vector<16x32xf32>
    %cst_130 = arith.constant dense<0.000000e+00> : vector<16xf32>
    %285 = vector.multi_reduction <add>, %284, %cst_130 [1] : vector<16x32xf32> to vector<16xf32>
    %286 = vector.shape_cast %285 : vector<16xf32> to vector<16x1xf32>
    %cst_131 = arith.constant 3.200000e+01 : f32
    %287 = vector.broadcast %cst_131 : f32 to vector<16x1xf32>
    %288 = arith.divf %286, %287 : vector<16x1xf32>
    %cst_132 = arith.constant 9.99999974E-6 : f32
    %289 = vector.broadcast %cst_132 : f32 to vector<16x1xf32>
    %290 = arith.addf %288, %289 : vector<16x1xf32>
    %291 = math.rsqrt %290 : vector<16x1xf32>
    %292 = vector.broadcast %291 : vector<16x1xf32> to vector<16x32xf32>
    %293 = arith.mulf %283, %292 : vector<16x32xf32>
    %294 = vector.broadcast %238 : vector<1x32xf32> to vector<16x32xf32>
    %295 = arith.mulf %293, %294 : vector<16x32xf32>
    %296 = vector.broadcast %239 : vector<1x32xf32> to vector<16x32xf32>
    %297 = arith.addf %295, %296 : vector<16x32xf32>
    %298 = vector.shape_cast %297 : vector<16x32xf32> to vector<2x8x32xf32>
    %c0_133 = arith.constant 0 : index
    %c0_134 = arith.constant 0 : index
    %c0_135 = arith.constant 0 : index
    %299 = vector.load %arg5[%c0_133, %c0_134, %c0_135] : memref<2x8x32xf32, #tpu.memory_space<vmem>>, vector<2x8x32xf32>
    tpu.vector_store %arg5[%c0_133, %c0_134, %c0_135], %298 {strides = array<i32>} : memref<2x8x32xf32, #tpu.memory_space<vmem>>, vector<2x8x32xf32>,
    return
  }
  func.func @transform_0(%arg0: i32) -> (i32, i32, i32) {
    %c0_i32 = arith.constant 0 : i32
    %c0_i32_0 = arith.constant 0 : i32
    %c0_i32_1 = arith.constant 0 : i32
    return %arg0, %c0_i32, %c0_i32_0 : i32, i32, i32
  }
  func.func @transform_1(%arg0: i32) -> (i32, i32, i32) {
    %c0_i32 = arith.constant 0 : i32
    %c0_i32_0 = arith.constant 0 : i32
    %c0_i32_1 = arith.constant 0 : i32
    return %arg0, %c0_i32, %c0_i32_0 : i32, i32, i32
  }
  func.func @transform_2(%arg0: i32) -> (i32, i32, i32, i32) {
    %c0_i32 = arith.constant 0 : i32
    %c0_i32_0 = arith.constant 0 : i32
    %c0_i32_1 = arith.constant 0 : i32
    %c0_i32_2 = arith.constant 0 : i32
    %c0_i32_3 = arith.constant 0 : i32
    return %c0_i32, %c0_i32_0, %c0_i32_1, %c0_i32_2 : i32, i32, i32, i32
  }
  func.func @transform_3(%arg0: i32) -> (i32, i32, i32) {
    %c0_i32 = arith.constant 0 : i32
    %c0_i32_0 = arith.constant 0 : i32
    %c0_i32_1 = arith.constant 0 : i32
    %c0_i32_2 = arith.constant 0 : i32
    return %c0_i32, %c0_i32_0, %c0_i32_1 : i32, i32, i32
  }
  func.func @transform_4(%arg0: i32) -> (i32, i32, i32) {
    %c0_i32 = arith.constant 0 : i32
    %c0_i32_0 = arith.constant 0 : i32
    %c0_i32_1 = arith.constant 0 : i32
    return %arg0, %c0_i32, %c0_i32_0 : i32, i32, i32
  }
}

</mosaic_0001>

<bundles_post_ra>
// kernel: tpu_custom_call.1
= control target key start
LH: loop header
LB: loop body
LE: loop exit
PB: predicated region body
PF: predicated region fallthrough
CT: control target
= control target key end

     0   :  { %9 = vsyncpa [#allocation3], 0  ;;  %s1800_s0 = inlined_call_operand.vmem [shape: f32[2,8,32], index: 0, kind: input, shape index: {}]   ;;  %s1801_s1 = inlined_call_operand.vmem [shape: f32[2,8,32], index: 1, kind: input, shape index: {}]   ;;  %s1802_s2 = inlined_call_operand.hbm [shape: bf16[4,4,32,32], index: 2, kind: input, shape index: {}]   ;;  %s1803_s3 = inlined_call_operand.vmem [shape: f32[4,6,32], index: 3, kind: input, shape index: {}]   ;;  %s1804_s4 = inlined_call_operand.hbm [shape: f32[2,8,32], index: 4, kind: output, shape index: {}]  }
   0x1   :  { %10 = vsyncpa [#allocation4], 0  ;;  %s19_s17 = sshll.u32 %s1802_s2, 4  ;;  %s1568_s18 = smov [#allocation2]   ;;  %s20_s17 = int_to_ptr.hbm [resolvable:$true] %s19_s17 }
   0x2   :  { %s21_s19 = sshll.u32 %s1568_s18, 4  ;;  %s1569_s20 = smov 64   ;;  %s22_s19 = int_to_ptr.vmem [resolvable:$true] %s21_s19 }
   0x3   :  { %s1570_s21 = smov 4  }
   0x4   :  { %27 = dma.hbm_to_vmem [thread:$0]  %s20_s17, 4096, %s22_s19, [#allocation3], %s1569_s20, %s1569_s20, %s1570_s21  }
   0x5   :  { %1564 = dma.done.wait [#allocation3], 4096  }
   0x6   :  { %1565 = vsyncadd [#allocation3], 4294963200  ;;  %v1428_v0 = vld [vmem:[#allocation2 + $0x8] sm:$0xff]  ;;  %v1430_v1 = vld [vmem:[#allocation2 + $0x18] sm:$0xff]  ;;  %vm73_vm0 = vcmask 261120   ;;  %vm191_vm1 = vcmask 64512  }
   0x7   :  { %v1427_v2 = vld [vmem:[#allocation2] sm:$0xff]  ;;  %83 = vmatpush.bf16.msra.mxu0 %v1428_v0  ;;  %112 = vmatpush.bf16.msra.mxu1 %v1430_v1  ;;  %v1429_v3 = vld [vmem:[#allocation2 + $0x10] sm:$0xff]  ;;  %v1611_v5 = vld [vmem:[%s1800_s0 + $0x8] sm:$0xff]  ;;  %vm219_vm2 = vcmask 1043456   ;;  %s1251_s12 = sshll.u32 %s1804_s4, 4  ;;  %s1573_s13 = smov 128   ;;  %s1252_s12 = int_to_ptr.hbm [resolvable:$true] %s1251_s12 }
   0x8   :  { %v1606_v4 = vld [vmem:[%s1800_s0] sm:$0xff]  ;;  %v1432_v26 = vld [vmem:[#allocation2 + $0x28] sm:$0xff]  ;;  %v1434_v53 = vld [vmem:[#allocation2 + $0x38] sm:$0xff]  ;;  %s1574_s14 = smov 8  }
   0x9   :  { %v59_v6 = vpack.c.bf16 %v1611_v5, %v1606_v4  ;;  %v1620_v7 = vld [vmem:[%s1803_s3] sm:$0x3f]  ;;  %139 = vmatpush.bf16.msra.mxu2 %v1432_v26  ;;  %v1433_v62 = vld [vmem:[#allocation2 + $0x30] sm:$0xff] }
   0xa   :  { %v60_v8 = vperm.slane %v1620_v7, 0  ;;  %v93_v9 = vperm.slane %v1620_v7, 1  ;;  %v1431_v27 = vld [vmem:[#allocation2 + $0x20] sm:$0xff]  ;;  %v120_v34 = vperm.slane %v1620_v7, 2 }
   0xb   :  { %84 = vmatpush.bf16.msra.mxu0 %v1427_v2  ;;  %113 = vmatpush.bf16.msra.mxu1 %v1429_v3 }
   0xd   :  { %140 = vmatpush.bf16.msra.mxu2 %v1431_v27 }
   0xe   :  { %1272 = vmatmul.msk.bf16.vlgmr.msra.gmra.mxu0 %vm73_vm0, %v59_v6  ;;  %1281 = vmatmul.msk.bf16.vlgmr.msra.gmra.mxu1 %vm73_vm0, %v59_v6 }
  0x10   :  { %1290 = vmatmul.msk.bf16.vlgmr.msra.gmra.mxu2 %vm73_vm0, %v59_v6  ;;  %v256_v6 = vperm.slane %v1620_v7, 3 }
  0x8b   :  { %v86_v10 = vpop.f32.mrf.mxu0  ;;  %v115_v11 = vpop.f32.mrf.mxu1 }
  0x8c   :  { %v87_v12 = vadd.f32 %v86_v10, %v60_v8  ;;  %v116_v13 = vadd.f32 %v115_v11, %v93_v9 }
  0x8e   :  { %v149_v14 = vpack.c.bf16 %v116_v13, %v116_v13  ;;  %v91_v15 = vmul.f32 0.17677669, %v87_v12 }
  0x90   :  { %v157_v16 = vsel %vm73_vm0, %v149_v14, 0  ;;  %v147_v19 = vpack.c.bf16 %v91_v15, %v91_v15 }
  0x91   :  { %166 = vmatpush.bf16.xpose.msra.mxu3 %v157_v16  ;;  %v1571_v16 = vmov 32.0  }
  0x93   :  { %v88_v17 = vpop.f32.mrf.mxu0  ;;  %v117_v18 = vpop.f32.mrf.mxu1 }
  0x94   :  { %v118_v20 = vadd.f32 %v117_v18, %v93_v9  ;;  %v89_v21 = vadd.f32 %v88_v17, %v60_v8  ;;  %v142_v37 = vpop.f32.mrf.mxu2 }
  0x95   :  { %v143_v38 = vadd.f32 %v142_v37, %v120_v34 }
  0x96   :  { %v150_v22 = vpack.c.bf16 %v118_v20, %v118_v20  ;;  %v92_v24 = vmul.f32 0.17677669, %v89_v21 }
  0x97   :  { %v151_v40 = vpack.c.bf16 %v143_v38, %v143_v38 }
  0x98   :  { %1291 = vmatmul.msk.bf16.vlgmr.msra.gmra.mxu3 %vm73_vm0, %v147_v19  ;;  %v176_v23 = vsel %vm73_vm0, %v150_v22, 0  ;;  %v148_v25 = vpack.c.bf16 %v92_v24, %v92_v24 }
  0x99   :  { %185 = vmatpush.bf16.xpose.msrb.mxu0 %v176_v23  ;;  %v221_v41 = vsel %vm219_vm2, %v151_v40, 0  ;;  %278 = vmatpush.bf16.msrb.mxu3 %v1434_v53 }
  0x9a   :  { %230 = vmatpush.bf16.msrb.mxu1 %v221_v41 }
  0x9c   :  { %v144_v44 = vpop.f32.mrf.mxu2 }
  0x9d   :  { %v145_v45 = vadd.f32 %v144_v44, %v120_v34  ;;  %279 = vmatpush.bf16.msrb.mxu3 %v1433_v62  ;;  %v38_v34 = vld [vmem:[%s1801_s1 + $0x8] sm:$0xff] }
  0x9f   :  { %v152_v49 = vpack.c.bf16 %v145_v45, %v145_v45 }
  0xa0   :  { %1292 = vmatmul.msk.bf16.vlgmr.msrb.gmra.mxu0 %vm73_vm0, %v148_v25 }
  0xa1   :  { %v240_v50 = vsel %vm219_vm2, %v152_v49, 0 }
  0xa2   :  { %249 = vmatpush.bf16.msrb.mxu2 %v240_v50 }
 0x11b   :  { %v168_v28 = vpop.f32.mrf.mxu3 }
 0x11c   :  { %v192_v33 = vsel %vm191_vm1, %v168_v28, -inf }
 0x11d   :  { %v187_v29 = vpop.f32.mrf.mxu0 }
 0x11e   :  { %v195_v30 = vsel %vm191_vm1, %v187_v29, -inf }
 0x11f   :  { %196 = vmax.xlane.f32.xlu0 %v195_v30 }
 0x123   :  { %v170_v31 = vpop.f32.mrf.mxu3 }
 0x124   :  { %v1438_v31 = vld [vmem:[#allocation2 + $0x58] sm:$0xff] }
 0x125   :  { %v189_v32 = vpop.f32.mrf.mxu0  ;;  %423 = vmatpush.bf16.msra.mxu1 %v1438_v31 }
 0x126   :  { %v1437_v32 = vld [vmem:[#allocation2 + $0x50] sm:$0xff] }
 0x127   :  { %193 = vmax.xlane.f32.xlu0 %v192_v33  ;;  %v37_v33 = vld [vmem:[%s1801_s1] sm:$0xff] }
 0x129   :  { %424 = vmatpush.bf16.msra.mxu1 %v1437_v32 }
 0x192   :  { %v197_v35 = vpop.xlane.xlu0 %196 }
 0x193   :  { %v199_v36 = vsub.f32 %v187_v29, %v197_v35  ;;  %v1656_v35 = vpack.c.bf16 %v38_v34, %v37_v33 }
 0x195   :  { %v202_v39 = vmul.f32 1.442695, %v199_v36  ;;  %v1436_v36 = vld [vmem:[#allocation2 + $0x48] sm:$0xff] }
 0x196   :  { %391 = vmatpush.bf16.msra.mxu0 %v1436_v36 }
 0x197   :  { %1466 = vpow2.f32 %v202_v39  ;;  %v1435_v39 = vld [vmem:[#allocation2 + $0x40] sm:$0xff] }
 0x19a   :  { %v194_v42 = vpop.xlane.xlu0 %193  ;;  %392 = vmatpush.bf16.msra.mxu0 %v1435_v39 }
 0x19b   :  { %v198_v43 = vsub.f32 %v168_v28, %v194_v42 }
 0x19d   :  { %v1467_v46 = vpop.eup %1466  ;;  %v200_v47 = vmul.f32 1.442695, %v198_v43 }
 0x19e   :  { %v207_v48 = vsel %vm191_vm1, %v1467_v46, 0.0 }
 0x19f   :  { %1468 = vpow2.f32 %v200_v47  ;;  %208 = vadd.xlane.f32.xlu1 %v207_v48 }
 0x1a5   :  { %v1469_v51 = vpop.eup %1468 }
 0x1a6   :  { %v204_v52 = vsel %vm191_vm1, %v1469_v51, 0.0 }
 0x1a7   :  { %205 = vadd.xlane.f32.xlu1 %v204_v52 }
 0x212   :  { %v209_v54 = vpop.xlane.xlu1 %208 }
 0x213   :  { %1470 = vrcp.f32 %v209_v54 }
 0x219   :  { %v1471_v55 = vpop.eup %1470 }
 0x21a   :  { %v213_v56 = vmul.f32 %v1471_v55, %v1467_v46  ;;  %v206_v57 = vpop.xlane.xlu1 %205 }
 0x21b   :  { %1472 = vrcp.f32 %v206_v57 }
 0x21c   :  { %v215_v58 = vpack.c.bf16 %v213_v56, %v213_v56  ;;  %1474 = vrcp.f32 %v1571_v16  ;;  %v339_v56 = vperm.slane %v1620_v7, 4 }
 0x21e   :  { %1294 = vmatmul.msk.bf16.vlgmr.msrb.gmra.mxu2 %vm191_vm1, %v215_v58 }
 0x221   :  { %v1473_v59 = vpop.eup %1472 }
 0x222   :  { %v212_v60 = vmul.f32 %v1473_v59, %v1469_v51  ;;  %v1475_v17 = vpop.eup %1474 }
 0x223   :  { %v295_v18 = vmul.f32 32.0, %v1475_v17  ;;  %vm299_vm3 = vweird.f32 %v1475_v17 }
 0x224   :  { %v214_v61 = vpack.c.bf16 %v212_v60, %v212_v60  ;;  %v342_v60 = vperm.slane %v1620_v7, 5 }
 0x225   :  { %v296_v19 = vsub.f32 1.0, %v295_v18 }
 0x226   :  { %1293 = vmatmul.msk.bf16.vlgmr.msrb.gmra.mxu1 %vm191_vm1, %v214_v61 }
 0x227   :  { %v297_v20 = vmul.f32 %v1475_v17, %v296_v19 }
 0x229   :  { %v298_v21 = vadd.f32 %v1475_v17, %v297_v20 }
 0x22b   :  { %v1644_v22 = vsel %vm299_vm3, %v1475_v17, %v298_v21 }
 0x236   :  { %1322 = vmatmul.msk.bf16.vlgmr.msra.gmra.mxu1 %vm73_vm0, %v1656_v35 }
 0x2a1   :  { %v251_v63 = vpop.f32.mrf.mxu2 }
 0x2a3   :  { %v232_v0 = vpop.f32.mrf.mxu1 }
 0x2a4   :  { %v255_v1 = vpack.c.bf16 %v251_v63, %v232_v0 }
 0x2a6   :  { %1303 = vmatmul.msk.bf16.vlgmr.msrb.gmra.mxu3 %vm73_vm0, %v255_v1 }
 0x2a9   :  { %v253_v2 = vpop.f32.mrf.mxu2 }
 0x2ab   :  { %v234_v3 = vpop.f32.mrf.mxu1 }
 0x2ac   :  { %v1674_v3 = vld [vmem:[%s1803_s3 + $0x8] sm:$0x3f] }
 0x2ad   :  { %v431_v31 = vperm.slane %v1674_v3, 2 }
 0x2b3   :  { %v426_v7 = vpop.f32.mrf.mxu1 }
 0x329   :  { %v281_v8 = vpop.f32.mrf.mxu3 }
 0x32a   :  { %v282_v9 = vadd.f32 %v281_v8, %v256_v6 }
 0x32c   :  { %v286_v10 = vadd.f32 %v282_v9, %v1606_v4 }
 0x32e   :  { %v288_v11 = vsel %vm73_vm0, %v286_v10, 0.0 }
 0x32f   :  { %289 = vadd.xlane.f32.xlu2 %v288_v11  ;;  %v428_v11 = vpop.f32.mrf.mxu1 }
 0x331   :  { %v283_v12 = vpop.f32.mrf.mxu3 }
 0x332   :  { %v284_v13 = vadd.f32 %v283_v12, %v256_v6  ;;  %v401_v6 = vperm.slane %v1674_v3, 1 }
 0x334   :  { %v287_v14 = vadd.f32 %v284_v13, %v1611_v5  ;;  %v427_v8 = vadd.f32 %v426_v7, %v401_v6  ;;  %v429_v12 = vadd.f32 %v428_v11, %v401_v6  ;;  %v565_v7 = vperm.slane %v1674_v3, 3 }
 0x336   :  { %v291_v15 = vsel %vm73_vm0, %v287_v14, 0.0  ;;  %v460_v9 = vpack.c.bf16 %v427_v8, %v427_v8  ;;  %v461_v13 = vpack.c.bf16 %v429_v12, %v429_v12 }
 0x337   :  { %292 = vadd.xlane.f32.xlu2 %v291_v15  ;;  %v369_v15 = vperm.slane %v1674_v3, 0 }
 0x3a2   :  { %v290_v4 = vpop.xlane.xlu2 %289 }
 0x3a3   :  { %v301_v23 = vmul.f32 %v1644_v22, %v290_v4 }
 0x3a5   :  { %v303_v24 = vsub.f32 %v286_v10, %v301_v23  ;;  %v468_v10 = vsel %vm73_vm0, %v460_v9, 0 }
 0x3a6   :  { %477 = vmatpush.bf16.xpose.msra.mxu3 %v468_v10 }
 0x3a7   :  { %v305_v25 = vmul.f32 %v303_v24, %v303_v24 }
 0x3a9   :  { %v307_v5 = vsel %vm73_vm0, %v305_v25, 0.0  ;;  %v1439_v25 = vld [vmem:[#allocation2 + $0x60] sm:$0xff] }
 0x3aa   :  { %308 = vadd.xlane.f32.xlu0 %v307_v5  ;;  %v293_v26 = vpop.xlane.xlu2 %292 }
 0x3ab   :  { %v302_v27 = vmul.f32 %v1644_v22, %v293_v26 }
 0x3ad   :  { %v304_v28 = vsub.f32 %v287_v14, %v302_v27  ;;  %v487_v14 = vsel %vm73_vm0, %v461_v13, 0 }
 0x3ae   :  { %496 = vmatpush.bf16.xpose.msrb.mxu0 %v487_v14 }
 0x3af   :  { %v306_v29 = vmul.f32 %v304_v28, %v304_v28 }
 0x3b1   :  { %v310_v30 = vsel %vm73_vm0, %v306_v29, 0.0 }
 0x3b2   :  { %311 = vadd.xlane.f32.xlu1 %v310_v30 }
 0x41d   :  { %v309_v37 = vpop.xlane.xlu0 %308 }
 0x41e   :  { %v313_v38 = vmul.f32 %v309_v37, %v1644_v22 }
 0x420   :  { %v315_v40 = vadd.f32 1e-05, %v313_v38 }
 0x422   :  { %1476 = vrsqrt.f32 %v315_v40  ;;  %vm323_vm5 = vweird.f32 %v315_v40 }
 0x425   :  { %v312_v41 = vpop.xlane.xlu1 %311 }
 0x426   :  { %v314_v42 = vmul.f32 %v312_v41, %v1644_v22 }
 0x428   :  { %v1477_v43 = vpop.eup %1476  ;;  %v316_v44 = vadd.f32 1e-05, %v314_v42 }
 0x429   :  { %v318_v45 = vmul.f32 %v1477_v43, %v315_v40  ;;  %vm324_vm4 = vweird.f32 %v1477_v43 }
 0x42a   :  { %1478 = vrsqrt.f32 %v316_v44  ;;  %vm325_vm6 = vmor %vm323_vm5, %vm324_vm4  ;;  %vm333_vm8 = vweird.f32 %v316_v44 }
 0x42b   :  { %v319_v46 = vmul.f32 %v1477_v43, %v318_v45 }
 0x42d   :  { %v320_v47 = vmul.f32 0.5, %v319_v46 }
 0x42f   :  { %v321_v48 = vsub.f32 1.5, %v320_v47 }
 0x430   :  { %v1479_v49 = vpop.eup %1478 }
 0x431   :  { %v322_v50 = vmul.f32 %v1477_v43, %v321_v48  ;;  %v328_v51 = vmul.f32 %v1479_v49, %v316_v44  ;;  %vm334_vm7 = vweird.f32 %v1479_v49 }
 0x432   :  { %vm335_vm9 = vmor %vm333_vm8, %vm334_vm7 }
 0x433   :  { %v329_v52 = vmul.f32 %v1479_v49, %v328_v51  ;;  %v326_v53 = vsel %vm325_vm6, %v1477_v43, %v322_v50 }
 0x434   :  { %v337_v57 = vmul.f32 %v326_v53, %v303_v24  ;;  %v1440_v24 = vld [vmem:[#allocation2 + $0x68] sm:$0xff] }
 0x435   :  { %v330_v54 = vmul.f32 0.5, %v329_v52  ;;  %450 = vmatpush.bf16.msra.mxu2 %v1440_v24 }
 0x436   :  { %v340_v61 = vmul.f32 %v339_v56, %v337_v57 }
 0x437   :  { %v331_v55 = vsub.f32 1.5, %v330_v54 }
 0x438   :  { %v1664_v0 = vadd.f32 %v342_v60, %v340_v61 }
 0x439   :  { %v332_v58 = vmul.f32 %v1479_v49, %v331_v55  ;;  %451 = vmatpush.bf16.msra.mxu2 %v1439_v25  ;;  %v1446_v25 = vld [vmem:[#allocation2 + $0x98] sm:$0xff] }
 0x43b   :  { %v336_v59 = vsel %vm335_vm9, %v1479_v49, %v332_v58 }
 0x43c   :  { %v338_v62 = vmul.f32 %v336_v59, %v304_v28  ;;  %1331 = vmatmul.msk.bf16.vlgmr.msra.gmra.mxu2 %vm73_vm0, %v1656_v35  ;;  %v1442_v59 = vld [vmem:[#allocation2 + $0x78] sm:$0xff] }
 0x43d   :  { %587 = vmatpush.bf16.msrb.mxu3 %v1442_v59 }
 0x43e   :  { %v341_v63 = vmul.f32 %v339_v56, %v338_v62 }
 0x440   :  { %v1666_v1 = vadd.f32 %v342_v60, %v341_v63  ;;  %v1441_v60 = vld [vmem:[#allocation2 + $0x70] sm:$0xff] }
 0x441   :  { %588 = vmatpush.bf16.msrb.mxu3 %v1441_v60 }
 0x442   :  { %v367_v2 = vpack.c.bf16 %v1666_v1, %v1664_v0 }
 0x444   :  { %1313 = vmatmul.msk.bf16.vlgmr.msra.gmra.mxu0 %vm73_vm0, %v367_v2 }
 0x4bf   :  { %v453_v34 = vpop.f32.mrf.mxu2 }
 0x4c0   :  { %v454_v37 = vadd.f32 %v453_v34, %v431_v31 }
 0x4c1   :  { %v394_v16 = vpop.f32.mrf.mxu0 }
 0x4c2   :  { %v395_v17 = vadd.f32 %v394_v16, %v369_v15  ;;  %v462_v40 = vpack.c.bf16 %v454_v37, %v454_v37 }
 0x4c4   :  { %v399_v18 = vmul.f32 0.17677669, %v395_v17  ;;  %v530_v42 = vsel %vm219_vm2, %v462_v40, 0 }
 0x4c5   :  { %539 = vmatpush.bf16.msrb.mxu1 %v530_v42 }
 0x4c6   :  { %v458_v19 = vpack.c.bf16 %v399_v18, %v399_v18 }
 0x4c7   :  { %v455_v43 = vpop.f32.mrf.mxu2 }
 0x4c8   :  { %1332 = vmatmul.msk.bf16.vlgmr.msra.gmra.mxu3 %vm73_vm0, %v458_v19  ;;  %v456_v44 = vadd.f32 %v455_v43, %v431_v31 }
 0x4c9   :  { %v396_v20 = vpop.f32.mrf.mxu0  ;;  %721 = vmatpush.bf16.msra.mxu1 %v1446_v25 }
 0x4ca   :  { %v397_v21 = vadd.f32 %v396_v20, %v369_v15  ;;  %v463_v47 = vpack.c.bf16 %v456_v44, %v456_v44 }
 0x4cc   :  { %v400_v4 = vmul.f32 0.17677669, %v397_v21  ;;  %v549_v50 = vsel %vm219_vm2, %v463_v47, 0 }
 0x4cd   :  { %558 = vmatpush.bf16.msrb.mxu2 %v549_v50 }
 0x4ce   :  { %v459_v23 = vpack.c.bf16 %v400_v4, %v400_v4 }
 0x4d0   :  { %1333 = vmatmul.msk.bf16.vlgmr.msrb.gmra.mxu0 %vm73_vm0, %v459_v23 }
 0x54b   :  { %v479_v5 = vpop.f32.mrf.mxu3 }
 0x54c   :  { %v502_v26 = vsel %vm191_vm1, %v479_v5, -inf }
 0x54d   :  { %v498_v27 = vpop.f32.mrf.mxu0  ;;  %503 = vmax.xlane.f32.xlu0 %v502_v26 }
 0x54e   :  { %v505_v28 = vsel %vm191_vm1, %v498_v27, -inf }
 0x54f   :  { %506 = vmax.xlane.f32.xlu2 %v505_v28  ;;  %v1443_v28 = vld [vmem:[#allocation2 + $0x80] sm:$0xff] }
 0x553   :  { %v481_v29 = vpop.f32.mrf.mxu3 }
 0x554   :  { %v1445_v29 = vld [vmem:[#allocation2 + $0x90] sm:$0xff] }
 0x555   :  { %v500_v30 = vpop.f32.mrf.mxu0  ;;  %722 = vmatpush.bf16.msra.mxu1 %v1445_v29 }
 0x556   :  { %v1447_v30 = vld [vmem:[#allocation2 + $0xa0] sm:$0xff] }
 0x5c0   :  { %v504_v32 = vpop.xlane.xlu0 %503 }
 0x5c1   :  { %v508_v33 = vsub.f32 %v479_v5, %v504_v32  ;;  %v1448_v5 = vld [vmem:[#allocation2 + $0xa8] sm:$0xff] }
 0x5c2   :  { %v507_v36 = vpop.xlane.xlu2 %506  ;;  %748 = vmatpush.bf16.msra.mxu2 %v1448_v5 }
 0x5c3   :  { %v510_v38 = vmul.f32 1.442695, %v508_v33  ;;  %v509_v39 = vsub.f32 %v498_v27, %v507_v36 }
 0x5c5   :  { %1480 = vpow2.f32 %v510_v38  ;;  %v512_v41 = vmul.f32 1.442695, %v509_v39 }
 0x5c6   :  { %749 = vmatpush.bf16.msra.mxu2 %v1447_v30 }
 0x5c7   :  { %1482 = vpow2.f32 %v512_v41 }
 0x5cb   :  { %v1481_v45 = vpop.eup %1480 }
 0x5cc   :  { %v514_v46 = vsel %vm191_vm1, %v1481_v45, 0.0 }
 0x5cd   :  { %v1483_v48 = vpop.eup %1482  ;;  %515 = vadd.xlane.f32.xlu2 %v514_v46 }
 0x5ce   :  { %v517_v49 = vsel %vm191_vm1, %v1483_v48, 0.0 }
 0x5cf   :  { %518 = vadd.xlane.f32.xlu1 %v517_v49 }
 0x640   :  { %v516_v51 = vpop.xlane.xlu2 %515 }
 0x641   :  { %1484 = vrcp.f32 %v516_v51 }
 0x642   :  { %v519_v52 = vpop.xlane.xlu1 %518 }
 0x643   :  { %1486 = vrcp.f32 %v519_v52  ;;  %v644_v52 = vperm.slane %v1674_v3, 5 }
 0x647   :  { %v1485_v53 = vpop.eup %1484 }
 0x648   :  { %v522_v54 = vmul.f32 %v1485_v53, %v1481_v45 }
 0x649   :  { %v1487_v55 = vpop.eup %1486 }
 0x64a   :  { %v524_v56 = vpack.c.bf16 %v522_v54, %v522_v54  ;;  %v523_v57 = vmul.f32 %v1487_v55, %v1483_v48  ;;  %v641_v48 = vperm.slane %v1674_v3, 4  ;;  %v1719_v3 = vld [vmem:[%s1803_s3 + $0x10] sm:$0x3f] }
 0x64b   :  { %v702_v59 = vperm.slane %v1719_v3, 1  ;;  %v670_v60 = vperm.slane %v1719_v3, 0 }
 0x64c   :  { %v525_v58 = vpack.c.bf16 %v523_v57, %v523_v57  ;;  %1334 = vmatmul.msk.bf16.vlgmr.msrb.gmra.mxu1 %vm191_vm1, %v524_v56 }
 0x64e   :  { %1335 = vmatmul.msk.bf16.vlgmr.msrb.gmra.mxu2 %vm191_vm1, %v525_v58 }
 0x6c9   :  { %v541_v61 = vpop.f32.mrf.mxu1 }
 0x6d1   :  { %v543_v62 = vpop.f32.mrf.mxu1  ;;  %v560_v63 = vpop.f32.mrf.mxu2 }
 0x6d2   :  { %v564_v2 = vpack.c.bf16 %v560_v63, %v541_v61 }
 0x6d4   :  { %1344 = vmatmul.msk.bf16.vlgmr.msrb.gmra.mxu3 %vm73_vm0, %v564_v2 }
 0x6d9   :  { %v562_v6 = vpop.f32.mrf.mxu2 }
 0x757   :  { %v590_v8 = vpop.f32.mrf.mxu3 }
 0x758   :  { %v591_v9 = vadd.f32 %v590_v8, %v565_v7 }
 0x75a   :  { %v595_v10 = vadd.f32 %v591_v9, %v1664_v0 }
 0x75c   :  { %v597_v11 = vsel %vm73_vm0, %v595_v10, 0.0 }
 0x75d   :  { %598 = vadd.xlane.f32.xlu0 %v597_v11 }
 0x75f   :  { %v592_v12 = vpop.f32.mrf.mxu3 }
 0x760   :  { %v593_v13 = vadd.f32 %v592_v12, %v565_v7  ;;  %v729_v7 = vperm.slane %v1719_v3, 2 }
 0x762   :  { %v596_v14 = vadd.f32 %v593_v13, %v1666_v1  ;;  %v1444_v1 = vld [vmem:[#allocation2 + $0x88] sm:$0xff] }
 0x763   :  { %692 = vmatpush.bf16.msra.mxu0 %v1444_v1 }
 0x764   :  { %v600_v15 = vsel %vm73_vm0, %v596_v14, 0.0 }
 0x765   :  { %601 = vadd.xlane.f32.xlu1 %v600_v15 }
 0x767   :  { %693 = vmatpush.bf16.msra.mxu0 %v1443_v28 }
 0x7d0   :  { %v599_v16 = vpop.xlane.xlu0 %598 }
 0x7d1   :  { %v603_v17 = vmul.f32 %v599_v16, %v1644_v22 }
 0x7d3   :  { %v605_v18 = vsub.f32 %v595_v10, %v603_v17 }
 0x7d5   :  { %v607_v19 = vmul.f32 %v605_v18, %v605_v18 }
 0x7d7   :  { %v609_v20 = vsel %vm73_vm0, %v607_v19, 0.0 }
 0x7d8   :  { %v602_v21 = vpop.xlane.xlu1 %601  ;;  %610 = vadd.xlane.f32.xlu2 %v609_v20 }
 0x7d9   :  { %v604_v0 = vmul.f32 %v602_v21, %v1644_v22 }
 0x7db   :  { %v606_v4 = vsub.f32 %v596_v14, %v604_v0 }
 0x7dd   :  { %v608_v23 = vmul.f32 %v606_v4, %v606_v4 }
 0x7df   :  { %v612_v24 = vsel %vm73_vm0, %v608_v23, 0.0 }
 0x7e0   :  { %613 = vadd.xlane.f32.xlu0 %v612_v24 }
 0x84b   :  { %v611_v26 = vpop.xlane.xlu2 %610 }
 0x84c   :  { %v615_v27 = vmul.f32 %v611_v26, %v1644_v22 }
 0x84e   :  { %v617_v31 = vadd.f32 1e-05, %v615_v27 }
 0x850   :  { %1488 = vrsqrt.f32 %v617_v31  ;;  %vm625_vm11 = vweird.f32 %v617_v31 }
 0x853   :  { %v614_v32 = vpop.xlane.xlu0 %613 }
 0x854   :  { %v616_v33 = vmul.f32 %v614_v32, %v1644_v22 }
 0x856   :  { %v1489_v34 = vpop.eup %1488  ;;  %v618_v36 = vadd.f32 1e-05, %v616_v33 }
 0x857   :  { %v620_v37 = vmul.f32 %v1489_v34, %v617_v31  ;;  %vm626_vm10 = vweird.f32 %v1489_v34 }
 0x858   :  { %1490 = vrsqrt.f32 %v618_v36  ;;  %vm627_vm12 = vmor %vm625_vm11, %vm626_vm10  ;;  %vm635_vm14 = vweird.f32 %v618_v36 }
 0x859   :  { %v621_v38 = vmul.f32 %v1489_v34, %v620_v37 }
 0x85b   :  { %v622_v39 = vmul.f32 0.5, %v621_v38 }
 0x85d   :  { %v623_v40 = vsub.f32 1.5, %v622_v39 }
 0x85e   :  { %v1491_v41 = vpop.eup %1490 }
 0x85f   :  { %v624_v42 = vmul.f32 %v1489_v34, %v623_v40  ;;  %v630_v43 = vmul.f32 %v1491_v41, %v618_v36  ;;  %vm636_vm13 = vweird.f32 %v1491_v41 }
 0x860   :  { %vm637_vm15 = vmor %vm635_vm14, %vm636_vm13 }
 0x861   :  { %v631_v44 = vmul.f32 %v1491_v41, %v630_v43  ;;  %v628_v45 = vsel %vm627_vm12, %v1489_v34, %v624_v42 }
 0x862   :  { %v639_v49 = vmul.f32 %v628_v45, %v605_v18 }
 0x863   :  { %v632_v46 = vmul.f32 0.5, %v631_v44 }
 0x864   :  { %v642_v53 = vmul.f32 %v641_v48, %v639_v49  ;;  %v1450_v49 = vld [vmem:[#allocation2 + $0xb8] sm:$0xff] }
 0x865   :  { %v633_v47 = vsub.f32 1.5, %v632_v46 }
 0x866   :  { %v1707_v56 = vadd.f32 %v644_v52, %v642_v53 }
 0x867   :  { %v634_v50 = vmul.f32 %v1491_v41, %v633_v47 }
 0x869   :  { %v638_v51 = vsel %vm637_vm15, %v1491_v41, %v634_v50  ;;  %v1449_v50 = vld [vmem:[#allocation2 + $0xb0] sm:$0xff] }
 0x86a   :  { %v640_v54 = vmul.f32 %v638_v51, %v606_v4 }
 0x86c   :  { %v643_v55 = vmul.f32 %v641_v48, %v640_v54 }
 0x86e   :  { %v1709_v57 = vadd.f32 %v644_v52, %v643_v55 }
 0x870   :  { %v669_v58 = vpack.c.bf16 %v1709_v57, %v1707_v56 }
 0x872   :  { %1354 = vmatmul.msk.bf16.vlgmr.msra.gmra.mxu0 %vm73_vm0, %v669_v58  ;;  %1363 = vmatmul.msk.bf16.vlgmr.msra.gmra.mxu1 %vm73_vm0, %v669_v58 }
 0x873   :  { %1372 = vmatmul.msk.bf16.vlgmr.msra.gmra.mxu2 %vm73_vm0, %v669_v58  ;;  %v863_v58 = vperm.slane %v1719_v3, 3 }
 0x8ef   :  { %v695_v61 = vpop.f32.mrf.mxu0  ;;  %v724_v62 = vpop.f32.mrf.mxu1 }
 0x8f0   :  { %v725_v63 = vadd.f32 %v724_v62, %v702_v59  ;;  %v696_v2 = vadd.f32 %v695_v61, %v670_v60 }
 0x8f2   :  { %v758_v6 = vpack.c.bf16 %v725_v63, %v725_v63  ;;  %v700_v9 = vmul.f32 0.17677669, %v696_v2 }
 0x8f4   :  { %v766_v8 = vsel %vm73_vm0, %v758_v6, 0  ;;  %v756_v16 = vpack.c.bf16 %v700_v9, %v700_v9 }
 0x8f5   :  { %775 = vmatpush.bf16.xpose.msra.mxu3 %v766_v8 }
 0x8f6   :  { %v751_v10 = vpop.f32.mrf.mxu2 }
 0x8f7   :  { %v752_v11 = vadd.f32 %v751_v10, %v729_v7  ;;  %v697_v12 = vpop.f32.mrf.mxu0  ;;  %v726_v13 = vpop.f32.mrf.mxu1 }
 0x8f8   :  { %v727_v14 = vadd.f32 %v726_v13, %v702_v59  ;;  %v698_v17 = vadd.f32 %v697_v12, %v670_v60 }
 0x8f9   :  { %v760_v15 = vpack.c.bf16 %v752_v11, %v752_v11 }
 0x8fa   :  { %v759_v18 = vpack.c.bf16 %v727_v14, %v727_v14  ;;  %v701_v21 = vmul.f32 0.17677669, %v698_v17  ;;  %v1453_v17 = vld [vmem:[#allocation2 + $0xd0] sm:$0xff] }
 0x8fb   :  { %v828_v19 = vsel %vm219_vm2, %v760_v15, 0 }
 0x8fc   :  { %v785_v20 = vsel %vm73_vm0, %v759_v18, 0  ;;  %837 = vmatpush.bf16.msrb.mxu1 %v828_v19  ;;  %1373 = vmatmul.msk.bf16.vlgmr.msra.gmra.mxu3 %vm73_vm0, %v756_v16  ;;  %v757_v24 = vpack.c.bf16 %v701_v21, %v701_v21  ;;  %v1452_v18 = vld [vmem:[#allocation2 + $0xc8] sm:$0xff] }
 0x8fd   :  { %794 = vmatpush.bf16.xpose.msrb.mxu0 %v785_v20  ;;  %885 = vmatpush.bf16.msrb.mxu3 %v1450_v49 }
 0x8fe   :  { %v753_v0 = vpop.f32.mrf.mxu2 }
 0x8ff   :  { %v754_v4 = vadd.f32 %v753_v0, %v729_v7  ;;  %v1451_v0 = vld [vmem:[#allocation2 + $0xc0] sm:$0xff] }
 0x901   :  { %v761_v23 = vpack.c.bf16 %v754_v4, %v754_v4  ;;  %886 = vmatpush.bf16.msrb.mxu3 %v1449_v50 }
 0x903   :  { %v847_v1 = vsel %vm219_vm2, %v761_v23, 0 }
 0x904   :  { %856 = vmatpush.bf16.msrb.mxu2 %v847_v1  ;;  %1374 = vmatmul.msk.bf16.vlgmr.msrb.gmra.mxu0 %vm73_vm0, %v757_v24 }
 0x905   :  { %990 = vmatpush.bf16.msra.mxu0 %v1452_v18 }
 0x909   :  { %991 = vmatpush.bf16.msra.mxu0 %v1451_v0 }
 0x97f   :  { %v777_v25 = vpop.f32.mrf.mxu3 }
 0x980   :  { %v800_v5 = vsel %vm191_vm1, %v777_v25, -inf }
 0x981   :  { %v796_v26 = vpop.f32.mrf.mxu0  ;;  %801 = vmax.xlane.f32.xlu2 %v800_v5 }
 0x982   :  { %v803_v27 = vsel %vm191_vm1, %v796_v26, -inf }
 0x983   :  { %804 = vmax.xlane.f32.xlu1 %v803_v27 }
 0x987   :  { %v779_v28 = vpop.f32.mrf.mxu3 }
 0x989   :  { %v798_v29 = vpop.f32.mrf.mxu0 }
 0x9f4   :  { %v802_v30 = vpop.xlane.xlu2 %801 }
 0x9f5   :  { %v806_v31 = vsub.f32 %v777_v25, %v802_v30 }
 0x9f6   :  { %v805_v32 = vpop.xlane.xlu1 %804 }
 0x9f7   :  { %v808_v33 = vmul.f32 1.442695, %v806_v31  ;;  %v807_v34 = vsub.f32 %v796_v26, %v805_v32 }
 0x9f9   :  { %1492 = vpow2.f32 %v808_v33  ;;  %v810_v36 = vmul.f32 1.442695, %v807_v34 }
 0x9fb   :  { %1494 = vpow2.f32 %v810_v36  ;;  %v939_v36 = vperm.slane %v1719_v3, 4 }
 0x9ff   :  { %v1493_v37 = vpop.eup %1492 }
 0xa00   :  { %v812_v38 = vsel %vm191_vm1, %v1493_v37, 0.0 }
 0xa01   :  { %v1495_v39 = vpop.eup %1494  ;;  %813 = vadd.xlane.f32.xlu1 %v812_v38 }
 0xa02   :  { %v815_v40 = vsel %vm191_vm1, %v1495_v39, 0.0 }
 0xa03   :  { %816 = vadd.xlane.f32.xlu0 %v815_v40  ;;  %v942_v40 = vperm.slane %v1719_v3, 5 }
 0xa74   :  { %v814_v41 = vpop.xlane.xlu1 %813 }
 0xa75   :  { %1496 = vrcp.f32 %v814_v41 }
 0xa76   :  { %v817_v42 = vpop.xlane.xlu0 %816 }
 0xa77   :  { %1498 = vrcp.f32 %v817_v42 }
 0xa7b   :  { %v1497_v43 = vpop.eup %1496 }
 0xa7c   :  { %v820_v44 = vmul.f32 %v1497_v43, %v1493_v37 }
 0xa7d   :  { %v1499_v45 = vpop.eup %1498 }
 0xa7e   :  { %v822_v46 = vpack.c.bf16 %v820_v44, %v820_v44  ;;  %v821_v47 = vmul.f32 %v1499_v45, %v1495_v39 }
 0xa80   :  { %v823_v48 = vpack.c.bf16 %v821_v47, %v821_v47  ;;  %1375 = vmatmul.msk.bf16.vlgmr.msrb.gmra.mxu1 %vm191_vm1, %v822_v46  ;;  %v1762_v47 = vld [vmem:[%s1803_s3 + $0x18] sm:$0x3f]  ;;  %s1572_s3 = smov [#allocation5]  }
 0xa81   :  { %s1249_s9 = sshll.u32 %s1572_s3, 4  ;;  %s1250_s9 = int_to_ptr.vmem [resolvable:$true] %s1249_s9 }
 0xa82   :  { %1376 = vmatmul.msk.bf16.vlgmr.msrb.gmra.mxu2 %vm191_vm1, %v823_v48  ;;  %v1000_v48 = vperm.slane %v1762_v47, 1 }
 0xafd   :  { %v839_v51 = vpop.f32.mrf.mxu1 }
 0xb05   :  { %v841_v52 = vpop.f32.mrf.mxu1  ;;  %v858_v53 = vpop.f32.mrf.mxu2 }
 0xb06   :  { %v862_v54 = vpack.c.bf16 %v858_v53, %v839_v51 }
 0xb08   :  { %1385 = vmatmul.msk.bf16.vlgmr.msrb.gmra.mxu3 %vm73_vm0, %v862_v54 }
 0xb0d   :  { %v860_v55 = vpop.f32.mrf.mxu2 }
 0xb8b   :  { %v888_v59 = vpop.f32.mrf.mxu3 }
 0xb8c   :  { %v889_v60 = vadd.f32 %v888_v59, %v863_v58 }
 0xb8e   :  { %v893_v61 = vadd.f32 %v889_v60, %v1707_v56 }
 0xb90   :  { %v895_v62 = vsel %vm73_vm0, %v893_v61, 0.0 }
 0xb91   :  { %896 = vadd.xlane.f32.xlu2 %v895_v62 }
 0xb93   :  { %v890_v63 = vpop.f32.mrf.mxu3 }
 0xb94   :  { %v891_v2 = vadd.f32 %v890_v63, %v863_v58  ;;  %v968_v58 = vperm.slane %v1762_v47, 0 }
 0xb96   :  { %v894_v6 = vadd.f32 %v891_v2, %v1709_v57  ;;  %v1454_v57 = vld [vmem:[#allocation2 + $0xd8] sm:$0xff] }
 0xb97   :  { %1019 = vmatpush.bf16.msra.mxu1 %v1454_v57 }
 0xb98   :  { %v898_v7 = vsel %vm73_vm0, %v894_v6, 0.0 }
 0xb99   :  { %899 = vadd.xlane.f32.xlu0 %v898_v7 }
 0xb9b   :  { %1020 = vmatpush.bf16.msra.mxu1 %v1453_v17 }
 0xb9e   :  { %1404 = vmatmul.msk.bf16.vlgmr.msra.gmra.mxu1 %vm73_vm0, %v1656_v35 }
 0xc04   :  { %v897_v8 = vpop.xlane.xlu2 %896 }
 0xc05   :  { %v901_v9 = vmul.f32 %v897_v8, %v1644_v22  ;;  %v1456_v8 = vld [vmem:[#allocation2 + $0xe8] sm:$0xff] }
 0xc06   :  { %1046 = vmatpush.bf16.msra.mxu2 %v1456_v8 }
 0xc07   :  { %v903_v10 = vsub.f32 %v893_v61, %v901_v9  ;;  %v1455_v9 = vld [vmem:[#allocation2 + $0xe0] sm:$0xff] }
 0xc09   :  { %v905_v11 = vmul.f32 %v903_v10, %v903_v10 }
 0xc0a   :  { %1047 = vmatpush.bf16.msra.mxu2 %v1455_v9 }
 0xc0b   :  { %v907_v12 = vsel %vm73_vm0, %v905_v11, 0.0 }
 0xc0c   :  { %v900_v13 = vpop.xlane.xlu0 %899  ;;  %908 = vadd.xlane.f32.xlu1 %v907_v12 }
 0xc0d   :  { %v902_v56 = vmul.f32 %v900_v13, %v1644_v22  ;;  %1413 = vmatmul.msk.bf16.vlgmr.msra.gmra.mxu2 %vm73_vm0, %v1656_v35 }
 0xc0f   :  { %v904_v14 = vsub.f32 %v894_v6, %v902_v56 }
 0xc11   :  { %v906_v15 = vmul.f32 %v904_v14, %v904_v14 }
 0xc13   :  { %v910_v16 = vsel %vm73_vm0, %v906_v15, 0.0  ;;  %v1027_v15 = vperm.slane %v1762_v47, 2 }
 0xc14   :  { %911 = vadd.xlane.f32.xlu2 %v910_v16 }
 0xc1b   :  { %v1022_v3 = vpop.f32.mrf.mxu1 }
 0xc1c   :  { %v1023_v49 = vadd.f32 %v1022_v3, %v1000_v48 }
 0xc1e   :  { %v1056_v50 = vpack.c.bf16 %v1023_v49, %v1023_v49 }
 0xc20   :  { %v1064_v51 = vsel %vm73_vm0, %v1056_v50, 0 }
 0xc21   :  { %1073 = vmatpush.bf16.xpose.msra.mxu3 %v1064_v51 }
 0xc23   :  { %v1024_v52 = vpop.f32.mrf.mxu1 }
 0xc24   :  { %v1025_v53 = vadd.f32 %v1024_v52, %v1000_v48  ;;  %v1161_v48 = vperm.slane %v1762_v47, 3 }
 0xc26   :  { %v1057_v54 = vpack.c.bf16 %v1025_v53, %v1025_v53 }
 0xc28   :  { %v1083_v55 = vsel %vm73_vm0, %v1057_v54, 0 }
 0xc29   :  { %1092 = vmatpush.bf16.xpose.msrb.mxu0 %v1083_v55 }
 0xc7f   :  { %v909_v19 = vpop.xlane.xlu1 %908 }
 0xc80   :  { %v913_v20 = vmul.f32 %v909_v19, %v1644_v22 }
 0xc82   :  { %v915_v21 = vadd.f32 1e-05, %v913_v20 }
 0xc84   :  { %1500 = vrsqrt.f32 %v915_v21  ;;  %vm923_vm4 = vweird.f32 %v915_v21 }
 0xc87   :  { %v912_v4 = vpop.xlane.xlu2 %911 }
 0xc88   :  { %v914_v23 = vmul.f32 %v912_v4, %v1644_v22 }
 0xc8a   :  { %v1501_v24 = vpop.eup %1500  ;;  %v916_v1 = vadd.f32 1e-05, %v914_v23 }
 0xc8b   :  { %v918_v25 = vmul.f32 %v1501_v24, %v915_v21  ;;  %vm924_vm3 = vweird.f32 %v1501_v24 }
 0xc8c   :  { %1502 = vrsqrt.f32 %v916_v1  ;;  %vm925_vm5 = vmor %vm923_vm4, %vm924_vm3  ;;  %vm933_vm7 = vweird.f32 %v916_v1 }
 0xc8d   :  { %v919_v5 = vmul.f32 %v1501_v24, %v918_v25 }
 0xc8f   :  { %v920_v26 = vmul.f32 0.5, %v919_v5 }
 0xc90   :  { %v1049_v17 = vpop.f32.mrf.mxu2 }
 0xc91   :  { %v921_v27 = vsub.f32 1.5, %v920_v26  ;;  %v1050_v19 = vadd.f32 %v1049_v17, %v1027_v15 }
 0xc92   :  { %v1503_v28 = vpop.eup %1502 }
 0xc93   :  { %v922_v29 = vmul.f32 %v1501_v24, %v921_v27  ;;  %v928_v30 = vmul.f32 %v1503_v28, %v916_v1  ;;  %vm934_vm6 = vweird.f32 %v1503_v28  ;;  %v1058_v35 = vpack.c.bf16 %v1050_v19, %v1050_v19 }
 0xc94   :  { %vm935_vm8 = vmor %vm933_vm7, %vm934_vm6  ;;  %v1237_v19 = vperm.slane %v1762_v47, 4 }
 0xc95   :  { %v929_v31 = vmul.f32 %v1503_v28, %v928_v30  ;;  %v926_v32 = vsel %vm925_vm5, %v1501_v24, %v922_v29  ;;  %v1126_v4 = vsel %vm219_vm2, %v1058_v35, 0  ;;  %v1240_v35 = vperm.slane %v1762_v47, 5 }
 0xc96   :  { %v937_v37 = vmul.f32 %v926_v32, %v903_v10  ;;  %1135 = vmatpush.bf16.msrb.mxu1 %v1126_v4 }
 0xc97   :  { %v930_v33 = vmul.f32 0.5, %v929_v31 }
 0xc98   :  { %v940_v41 = vmul.f32 %v939_v36, %v937_v37  ;;  %v1051_v23 = vpop.f32.mrf.mxu2 }
 0xc99   :  { %v931_v34 = vsub.f32 1.5, %v930_v33  ;;  %v1052_v24 = vadd.f32 %v1051_v23, %v1027_v15 }
 0xc9a   :  { %v1752_v44 = vadd.f32 %v942_v40, %v940_v41 }
 0xc9b   :  { %v932_v38 = vmul.f32 %v1503_v28, %v931_v34  ;;  %v1059_v5 = vpack.c.bf16 %v1052_v24, %v1052_v24 }
 0xc9d   :  { %v936_v39 = vsel %vm935_vm8, %v1503_v28, %v932_v38  ;;  %v1145_v28 = vsel %vm219_vm2, %v1059_v5, 0  ;;  %v1458_v38 = vld [vmem:[#allocation2 + $0xf8] sm:$0xff] }
 0xc9e   :  { %v938_v42 = vmul.f32 %v936_v39, %v904_v14  ;;  %1154 = vmatpush.bf16.msrb.mxu2 %v1145_v28  ;;  %1183 = vmatpush.bf16.msrb.mxu3 %v1458_v38  ;;  %v1457_v39 = vld [vmem:[#allocation2 + $0xf0] sm:$0xff] }
 0xca0   :  { %v941_v43 = vmul.f32 %v939_v36, %v938_v42 }
 0xca2   :  { %v1754_v45 = vadd.f32 %v942_v40, %v941_v43  ;;  %1184 = vmatpush.bf16.msrb.mxu3 %v1457_v39 }
 0xca4   :  { %v967_v46 = vpack.c.bf16 %v1754_v45, %v1752_v44 }
 0xca6   :  { %1395 = vmatmul.msk.bf16.vlgmr.msra.gmra.mxu0 %vm73_vm0, %v967_v46 }
 0xd23   :  { %v993_v59 = vpop.f32.mrf.mxu0 }
 0xd24   :  { %v994_v60 = vadd.f32 %v993_v59, %v968_v58 }
 0xd26   :  { %v998_v61 = vmul.f32 0.17677669, %v994_v60 }
 0xd28   :  { %v1054_v62 = vpack.c.bf16 %v998_v61, %v998_v61 }
 0xd2a   :  { %1414 = vmatmul.msk.bf16.vlgmr.msra.gmra.mxu3 %vm73_vm0, %v1054_v62 }
 0xd2b   :  { %v995_v63 = vpop.f32.mrf.mxu0 }
 0xd2c   :  { %v996_v2 = vadd.f32 %v995_v63, %v968_v58 }
 0xd2e   :  { %v999_v6 = vmul.f32 0.17677669, %v996_v2 }
 0xd30   :  { %v1055_v7 = vpack.c.bf16 %v999_v6, %v999_v6 }
 0xd32   :  { %1415 = vmatmul.msk.bf16.vlgmr.msrb.gmra.mxu0 %vm73_vm0, %v1055_v7 }
 0xdad   :  { %v1075_v10 = vpop.f32.mrf.mxu3 }
 0xdae   :  { %v1098_v11 = vsel %vm191_vm1, %v1075_v10, -inf }
 0xdaf   :  { %v1094_v12 = vpop.f32.mrf.mxu0  ;;  %1099 = vmax.xlane.f32.xlu1 %v1098_v11 }
 0xdb0   :  { %v1101_v13 = vsel %vm191_vm1, %v1094_v12, -inf }
 0xdb1   :  { %1102 = vmax.xlane.f32.xlu0 %v1101_v13 }
 0xdb5   :  { %v1077_v56 = vpop.f32.mrf.mxu3 }
 0xdb7   :  { %v1096_v14 = vpop.f32.mrf.mxu0 }
 0xe22   :  { %v1100_v16 = vpop.xlane.xlu1 %1099 }
 0xe23   :  { %v1104_v57 = vsub.f32 %v1075_v10, %v1100_v16 }
 0xe24   :  { %v1103_v18 = vpop.xlane.xlu0 %1102 }
 0xe25   :  { %v1106_v20 = vmul.f32 1.442695, %v1104_v57  ;;  %v1105_v21 = vsub.f32 %v1094_v12, %v1103_v18 }
 0xe27   :  { %1504 = vpow2.f32 %v1106_v20  ;;  %v1108_v0 = vmul.f32 1.442695, %v1105_v21 }
 0xe29   :  { %1506 = vpow2.f32 %v1108_v0 }
 0xe2d   :  { %v1505_v1 = vpop.eup %1504 }
 0xe2e   :  { %v1110_v25 = vsel %vm191_vm1, %v1505_v1, 0.0 }
 0xe2f   :  { %v1507_v26 = vpop.eup %1506  ;;  %1111 = vadd.xlane.f32.xlu0 %v1110_v25 }
 0xe30   :  { %v1113_v27 = vsel %vm191_vm1, %v1507_v26, 0.0 }
 0xe31   :  { %1114 = vadd.xlane.f32.xlu2 %v1113_v27 }
 0xea2   :  { %v1112_v29 = vpop.xlane.xlu0 %1111 }
 0xea3   :  { %1508 = vrcp.f32 %v1112_v29 }
 0xea4   :  { %v1115_v30 = vpop.xlane.xlu2 %1114 }
 0xea5   :  { %1510 = vrcp.f32 %v1115_v30 }
 0xea9   :  { %v1509_v31 = vpop.eup %1508 }
 0xeaa   :  { %v1118_v32 = vmul.f32 %v1509_v31, %v1505_v1 }
 0xeab   :  { %v1511_v33 = vpop.eup %1510 }
 0xeac   :  { %v1120_v34 = vpack.c.bf16 %v1118_v32, %v1118_v32  ;;  %v1119_v36 = vmul.f32 %v1511_v33, %v1507_v26 }
 0xeae   :  { %v1121_v37 = vpack.c.bf16 %v1119_v36, %v1119_v36  ;;  %1416 = vmatmul.msk.bf16.vlgmr.msrb.gmra.mxu1 %vm191_vm1, %v1120_v34 }
 0xeb0   :  { %1417 = vmatmul.msk.bf16.vlgmr.msrb.gmra.mxu2 %vm191_vm1, %v1121_v37 }
 0xf2b   :  { %v1137_v40 = vpop.f32.mrf.mxu1 }
 0xf33   :  { %v1139_v41 = vpop.f32.mrf.mxu1  ;;  %v1156_v42 = vpop.f32.mrf.mxu2 }
 0xf34   :  { %v1160_v43 = vpack.c.bf16 %v1156_v42, %v1137_v40 }
 0xf36   :  { %1426 = vmatmul.msk.bf16.vlgmr.msrb.gmra.mxu3 %vm73_vm0, %v1160_v43 }
 0xf3b   :  { %v1158_v46 = vpop.f32.mrf.mxu2 }
 0xfb9   :  { %v1186_v3 = vpop.f32.mrf.mxu3 }
 0xfba   :  { %v1187_v49 = vadd.f32 %v1186_v3, %v1161_v48 }
 0xfbc   :  { %v1191_v50 = vadd.f32 %v1187_v49, %v1752_v44 }
 0xfbe   :  { %v1193_v51 = vsel %vm73_vm0, %v1191_v50, 0.0 }
 0xfbf   :  { %1194 = vadd.xlane.f32.xlu1 %v1193_v51 }
 0xfc1   :  { %v1188_v52 = vpop.f32.mrf.mxu3 }
 0xfc2   :  { %v1189_v53 = vadd.f32 %v1188_v52, %v1161_v48 }
 0xfc4   :  { %v1192_v54 = vadd.f32 %v1189_v53, %v1754_v45 }
 0xfc6   :  { %v1196_v55 = vsel %vm73_vm0, %v1192_v54, 0.0 }
 0xfc7   :  { %1197 = vadd.xlane.f32.xlu2 %v1196_v55 }
0x1032   :  { %v1195_v58 = vpop.xlane.xlu1 %1194 }
0x1033   :  { %v1199_v59 = vmul.f32 %v1195_v58, %v1644_v22 }
0x1035   :  { %v1201_v60 = vsub.f32 %v1191_v50, %v1199_v59 }
0x1037   :  { %v1203_v61 = vmul.f32 %v1201_v60, %v1201_v60 }
0x1039   :  { %v1205_v62 = vsel %vm73_vm0, %v1203_v61, 0.0 }
0x103a   :  { %v1198_v63 = vpop.xlane.xlu2 %1197  ;;  %1206 = vadd.xlane.f32.xlu0 %v1205_v62 }
0x103b   :  { %v1200_v44 = vmul.f32 %v1198_v63, %v1644_v22 }
0x103d   :  { %v1202_v2 = vsub.f32 %v1192_v54, %v1200_v44 }
0x103f   :  { %v1204_v6 = vmul.f32 %v1202_v2, %v1202_v2 }
0x1041   :  { %v1208_v7 = vsel %vm73_vm0, %v1204_v6, 0.0 }
0x1042   :  { %1209 = vadd.xlane.f32.xlu1 %v1208_v7 }
0x10ad   :  { %v1207_v45 = vpop.xlane.xlu0 %1206 }
0x10ae   :  { %v1211_v8 = vmul.f32 %v1207_v45, %v1644_v22 }
0x10b0   :  { %v1213_v9 = vadd.f32 1e-05, %v1211_v8 }
0x10b2   :  { %1512 = vrsqrt.f32 %v1213_v9  ;;  %vm1221_vm2 = vweird.f32 %v1213_v9 }
0x10b5   :  { %v1210_v10 = vpop.xlane.xlu1 %1209 }
0x10b6   :  { %v1212_v11 = vmul.f32 %v1210_v10, %v1644_v22 }
0x10b8   :  { %v1513_v12 = vpop.eup %1512  ;;  %v1214_v13 = vadd.f32 1e-05, %v1212_v11 }
0x10b9   :  { %v1216_v56 = vmul.f32 %v1513_v12, %v1213_v9  ;;  %vm1222_vm1 = vweird.f32 %v1513_v12 }
0x10ba   :  { %1514 = vrsqrt.f32 %v1214_v13  ;;  %vm1223_vm9 = vmor %vm1221_vm2, %vm1222_vm1  ;;  %vm1231_vm11 = vweird.f32 %v1214_v13 }
0x10bb   :  { %v1217_v14 = vmul.f32 %v1513_v12, %v1216_v56 }
0x10bd   :  { %v1218_v15 = vmul.f32 0.5, %v1217_v14 }
0x10bf   :  { %v1219_v16 = vsub.f32 1.5, %v1218_v15 }
0x10c0   :  { %v1515_v57 = vpop.eup %1514 }
0x10c1   :  { %v1220_v17 = vmul.f32 %v1513_v12, %v1219_v16  ;;  %v1226_v18 = vmul.f32 %v1515_v57, %v1214_v13  ;;  %vm1232_vm10 = vweird.f32 %v1515_v57 }
0x10c2   :  { %vm1233_vm12 = vmor %vm1231_vm11, %vm1232_vm10 }
0x10c3   :  { %v1224_v20 = vsel %vm1223_vm9, %v1513_v12, %v1220_v17  ;;  %v1227_v21 = vmul.f32 %v1515_v57, %v1226_v18 }
0x10c4   :  { %v1235_v22 = vmul.f32 %v1224_v20, %v1201_v60 }
0x10c5   :  { %v1228_v0 = vmul.f32 0.5, %v1227_v21 }
0x10c6   :  { %v1238_v4 = vmul.f32 %v1237_v19, %v1235_v22 }
0x10c7   :  { %v1229_v23 = vsub.f32 1.5, %v1228_v0 }
0x10c8   :  { %v1241_v24 = vadd.f32 %v1240_v35, %v1238_v4 }
0x10c9   :  { %v1230_v1 = vmul.f32 %v1515_v57, %v1229_v23 }
0x10ca   :  { %1243 = vst.msk [vmem:[#allocation5] sm:$0xff] %vm73_vm0, %v1241_v24 }
0x10cb   :  { %v1234_v25 = vsel %vm1233_vm12, %v1515_v57, %v1230_v1 }
0x10cc   :  { %v1236_v5 = vmul.f32 %v1234_v25, %v1202_v2 }
0x10ce   :  { %v1239_v47 = vmul.f32 %v1237_v19, %v1236_v5 }
0x10d0   :  { %v1242_v26 = vadd.f32 %v1240_v35, %v1239_v47 }
0x10d2   :  { %1244 = vst.msk [vmem:[#allocation5 + $0x8] sm:$0xff] %vm73_vm0, %v1242_v26 }
0x10d3   :  { %1257 = dma.vmem_to_hbm [thread:$0]  %s1250_s9, 256, %s1252_s12, [#allocation4], %s1573_s13, %s1573_s13, %s1574_s14  }
0x10d4   :  { %1566 = dma.done.wait [#allocation4], 256  }
0x10d5   :  { %1567 = vsyncadd [#allocation4], 4294967040 }
0x10d6   :  { %1262 = vsyncpa [#allocation3], 1 }
0x10d7   :  { %1263 = vsyncpa [#allocation4], 1 }

// kernel: tpu_custom_call.1
= control target key start
LH: loop header
LB: loop body
LE: loop exit
PB: predicated region body
PF: predicated region fallthrough
CT: control target
= control target key end

     0   :  { %9 = vsyncpa [#allocation3], 0  ;;  %s1800_s0 = inlined_call_operand.vmem [shape: f32[2,8,32], index: 0, kind: input, shape index: {}]   ;;  %s1801_s1 = inlined_call_operand.vmem [shape: f32[2,8,32], index: 1, kind: input, shape index: {}]   ;;  %s1802_s2 = inlined_call_operand.hbm [shape: bf16[4,4,32,32], index: 2, kind: input, shape index: {}]   ;;  %s1803_s3 = inlined_call_operand.vmem [shape: f32[4,6,32], index: 3, kind: input, shape index: {}]   ;;  %s1804_s4 = inlined_call_operand.hbm [shape: f32[2,8,32], index: 4, kind: output, shape index: {}]  }
   0x1   :  { %10 = vsyncpa [#allocation4], 0  ;;  %s19_s17 = sshll.u32 %s1802_s2, 4  ;;  %s1568_s18 = smov [#allocation2]   ;;  %s20_s17 = int_to_ptr.hbm [resolvable:$true] %s19_s17 }
   0x2   :  { %s21_s19 = sshll.u32 %s1568_s18, 4  ;;  %s1569_s20 = smov 64   ;;  %s22_s19 = int_to_ptr.vmem [resolvable:$true] %s21_s19 }
   0x3   :  { %s1570_s21 = smov 4  }
   0x4   :  { %27 = dma.hbm_to_vmem [thread:$0]  %s20_s17, 4096, %s22_s19, [#allocation3], %s1569_s20, %s1569_s20, %s1570_s21  }
   0x5   :  { %1564 = dma.done.wait [#allocation3], 4096  }
   0x6   :  { %1565 = vsyncadd [#allocation3], 4294963200  ;;  %v1428_v0 = vld [vmem:[#allocation2 + $0x8] sm:$0xff]  ;;  %v1430_v1 = vld [vmem:[#allocation2 + $0x18] sm:$0xff]  ;;  %vm73_vm0 = vcmask 261120   ;;  %vm191_vm1 = vcmask 64512  }
   0x7   :  { %v1427_v2 = vld [vmem:[#allocation2] sm:$0xff]  ;;  %83 = vmatpush.bf16.msra.mxu0 %v1428_v0  ;;  %112 = vmatpush.bf16.msra.mxu1 %v1430_v1  ;;  %v1429_v3 = vld [vmem:[#allocation2 + $0x10] sm:$0xff]  ;;  %v1611_v5 = vld [vmem:[%s1800_s0 + $0x8] sm:$0xff]  ;;  %vm219_vm2 = vcmask 1043456   ;;  %s1251_s12 = sshll.u32 %s1804_s4, 4  ;;  %s1573_s13 = smov 128   ;;  %s1252_s12 = int_to_ptr.hbm [resolvable:$true] %s1251_s12 }
   0x8   :  { %v1606_v4 = vld [vmem:[%s1800_s0] sm:$0xff]  ;;  %v1432_v26 = vld [vmem:[#allocation2 + $0x28] sm:$0xff]  ;;  %v1434_v53 = vld [vmem:[#allocation2 + $0x38] sm:$0xff]  ;;  %s1574_s14 = smov 8  }
   0x9   :  { %v59_v6 = vpack.c.bf16 %v1611_v5, %v1606_v4  ;;  %v1620_v7 = vld [vmem:[%s1803_s3] sm:$0x3f]  ;;  %139 = vmatpush.bf16.msra.mxu2 %v1432_v26  ;;  %v1433_v62 = vld [vmem:[#allocation2 + $0x30] sm:$0xff] }
   0xa   :  { %v60_v8 = vperm.slane %v1620_v7, 0  ;;  %v93_v9 = vperm.slane %v1620_v7, 1  ;;  %v1431_v27 = vld [vmem:[#allocation2 + $0x20] sm:$0xff]  ;;  %v120_v34 = vperm.slane %v1620_v7, 2 }
   0xb   :  { %84 = vmatpush.bf16.msra.mxu0 %v1427_v2  ;;  %113 = vmatpush.bf16.msra.mxu1 %v1429_v3 }
   0xd   :  { %140 = vmatpush.bf16.msra.mxu2 %v1431_v27 }
   0xe   :  { %1272 = vmatmul.msk.bf16.vlgmr.msra.gmra.mxu0 %vm73_vm0, %v59_v6  ;;  %1281 = vmatmul.msk.bf16.vlgmr.msra.gmra.mxu1 %vm73_vm0, %v59_v6 }
  0x10   :  { %1290 = vmatmul.msk.bf16.vlgmr.msra.gmra.mxu2 %vm73_vm0, %v59_v6  ;;  %v256_v6 = vperm.slane %v1620_v7, 3 }
  0x8b   :  { %v86_v10 = vpop.f32.mrf.mxu0  ;;  %v115_v11 = vpop.f32.mrf.mxu1 }
  0x8c   :  { %v87_v12 = vadd.f32 %v86_v10, %v60_v8  ;;  %v116_v13 = vadd.f32 %v115_v11, %v93_v9 }
  0x8e   :  { %v149_v14 = vpack.c.bf16 %v116_v13, %v116_v13  ;;  %v91_v15 = vmul.f32 0.17677669, %v87_v12 }
  0x90   :  { %v157_v16 = vsel %vm73_vm0, %v149_v14, 0  ;;  %v147_v19 = vpack.c.bf16 %v91_v15, %v91_v15 }
  0x91   :  { %166 = vmatpush.bf16.xpose.msra.mxu3 %v157_v16  ;;  %v1571_v16 = vmov 32.0  }
  0x93   :  { %v88_v17 = vpop.f32.mrf.mxu0  ;;  %v117_v18 = vpop.f32.mrf.mxu1 }
  0x94   :  { %v118_v20 = vadd.f32 %v117_v18, %v93_v9  ;;  %v89_v21 = vadd.f32 %v88_v17, %v60_v8  ;;  %v142_v37 = vpop.f32.mrf.mxu2 }
  0x95   :  { %v143_v38 = vadd.f32 %v142_v37, %v120_v34 }
  0x96   :  { %v150_v22 = vpack.c.bf16 %v118_v20, %v118_v20  ;;  %v92_v24 = vmul.f32 0.17677669, %v89_v21 }
  0x97   :  { %v151_v40 = vpack.c.bf16 %v143_v38, %v143_v38 }
  0x98   :  { %1291 = vmatmul.msk.bf16.vlgmr.msra.gmra.mxu3 %vm73_vm0, %v147_v19  ;;  %v176_v23 = vsel %vm73_vm0, %v150_v22, 0  ;;  %v148_v25 = vpack.c.bf16 %v92_v24, %v92_v24 }
  0x99   :  { %185 = vmatpush.bf16.xpose.msrb.mxu0 %v176_v23  ;;  %v221_v41 = vsel %vm219_vm2, %v151_v40, 0  ;;  %278 = vmatpush.bf16.msrb.mxu3 %v1434_v53 }
  0x9a   :  { %230 = vmatpush.bf16.msrb.mxu1 %v221_v41 }
  0x9c   :  { %v144_v44 = vpop.f32.mrf.mxu2 }
  0x9d   :  { %v145_v45 = vadd.f32 %v144_v44, %v120_v34  ;;  %279 = vmatpush.bf16.msrb.mxu3 %v1433_v62  ;;  %v38_v34 = vld [vmem:[%s1801_s1 + $0x8] sm:$0xff] }
  0x9f   :  { %v152_v49 = vpack.c.bf16 %v145_v45, %v145_v45 }
  0xa0   :  { %1292 = vmatmul.msk.bf16.vlgmr.msrb.gmra.mxu0 %vm73_vm0, %v148_v25 }
  0xa1   :  { %v240_v50 = vsel %vm219_vm2, %v152_v49, 0 }
  0xa2   :  { %249 = vmatpush.bf16.msrb.mxu2 %v240_v50 }
 0x11b   :  { %v168_v28 = vpop.f32.mrf.mxu3 }
 0x11c   :  { %v192_v33 = vsel %vm191_vm1, %v168_v28, -inf }
 0x11d   :  { %v187_v29 = vpop.f32.mrf.mxu0 }
 0x11e   :  { %v195_v30 = vsel %vm191_vm1, %v187_v29, -inf }
 0x11f   :  { %196 = vmax.xlane.f32.xlu0 %v195_v30 }
 0x123   :  { %v170_v31 = vpop.f32.mrf.mxu3 }
 0x124   :  { %v1438_v31 = vld [vmem:[#allocation2 + $0x58] sm:$0xff] }
 0x125   :  { %v189_v32 = vpop.f32.mrf.mxu0  ;;  %423 = vmatpush.bf16.msra.mxu1 %v1438_v31 }
 0x126   :  { %v1437_v32 = vld [vmem:[#allocation2 + $0x50] sm:$0xff] }
 0x127   :  { %193 = vmax.xlane.f32.xlu0 %v192_v33  ;;  %v37_v33 = vld [vmem:[%s1801_s1] sm:$0xff] }
 0x129   :  { %424 = vmatpush.bf16.msra.mxu1 %v1437_v32 }
 0x192   :  { %v197_v35 = vpop.xlane.xlu0 %196 }
 0x193   :  { %v199_v36 = vsub.f32 %v187_v29, %v197_v35  ;;  %v1656_v35 = vpack.c.bf16 %v38_v34, %v37_v33 }
 0x195   :  { %v202_v39 = vmul.f32 1.442695, %v199_v36  ;;  %v1436_v36 = vld [vmem:[#allocation2 + $0x48] sm:$0xff] }
 0x196   :  { %391 = vmatpush.bf16.msra.mxu0 %v1436_v36 }
 0x197   :  { %1466 = vpow2.f32 %v202_v39  ;;  %v1435_v39 = vld [vmem:[#allocation2 + $0x40] sm:$0xff] }
 0x19a   :  { %v194_v42 = vpop.xlane.xlu0 %193  ;;  %392 = vmatpush.bf16.msra.mxu0 %v1435_v39 }
 0x19b   :  { %v198_v43 = vsub.f32 %v168_v28, %v194_v42 }
 0x19d   :  { %v1467_v46 = vpop.eup %1466  ;;  %v200_v47 = vmul.f32 1.442695, %v198_v43 }
 0x19e   :  { %v207_v48 = vsel %vm191_vm1, %v1467_v46, 0.0 }
 0x19f   :  { %1468 = vpow2.f32 %v200_v47  ;;  %208 = vadd.xlane.f32.xlu1 %v207_v48 }
 0x1a5   :  { %v1469_v51 = vpop.eup %1468 }
 0x1a6   :  { %v204_v52 = vsel %vm191_vm1, %v1469_v51, 0.0 }
 0x1a7   :  { %205 = vadd.xlane.f32.xlu1 %v204_v52 }
 0x212   :  { %v209_v54 = vpop.xlane.xlu1 %208 }
 0x213   :  { %1470 = vrcp.f32 %v209_v54 }
 0x219   :  { %v1471_v55 = vpop.eup %1470 }
 0x21a   :  { %v213_v56 = vmul.f32 %v1471_v55, %v1467_v46  ;;  %v206_v57 = vpop.xlane.xlu1 %205 }
 0x21b   :  { %1472 = vrcp.f32 %v206_v57 }
 0x21c   :  { %v215_v58 = vpack.c.bf16 %v213_v56, %v213_v56  ;;  %1474 = vrcp.f32 %v1571_v16  ;;  %v339_v56 = vperm.slane %v1620_v7, 4 }
 0x21e   :  { %1294 = vmatmul.msk.bf16.vlgmr.msrb.gmra.mxu2 %vm191_vm1, %v215_v58 }
 0x221   :  { %v1473_v59 = vpop.eup %1472 }
 0x222   :  { %v212_v60 = vmul.f32 %v1473_v59, %v1469_v51  ;;  %v1475_v17 = vpop.eup %1474 }
 0x223   :  { %v295_v18 = vmul.f32 32.0, %v1475_v17  ;;  %vm299_vm3 = vweird.f32 %v1475_v17 }
 0x224   :  { %v214_v61 = vpack.c.bf16 %v212_v60, %v212_v60  ;;  %v342_v60 = vperm.slane %v1620_v7, 5 }
 0x225   :  { %v296_v19 = vsub.f32 1.0, %v295_v18 }
 0x226   :  { %1293 = vmatmul.msk.bf16.vlgmr.msrb.gmra.mxu1 %vm191_vm1, %v214_v61 }
 0x227   :  { %v297_v20 = vmul.f32 %v1475_v17, %v296_v19 }
 0x229   :  { %v298_v21 = vadd.f32 %v1475_v17, %v297_v20 }
 0x22b   :  { %v1644_v22 = vsel %vm299_vm3, %v1475_v17, %v298_v21 }
 0x236   :  { %1322 = vmatmul.msk.bf16.vlgmr.msra.gmra.mxu1 %vm73_vm0, %v1656_v35 }
 0x2a1   :  { %v251_v63 = vpop.f32.mrf.mxu2 }
 0x2a3   :  { %v232_v0 = vpop.f32.mrf.mxu1 }
 0x2a4   :  { %v255_v1 = vpack.c.bf16 %v251_v63, %v232_v0 }
 0x2a6   :  { %1303 = vmatmul.msk.bf16.vlgmr.msrb.gmra.mxu3 %vm73_vm0, %v255_v1 }
 0x2a9   :  { %v253_v2 = vpop.f32.mrf.mxu2 }
 0x2ab   :  { %v234_v3 = vpop.f32.mrf.mxu1 }
 0x2ac   :  { %v1674_v3 = vld [vmem:[%s1803_s3 + $0x8] sm:$0x3f] }
 0x2ad   :  { %v431_v31 = vperm.slane %v1674_v3, 2 }
 0x2b3   :  { %v426_v7 = vpop.f32.mrf.mxu1 }
 0x329   :  { %v281_v8 = vpop.f32.mrf.mxu3 }
 0x32a   :  { %v282_v9 = vadd.f32 %v281_v8, %v256_v6 }
 0x32c   :  { %v286_v10 = vadd.f32 %v282_v9, %v1606_v4 }
 0x32e   :  { %v288_v11 = vsel %vm73_vm0, %v286_v10, 0.0 }
 0x32f   :  { %289 = vadd.xlane.f32.xlu2 %v288_v11  ;;  %v428_v11 = vpop.f32.mrf.mxu1 }
 0x331   :  { %v283_v12 = vpop.f32.mrf.mxu3 }
 0x332   :  { %v284_v13 = vadd.f32 %v283_v12, %v256_v6  ;;  %v401_v6 = vperm.slane %v1674_v3, 1 }
 0x334   :  { %v287_v14 = vadd.f32 %v284_v13, %v1611_v5  ;;  %v427_v8 = vadd.f32 %v426_v7, %v401_v6  ;;  %v429_v12 = vadd.f32 %v428_v11, %v401_v6  ;;  %v565_v7 = vperm.slane %v1674_v3, 3 }
 0x336   :  { %v291_v15 = vsel %vm73_vm0, %v287_v14, 0.0  ;;  %v460_v9 = vpack.c.bf16 %v427_v8, %v427_v8  ;;  %v461_v13 = vpack.c.bf16 %v429_v12, %v429_v12 }
 0x337   :  { %292 = vadd.xlane.f32.xlu2 %v291_v15  ;;  %v369_v15 = vperm.slane %v1674_v3, 0 }
 0x3a2   :  { %v290_v4 = vpop.xlane.xlu2 %289 }
 0x3a3   :  { %v301_v23 = vmul.f32 %v1644_v22, %v290_v4 }
 0x3a5   :  { %v303_v24 = vsub.f32 %v286_v10, %v301_v23  ;;  %v468_v10 = vsel %vm73_vm0, %v460_v9, 0 }
 0x3a6   :  { %477 = vmatpush.bf16.xpose.msra.mxu3 %v468_v10 }
 0x3a7   :  { %v305_v25 = vmul.f32 %v303_v24, %v303_v24 }
 0x3a9   :  { %v307_v5 = vsel %vm73_vm0, %v305_v25, 0.0  ;;  %v1439_v25 = vld [vmem:[#allocation2 + $0x60] sm:$0xff] }
 0x3aa   :  { %308 = vadd.xlane.f32.xlu0 %v307_v5  ;;  %v293_v26 = vpop.xlane.xlu2 %292 }
 0x3ab   :  { %v302_v27 = vmul.f32 %v1644_v22, %v293_v26 }
 0x3ad   :  { %v304_v28 = vsub.f32 %v287_v14, %v302_v27  ;;  %v487_v14 = vsel %vm73_vm0, %v461_v13, 0 }
 0x3ae   :  { %496 = vmatpush.bf16.xpose.msrb.mxu0 %v487_v14 }
 0x3af   :  { %v306_v29 = vmul.f32 %v304_v28, %v304_v28 }
 0x3b1   :  { %v310_v30 = vsel %vm73_vm0, %v306_v29, 0.0 }
 0x3b2   :  { %311 = vadd.xlane.f32.xlu1 %v310_v30 }
 0x41d   :  { %v309_v37 = vpop.xlane.xlu0 %308 }
 0x41e   :  { %v313_v38 = vmul.f32 %v309_v37, %v1644_v22 }
 0x420   :  { %v315_v40 = vadd.f32 1e-05, %v313_v38 }
 0x422   :  { %1476 = vrsqrt.f32 %v315_v40  ;;  %vm323_vm5 = vweird.f32 %v315_v40 }
 0x425   :  { %v312_v41 = vpop.xlane.xlu1 %311 }
 0x426   :  { %v314_v42 = vmul.f32 %v312_v41, %v1644_v22 }
 0x428   :  { %v1477_v43 = vpop.eup %1476  ;;  %v316_v44 = vadd.f32 1e-05, %v314_v42 }
 0x429   :  { %v318_v45 = vmul.f32 %v1477_v43, %v315_v40  ;;  %vm324_vm4 = vweird.f32 %v1477_v43 }
 0x42a   :  { %1478 = vrsqrt.f32 %v316_v44  ;;  %vm325_vm6 = vmor %vm323_vm5, %vm324_vm4  ;;  %vm333_vm8 = vweird.f32 %v316_v44 }
 0x42b   :  { %v319_v46 = vmul.f32 %v1477_v43, %v318_v45 }
 0x42d   :  { %v320_v47 = vmul.f32 0.5, %v319_v46 }
 0x42f   :  { %v321_v48 = vsub.f32 1.5, %v320_v47 }
 0x430   :  { %v1479_v49 = vpop.eup %1478 }
 0x431   :  { %v322_v50 = vmul.f32 %v1477_v43, %v321_v48  ;;  %v328_v51 = vmul.f32 %v1479_v49, %v316_v44  ;;  %vm334_vm7 = vweird.f32 %v1479_v49 }
 0x432   :  { %vm335_vm9 = vmor %vm333_vm8, %vm334_vm7 }
 0x433   :  { %v329_v52 = vmul.f32 %v1479_v49, %v328_v51  ;;  %v326_v53 = vsel %vm325_vm6, %v1477_v43, %v322_v50 }
 0x434   :  { %v337_v57 = vmul.f32 %v326_v53, %v303_v24  ;;  %v1440_v24 = vld [vmem:[#allocation2 + $0x68] sm:$0xff] }
 0x435   :  { %v330_v54 = vmul.f32 0.5, %v329_v52  ;;  %450 = vmatpush.bf16.msra.mxu2 %v1440_v24 }
 0x436   :  { %v340_v61 = vmul.f32 %v339_v56, %v337_v57 }
 0x437   :  { %v331_v55 = vsub.f32 1.5, %v330_v54 }
 0x438   :  { %v1664_v0 = vadd.f32 %v342_v60, %v340_v61 }
 0x439   :  { %v332_v58 = vmul.f32 %v1479_v49, %v331_v55  ;;  %451 = vmatpush.bf16.msra.mxu2 %v1439_v25  ;;  %v1446_v25 = vld [vmem:[#allocation2 + $0x98] sm:$0xff] }
 0x43b   :  { %v336_v59 = vsel %vm335_vm9, %v1479_v49, %v332_v58 }
 0x43c   :  { %v338_v62 = vmul.f32 %v336_v59, %v304_v28  ;;  %1331 = vmatmul.msk.bf16.vlgmr.msra.gmra.mxu2 %vm73_vm0, %v1656_v35  ;;  %v1442_v59 = vld [vmem:[#allocation2 + $0x78] sm:$0xff] }
 0x43d   :  { %587 = vmatpush.bf16.msrb.mxu3 %v1442_v59 }
 0x43e   :  { %v341_v63 = vmul.f32 %v339_v56, %v338_v62 }
 0x440   :  { %v1666_v1 = vadd.f32 %v342_v60, %v341_v63  ;;  %v1441_v60 = vld [vmem:[#allocation2 + $0x70] sm:$0xff] }
 0x441   :  { %588 = vmatpush.bf16.msrb.mxu3 %v1441_v60 }
 0x442   :  { %v367_v2 = vpack.c.bf16 %v1666_v1, %v1664_v0 }
 0x444   :  { %1313 = vmatmul.msk.bf16.vlgmr.msra.gmra.mxu0 %vm73_vm0, %v367_v2 }
 0x4bf   :  { %v453_v34 = vpop.f32.mrf.mxu2 }
 0x4c0   :  { %v454_v37 = vadd.f32 %v453_v34, %v431_v31 }
 0x4c1   :  { %v394_v16 = vpop.f32.mrf.mxu0 }
 0x4c2   :  { %v395_v17 = vadd.f32 %v394_v16, %v369_v15  ;;  %v462_v40 = vpack.c.bf16 %v454_v37, %v454_v37 }
 0x4c4   :  { %v399_v18 = vmul.f32 0.17677669, %v395_v17  ;;  %v530_v42 = vsel %vm219_vm2, %v462_v40, 0 }
 0x4c5   :  { %539 = vmatpush.bf16.msrb.mxu1 %v530_v42 }
 0x4c6   :  { %v458_v19 = vpack.c.bf16 %v399_v18, %v399_v18 }
 0x4c7   :  { %v455_v43 = vpop.f32.mrf.mxu2 }
 0x4c8   :  { %1332 = vmatmul.msk.bf16.vlgmr.msra.gmra.mxu3 %vm73_vm0, %v458_v19  ;;  %v456_v44 = vadd.f32 %v455_v43, %v431_v31 }
 0x4c9   :  { %v396_v20 = vpop.f32.mrf.mxu0  ;;  %721 = vmatpush.bf16.msra.mxu1 %v1446_v25 }
 0x4ca   :  { %v397_v21 = vadd.f32 %v396_v20, %v369_v15  ;;  %v463_v47 = vpack.c.bf16 %v456_v44, %v456_v44 }
 0x4cc   :  { %v400_v4 = vmul.f32 0.17677669, %v397_v21  ;;  %v549_v50 = vsel %vm219_vm2, %v463_v47, 0 }
 0x4cd   :  { %558 = vmatpush.bf16.msrb.mxu2 %v549_v50 }
 0x4ce   :  { %v459_v23 = vpack.c.bf16 %v400_v4, %v400_v4 }
 0x4d0   :  { %1333 = vmatmul.msk.bf16.vlgmr.msrb.gmra.mxu0 %vm73_vm0, %v459_v23 }
 0x54b   :  { %v479_v5 = vpop.f32.mrf.mxu3 }
 0x54c   :  { %v502_v26 = vsel %vm191_vm1, %v479_v5, -inf }
 0x54d   :  { %v498_v27 = vpop.f32.mrf.mxu0  ;;  %503 = vmax.xlane.f32.xlu0 %v502_v26 }
 0x54e   :  { %v505_v28 = vsel %vm191_vm1, %v498_v27, -inf }
 0x54f   :  { %506 = vmax.xlane.f32.xlu2 %v505_v28  ;;  %v1443_v28 = vld [vmem:[#allocation2 + $0x80] sm:$0xff] }
 0x553   :  { %v481_v29 = vpop.f32.mrf.mxu3 }
 0x554   :  { %v1445_v29 = vld [vmem:[#allocation2 + $0x90] sm:$0xff] }
 0x555   :  { %v500_v30 = vpop.f32.mrf.mxu0  ;;  %722 = vmatpush.bf16.msra.mxu1 %v1445_v29 }
 0x556   :  { %v1447_v30 = vld [vmem:[#allocation2 + $0xa0] sm:$0xff] }
 0x5c0   :  { %v504_v32 = vpop.xlane.xlu0 %503 }
 0x5c1   :  { %v508_v33 = vsub.f32 %v479_v5, %v504_v32  ;;  %v1448_v5 = vld [vmem:[#allocation2 + $0xa8] sm:$0xff] }
 0x5c2   :  { %v507_v36 = vpop.xlane.xlu2 %506  ;;  %748 = vmatpush.bf16.msra.mxu2 %v1448_v5 }
 0x5c3   :  { %v510_v38 = vmul.f32 1.442695, %v508_v33  ;;  %v509_v39 = vsub.f32 %v498_v27, %v507_v36 }
 0x5c5   :  { %1480 = vpow2.f32 %v510_v38  ;;  %v512_v41 = vmul.f32 1.442695, %v509_v39 }
 0x5c6   :  { %749 = vmatpush.bf16.msra.mxu2 %v1447_v30 }
 0x5c7   :  { %1482 = vpow2.f32 %v512_v41 }
 0x5cb   :  { %v1481_v45 = vpop.eup %1480 }
 0x5cc   :  { %v514_v46 = vsel %vm191_vm1, %v1481_v45, 0.0 }
 0x5cd   :  { %v1483_v48 = vpop.eup %1482  ;;  %515 = vadd.xlane.f32.xlu2 %v514_v46 }
 0x5ce   :  { %v517_v49 = vsel %vm191_vm1, %v1483_v48, 0.0 }
 0x5cf   :  { %518 = vadd.xlane.f32.xlu1 %v517_v49 }
 0x640   :  { %v516_v51 = vpop.xlane.xlu2 %515 }
 0x641   :  { %1484 = vrcp.f32 %v516_v51 }
 0x642   :  { %v519_v52 = vpop.xlane.xlu1 %518 }
 0x643   :  { %1486 = vrcp.f32 %v519_v52  ;;  %v644_v52 = vperm.slane %v1674_v3, 5 }
 0x647   :  { %v1485_v53 = vpop.eup %1484 }
 0x648   :  { %v522_v54 = vmul.f32 %v1485_v53, %v1481_v45 }
 0x649   :  { %v1487_v55 = vpop.eup %1486 }
 0x64a   :  { %v524_v56 = vpack.c.bf16 %v522_v54, %v522_v54  ;;  %v523_v57 = vmul.f32 %v1487_v55, %v1483_v48  ;;  %v641_v48 = vperm.slane %v1674_v3, 4  ;;  %v1719_v3 = vld [vmem:[%s1803_s3 + $0x10] sm:$0x3f] }
 0x64b   :  { %v702_v59 = vperm.slane %v1719_v3, 1  ;;  %v670_v60 = vperm.slane %v1719_v3, 0 }
 0x64c   :  { %v525_v58 = vpack.c.bf16 %v523_v57, %v523_v57  ;;  %1334 = vmatmul.msk.bf16.vlgmr.msrb.gmra.mxu1 %vm191_vm1, %v524_v56 }
 0x64e   :  { %1335 = vmatmul.msk.bf16.vlgmr.msrb.gmra.mxu2 %vm191_vm1, %v525_v58 }
 0x6c9   :  { %v541_v61 = vpop.f32.mrf.mxu1 }
 0x6d1   :  { %v543_v62 = vpop.f32.mrf.mxu1  ;;  %v560_v63 = vpop.f32.mrf.mxu2 }
 0x6d2   :  { %v564_v2 = vpack.c.bf16 %v560_v63, %v541_v61 }
 0x6d4   :  { %1344 = vmatmul.msk.bf16.vlgmr.msrb.gmra.mxu3 %vm73_vm0, %v564_v2 }
 0x6d9   :  { %v562_v6 = vpop.f32.mrf.mxu2 }
 0x757   :  { %v590_v8 = vpop.f32.mrf.mxu3 }
 0x758   :  { %v591_v9 = vadd.f32 %v590_v8, %v565_v7 }
 0x75a   :  { %v595_v10 = vadd.f32 %v591_v9, %v1664_v0 }
 0x75c   :  { %v597_v11 = vsel %vm73_vm0, %v595_v10, 0.0 }
 0x75d   :  { %598 = vadd.xlane.f32.xlu0 %v597_v11 }
 0x75f   :  { %v592_v12 = vpop.f32.mrf.mxu3 }
 0x760   :  { %v593_v13 = vadd.f32 %v592_v12, %v565_v7  ;;  %v729_v7 = vperm.slane %v1719_v3, 2 }
 0x762   :  { %v596_v14 = vadd.f32 %v593_v13, %v1666_v1  ;;  %v1444_v1 = vld [vmem:[#allocation2 + $0x88] sm:$0xff] }
 0x763   :  { %692 = vmatpush.bf16.msra.mxu0 %v1444_v1 }
 0x764   :  { %v600_v15 = vsel %vm73_vm0, %v596_v14, 0.0 }
 0x765   :  { %601 = vadd.xlane.f32.xlu1 %v600_v15 }
 0x767   :  { %693 = vmatpush.bf16.msra.mxu0 %v1443_v28 }
 0x7d0   :  { %v599_v16 = vpop.xlane.xlu0 %598 }
 0x7d1   :  { %v603_v17 = vmul.f32 %v599_v16, %v1644_v22 }
 0x7d3   :  { %v605_v18 = vsub.f32 %v595_v10, %v603_v17 }
 0x7d5   :  { %v607_v19 = vmul.f32 %v605_v18, %v605_v18 }
 0x7d7   :  { %v609_v20 = vsel %vm73_vm0, %v607_v19, 0.0 }
 0x7d8   :  { %v602_v21 = vpop.xlane.xlu1 %601  ;;  %610 = vadd.xlane.f32.xlu2 %v609_v20 }
 0x7d9   :  { %v604_v0 = vmul.f32 %v602_v21, %v1644_v22 }
 0x7db   :  { %v606_v4 = vsub.f32 %v596_v14, %v604_v0 }
 0x7dd   :  { %v608_v23 = vmul.f32 %v606_v4, %v606_v4 }
 0x7df   :  { %v612_v24 = vsel %vm73_vm0, %v608_v23, 0.0 }
 0x7e0   :  { %613 = vadd.xlane.f32.xlu0 %v612_v24 }
 0x84b   :  { %v611_v26 = vpop.xlane.xlu2 %610 }
 0x84c   :  { %v615_v27 = vmul.f32 %v611_v26, %v1644_v22 }
 0x84e   :  { %v617_v31 = vadd.f32 1e-05, %v615_v27 }
 0x850   :  { %1488 = vrsqrt.f32 %v617_v31  ;;  %vm625_vm11 = vweird.f32 %v617_v31 }
 0x853   :  { %v614_v32 = vpop.xlane.xlu0 %613 }
 0x854   :  { %v616_v33 = vmul.f32 %v614_v32, %v1644_v22 }
 0x856   :  { %v1489_v34 = vpop.eup %1488  ;;  %v618_v36 = vadd.f32 1e-05, %v616_v33 }
 0x857   :  { %v620_v37 = vmul.f32 %v1489_v34, %v617_v31  ;;  %vm626_vm10 = vweird.f32 %v1489_v34 }
 0x858   :  { %1490 = vrsqrt.f32 %v618_v36  ;;  %vm627_vm12 = vmor %vm625_vm11, %vm626_vm10  ;;  %vm635_vm14 = vweird.f32 %v618_v36 }
 0x859   :  { %v621_v38 = vmul.f32 %v1489_v34, %v620_v37 }
 0x85b   :  { %v622_v39 = vmul.f32 0.5, %v621_v38 }
 0x85d   :  { %v623_v40 = vsub.f32 1.5, %v622_v39 }
 0x85e   :  { %v1491_v41 = vpop.eup %1490 }
 0x85f   :  { %v624_v42 = vmul.f32 %v1489_v34, %v623_v40  ;;  %v630_v43 = vmul.f32 %v1491_v41, %v618_v36  ;;  %vm636_vm13 = vweird.f32 %v1491_v41 }
 0x860   :  { %vm637_vm15 = vmor %vm635_vm14, %vm636_vm13 }
 0x861   :  { %v631_v44 = vmul.f32 %v1491_v41, %v630_v43  ;;  %v628_v45 = vsel %vm627_vm12, %v1489_v34, %v624_v42 }
 0x862   :  { %v639_v49 = vmul.f32 %v628_v45, %v605_v18 }
 0x863   :  { %v632_v46 = vmul.f32 0.5, %v631_v44 }
 0x864   :  { %v642_v53 = vmul.f32 %v641_v48, %v639_v49  ;;  %v1450_v49 = vld [vmem:[#allocation2 + $0xb8] sm:$0xff] }
 0x865   :  { %v633_v47 = vsub.f32 1.5, %v632_v46 }
 0x866   :  { %v1707_v56 = vadd.f32 %v644_v52, %v642_v53 }
 0x867   :  { %v634_v50 = vmul.f32 %v1491_v41, %v633_v47 }
 0x869   :  { %v638_v51 = vsel %vm637_vm15, %v1491_v41, %v634_v50  ;;  %v1449_v50 = vld [vmem:[#allocation2 + $0xb0] sm:$0xff] }
 0x86a   :  { %v640_v54 = vmul.f32 %v638_v51, %v606_v4 }
 0x86c   :  { %v643_v55 = vmul.f32 %v641_v48, %v640_v54 }
 0x86e   :  { %v1709_v57 = vadd.f32 %v644_v52, %v643_v55 }
 0x870   :  { %v669_v58 = vpack.c.bf16 %v1709_v57, %v1707_v56 }
 0x872   :  { %1354 = vmatmul.msk.bf16.vlgmr.msra.gmra.mxu0 %vm73_vm0, %v669_v58  ;;  %1363 = vmatmul.msk.bf16.vlgmr.msra.gmra.mxu1 %vm73_vm0, %v669_v58 }
 0x873   :  { %1372 = vmatmul.msk.bf16.vlgmr.msra.gmra.mxu2 %vm73_vm0, %v669_v58  ;;  %v863_v58 = vperm.slane %v1719_v3, 3 }
 0x8ef   :  { %v695_v61 = vpop.f32.mrf.mxu0  ;;  %v724_v62 = vpop.f32.mrf.mxu1 }
 0x8f0   :  { %v725_v63 = vadd.f32 %v724_v62, %v702_v59  ;;  %v696_v2 = vadd.f32 %v695_v61, %v670_v60 }
 0x8f2   :  { %v758_v6 = vpack.c.bf16 %v725_v63, %v725_v63  ;;  %v700_v9 = vmul.f32 0.17677669, %v696_v2 }
 0x8f4   :  { %v766_v8 = vsel %vm73_vm0, %v758_v6, 0  ;;  %v756_v16 = vpack.c.bf16 %v700_v9, %v700_v9 }
 0x8f5   :  { %775 = vmatpush.bf16.xpose.msra.mxu3 %v766_v8 }
 0x8f6   :  { %v751_v10 = vpop.f32.mrf.mxu2 }
 0x8f7   :  { %v752_v11 = vadd.f32 %v751_v10, %v729_v7  ;;  %v697_v12 = vpop.f32.mrf.mxu0  ;;  %v726_v13 = vpop.f32.mrf.mxu1 }
 0x8f8   :  { %v727_v14 = vadd.f32 %v726_v13, %v702_v59  ;;  %v698_v17 = vadd.f32 %v697_v12, %v670_v60 }
 0x8f9   :  { %v760_v15 = vpack.c.bf16 %v752_v11, %v752_v11 }
 0x8fa   :  { %v759_v18 = vpack.c.bf16 %v727_v14, %v727_v14  ;;  %v701_v21 = vmul.f32 0.17677669, %v698_v17  ;;  %v1453_v17 = vld [vmem:[#allocation2 + $0xd0] sm:$0xff] }
 0x8fb   :  { %v828_v19 = vsel %vm219_vm2, %v760_v15, 0 }
 0x8fc   :  { %v785_v20 = vsel %vm73_vm0, %v759_v18, 0  ;;  %837 = vmatpush.bf16.msrb.mxu1 %v828_v19  ;;  %1373 = vmatmul.msk.bf16.vlgmr.msra.gmra.mxu3 %vm73_vm0, %v756_v16  ;;  %v757_v24 = vpack.c.bf16 %v701_v21, %v701_v21  ;;  %v1452_v18 = vld [vmem:[#allocation2 + $0xc8] sm:$0xff] }
 0x8fd   :  { %794 = vmatpush.bf16.xpose.msrb.mxu0 %v785_v20  ;;  %885 = vmatpush.bf16.msrb.mxu3 %v1450_v49 }
 0x8fe   :  { %v753_v0 = vpop.f32.mrf.mxu2 }
 0x8ff   :  { %v754_v4 = vadd.f32 %v753_v0, %v729_v7  ;;  %v1451_v0 = vld [vmem:[#allocation2 + $0xc0] sm:$0xff] }
 0x901   :  { %v761_v23 = vpack.c.bf16 %v754_v4, %v754_v4  ;;  %886 = vmatpush.bf16.msrb.mxu3 %v1449_v50 }
 0x903   :  { %v847_v1 = vsel %vm219_vm2, %v761_v23, 0 }
 0x904   :  { %856 = vmatpush.bf16.msrb.mxu2 %v847_v1  ;;  %1374 = vmatmul.msk.bf16.vlgmr.msrb.gmra.mxu0 %vm73_vm0, %v757_v24 }
 0x905   :  { %990 = vmatpush.bf16.msra.mxu0 %v1452_v18 }
 0x909   :  { %991 = vmatpush.bf16.msra.mxu0 %v1451_v0 }
 0x97f   :  { %v777_v25 = vpop.f32.mrf.mxu3 }
 0x980   :  { %v800_v5 = vsel %vm191_vm1, %v777_v25, -inf }
 0x981   :  { %v796_v26 = vpop.f32.mrf.mxu0  ;;  %801 = vmax.xlane.f32.xlu2 %v800_v5 }
 0x982   :  { %v803_v27 = vsel %vm191_vm1, %v796_v26, -inf }
 0x983   :  { %804 = vmax.xlane.f32.xlu1 %v803_v27 }
 0x987   :  { %v779_v28 = vpop.f32.mrf.mxu3 }
 0x989   :  { %v798_v29 = vpop.f32.mrf.mxu0 }
 0x9f4   :  { %v802_v30 = vpop.xlane.xlu2 %801 }
 0x9f5   :  { %v806_v31 = vsub.f32 %v777_v25, %v802_v30 }
 0x9f6   :  { %v805_v32 = vpop.xlane.xlu1 %804 }
 0x9f7   :  { %v808_v33 = vmul.f32 1.442695, %v806_v31  ;;  %v807_v34 = vsub.f32 %v796_v26, %v805_v32 }
 0x9f9   :  { %1492 = vpow2.f32 %v808_v33  ;;  %v810_v36 = vmul.f32 1.442695, %v807_v34 }
 0x9fb   :  { %1494 = vpow2.f32 %v810_v36  ;;  %v939_v36 = vperm.slane %v1719_v3, 4 }
 0x9ff   :  { %v1493_v37 = vpop.eup %1492 }
 0xa00   :  { %v812_v38 = vsel %vm191_vm1, %v1493_v37, 0.0 }
 0xa01   :  { %v1495_v39 = vpop.eup %1494  ;;  %813 = vadd.xlane.f32.xlu1 %v812_v38 }
 0xa02   :  { %v815_v40 = vsel %vm191_vm1, %v1495_v39, 0.0 }
 0xa03   :  { %816 = vadd.xlane.f32.xlu0 %v815_v40  ;;  %v942_v40 = vperm.slane %v1719_v3, 5 }
 0xa74   :  { %v814_v41 = vpop.xlane.xlu1 %813 }
 0xa75   :  { %1496 = vrcp.f32 %v814_v41 }
 0xa76   :  { %v817_v42 = vpop.xlane.xlu0 %816 }
 0xa77   :  { %1498 = vrcp.f32 %v817_v42 }
 0xa7b   :  { %v1497_v43 = vpop.eup %1496 }
 0xa7c   :  { %v820_v44 = vmul.f32 %v1497_v43, %v1493_v37 }
 0xa7d   :  { %v1499_v45 = vpop.eup %1498 }
 0xa7e   :  { %v822_v46 = vpack.c.bf16 %v820_v44, %v820_v44  ;;  %v821_v47 = vmul.f32 %v1499_v45, %v1495_v39 }
 0xa80   :  { %v823_v48 = vpack.c.bf16 %v821_v47, %v821_v47  ;;  %1375 = vmatmul.msk.bf16.vlgmr.msrb.gmra.mxu1 %vm191_vm1, %v822_v46  ;;  %v1762_v47 = vld [vmem:[%s1803_s3 + $0x18] sm:$0x3f]  ;;  %s1572_s3 = smov [#allocation5]  }
 0xa81   :  { %s1249_s9 = sshll.u32 %s1572_s3, 4  ;;  %s1250_s9 = int_to_ptr.vmem [resolvable:$true] %s1249_s9 }
 0xa82   :  { %1376 = vmatmul.msk.bf16.vlgmr.msrb.gmra.mxu2 %vm191_vm1, %v823_v48  ;;  %v1000_v48 = vperm.slane %v1762_v47, 1 }
 0xafd   :  { %v839_v51 = vpop.f32.mrf.mxu1 }
 0xb05   :  { %v841_v52 = vpop.f32.mrf.mxu1  ;;  %v858_v53 = vpop.f32.mrf.mxu2 }
 0xb06   :  { %v862_v54 = vpack.c.bf16 %v858_v53, %v839_v51 }
 0xb08   :  { %1385 = vmatmul.msk.bf16.vlgmr.msrb.gmra.mxu3 %vm73_vm0, %v862_v54 }
 0xb0d   :  { %v860_v55 = vpop.f32.mrf.mxu2 }
 0xb8b   :  { %v888_v59 = vpop.f32.mrf.mxu3 }
 0xb8c   :  { %v889_v60 = vadd.f32 %v888_v59, %v863_v58 }
 0xb8e   :  { %v893_v61 = vadd.f32 %v889_v60, %v1707_v56 }
 0xb90   :  { %v895_v62 = vsel %vm73_vm0, %v893_v61, 0.0 }
 0xb91   :  { %896 = vadd.xlane.f32.xlu2 %v895_v62 }
 0xb93   :  { %v890_v63 = vpop.f32.mrf.mxu3 }
 0xb94   :  { %v891_v2 = vadd.f32 %v890_v63, %v863_v58  ;;  %v968_v58 = vperm.slane %v1762_v47, 0 }
 0xb96   :  { %v894_v6 = vadd.f32 %v891_v2, %v1709_v57  ;;  %v1454_v57 = vld [vmem:[#allocation2 + $0xd8] sm:$0xff] }
 0xb97   :  { %1019 = vmatpush.bf16.msra.mxu1 %v1454_v57 }
 0xb98   :  { %v898_v7 = vsel %vm73_vm0, %v894_v6, 0.0 }
 0xb99   :  { %899 = vadd.xlane.f32.xlu0 %v898_v7 }
 0xb9b   :  { %1020 = vmatpush.bf16.msra.mxu1 %v1453_v17 }
 0xb9e   :  { %1404 = vmatmul.msk.bf16.vlgmr.msra.gmra.mxu1 %vm73_vm0, %v1656_v35 }
 0xc04   :  { %v897_v8 = vpop.xlane.xlu2 %896 }
 0xc05   :  { %v901_v9 = vmul.f32 %v897_v8, %v1644_v22  ;;  %v1456_v8 = vld [vmem:[#allocation2 + $0xe8] sm:$0xff] }
 0xc06   :  { %1046 = vmatpush.bf16.msra.mxu2 %v1456_v8 }
 0xc07   :  { %v903_v10 = vsub.f32 %v893_v61, %v901_v9  ;;  %v1455_v9 = vld [vmem:[#allocation2 + $0xe0] sm:$0xff] }
 0xc09   :  { %v905_v11 = vmul.f32 %v903_v10, %v903_v10 }
 0xc0a   :  { %1047 = vmatpush.bf16.msra.mxu2 %v1455_v9 }
 0xc0b   :  { %v907_v12 = vsel %vm73_vm0, %v905_v11, 0.0 }
 0xc0c   :  { %v900_v13 = vpop.xlane.xlu0 %899  ;;  %908 = vadd.xlane.f32.xlu1 %v907_v12 }
 0xc0d   :  { %v902_v56 = vmul.f32 %v900_v13, %v1644_v22  ;;  %1413 = vmatmul.msk.bf16.vlgmr.msra.gmra.mxu2 %vm73_vm0, %v1656_v35 }
 0xc0f   :  { %v904_v14 = vsub.f32 %v894_v6, %v902_v56 }
 0xc11   :  { %v906_v15 = vmul.f32 %v904_v14, %v904_v14 }
 0xc13   :  { %v910_v16 = vsel %vm73_vm0, %v906_v15, 0.0  ;;  %v1027_v15 = vperm.slane %v1762_v47, 2 }
 0xc14   :  { %911 = vadd.xlane.f32.xlu2 %v910_v16 }
 0xc1b   :  { %v1022_v3 = vpop.f32.mrf.mxu1 }
 0xc1c   :  { %v1023_v49 = vadd.f32 %v1022_v3, %v1000_v48 }
 0xc1e   :  { %v1056_v50 = vpack.c.bf16 %v1023_v49, %v1023_v49 }
 0xc20   :  { %v1064_v51 = vsel %vm73_vm0, %v1056_v50, 0 }
 0xc21   :  { %1073 = vmatpush.bf16.xpose.msra.mxu3 %v1064_v51 }
 0xc23   :  { %v1024_v52 = vpop.f32.mrf.mxu1 }
 0xc24   :  { %v1025_v53 = vadd.f32 %v1024_v52, %v1000_v48  ;;  %v1161_v48 = vperm.slane %v1762_v47, 3 }
 0xc26   :  { %v1057_v54 = vpack.c.bf16 %v1025_v53, %v1025_v53 }
 0xc28   :  { %v1083_v55 = vsel %vm73_vm0, %v1057_v54, 0 }
 0xc29   :  { %1092 = vmatpush.bf16.xpose.msrb.mxu0 %v1083_v55 }
 0xc7f   :  { %v909_v19 = vpop.xlane.xlu1 %908 }
 0xc80   :  { %v913_v20 = vmul.f32 %v909_v19, %v1644_v22 }
 0xc82   :  { %v915_v21 = vadd.f32 1e-05, %v913_v20 }
 0xc84   :  { %1500 = vrsqrt.f32 %v915_v21  ;;  %vm923_vm4 = vweird.f32 %v915_v21 }
 0xc87   :  { %v912_v4 = vpop.xlane.xlu2 %911 }
 0xc88   :  { %v914_v23 = vmul.f32 %v912_v4, %v1644_v22 }
 0xc8a   :  { %v1501_v24 = vpop.eup %1500  ;;  %v916_v1 = vadd.f32 1e-05, %v914_v23 }
 0xc8b   :  { %v918_v25 = vmul.f32 %v1501_v24, %v915_v21  ;;  %vm924_vm3 = vweird.f32 %v1501_v24 }
 0xc8c   :  { %1502 = vrsqrt.f32 %v916_v1  ;;  %vm925_vm5 = vmor %vm923_vm4, %vm924_vm3  ;;  %vm933_vm7 = vweird.f32 %v916_v1 }
 0xc8d   :  { %v919_v5 = vmul.f32 %v1501_v24, %v918_v25 }
 0xc8f   :  { %v920_v26 = vmul.f32 0.5, %v919_v5 }
 0xc90   :  { %v1049_v17 = vpop.f32.mrf.mxu2 }
 0xc91   :  { %v921_v27 = vsub.f32 1.5, %v920_v26  ;;  %v1050_v19 = vadd.f32 %v1049_v17, %v1027_v15 }
 0xc92   :  { %v1503_v28 = vpop.eup %1502 }
 0xc93   :  { %v922_v29 = vmul.f32 %v1501_v24, %v921_v27  ;;  %v928_v30 = vmul.f32 %v1503_v28, %v916_v1  ;;  %vm934_vm6 = vweird.f32 %v1503_v28  ;;  %v1058_v35 = vpack.c.bf16 %v1050_v19, %v1050_v19 }
 0xc94   :  { %vm935_vm8 = vmor %vm933_vm7, %vm934_vm6  ;;  %v1237_v19 = vperm.slane %v1762_v47, 4 }
 0xc95   :  { %v929_v31 = vmul.f32 %v1503_v28, %v928_v30  ;;  %v926_v32 = vsel %vm925_vm5, %v1501_v24, %v922_v29  ;;  %v1126_v4 = vsel %vm219_vm2, %v1058_v35, 0  ;;  %v1240_v35 = vperm.slane %v1762_v47, 5 }
 0xc96   :  { %v937_v37 = vmul.f32 %v926_v32, %v903_v10  ;;  %1135 = vmatpush.bf16.msrb.mxu1 %v1126_v4 }
 0xc97   :  { %v930_v33 = vmul.f32 0.5, %v929_v31 }
 0xc98   :  { %v940_v41 = vmul.f32 %v939_v36, %v937_v37  ;;  %v1051_v23 = vpop.f32.mrf.mxu2 }
 0xc99   :  { %v931_v34 = vsub.f32 1.5, %v930_v33  ;;  %v1052_v24 = vadd.f32 %v1051_v23, %v1027_v15 }
 0xc9a   :  { %v1752_v44 = vadd.f32 %v942_v40, %v940_v41 }
 0xc9b   :  { %v932_v38 = vmul.f32 %v1503_v28, %v931_v34  ;;  %v1059_v5 = vpack.c.bf16 %v1052_v24, %v1052_v24 }
 0xc9d   :  { %v936_v39 = vsel %vm935_vm8, %v1503_v28, %v932_v38  ;;  %v1145_v28 = vsel %vm219_vm2, %v1059_v5, 0  ;;  %v1458_v38 = vld [vmem:[#allocation2 + $0xf8] sm:$0xff] }
 0xc9e   :  { %v938_v42 = vmul.f32 %v936_v39, %v904_v14  ;;  %1154 = vmatpush.bf16.msrb.mxu2 %v1145_v28  ;;  %1183 = vmatpush.bf16.msrb.mxu3 %v1458_v38  ;;  %v1457_v39 = vld [vmem:[#allocation2 + $0xf0] sm:$0xff] }
 0xca0   :  { %v941_v43 = vmul.f32 %v939_v36, %v938_v42 }
 0xca2   :  { %v1754_v45 = vadd.f32 %v942_v40, %v941_v43  ;;  %1184 = vmatpush.bf16.msrb.mxu3 %v1457_v39 }
 0xca4   :  { %v967_v46 = vpack.c.bf16 %v1754_v45, %v1752_v44 }
 0xca6   :  { %1395 = vmatmul.msk.bf16.vlgmr.msra.gmra.mxu0 %vm73_vm0, %v967_v46 }
 0xd23   :  { %v993_v59 = vpop.f32.mrf.mxu0 }
 0xd24   :  { %v994_v60 = vadd.f32 %v993_v59, %v968_v58 }
 0xd26   :  { %v998_v61 = vmul.f32 0.17677669, %v994_v60 }
 0xd28   :  { %v1054_v62 = vpack.c.bf16 %v998_v61, %v998_v61 }
 0xd2a   :  { %1414 = vmatmul.msk.bf16.vlgmr.msra.gmra.mxu3 %vm73_vm0, %v1054_v62 }
 0xd2b   :  { %v995_v63 = vpop.f32.mrf.mxu0 }
 0xd2c   :  { %v996_v2 = vadd.f32 %v995_v63, %v968_v58 }
 0xd2e   :  { %v999_v6 = vmul.f32 0.17677669, %v996_v2 }
 0xd30   :  { %v1055_v7 = vpack.c.bf16 %v999_v6, %v999_v6 }
 0xd32   :  { %1415 = vmatmul.msk.bf16.vlgmr.msrb.gmra.mxu0 %vm73_vm0, %v1055_v7 }
 0xdad   :  { %v1075_v10 = vpop.f32.mrf.mxu3 }
 0xdae   :  { %v1098_v11 = vsel %vm191_vm1, %v1075_v10, -inf }
 0xdaf   :  { %v1094_v12 = vpop.f32.mrf.mxu0  ;;  %1099 = vmax.xlane.f32.xlu1 %v1098_v11 }
 0xdb0   :  { %v1101_v13 = vsel %vm191_vm1, %v1094_v12, -inf }
 0xdb1   :  { %1102 = vmax.xlane.f32.xlu0 %v1101_v13 }
 0xdb5   :  { %v1077_v56 = vpop.f32.mrf.mxu3 }
 0xdb7   :  { %v1096_v14 = vpop.f32.mrf.mxu0 }
 0xe22   :  { %v1100_v16 = vpop.xlane.xlu1 %1099 }
 0xe23   :  { %v1104_v57 = vsub.f32 %v1075_v10, %v1100_v16 }
 0xe24   :  { %v1103_v18 = vpop.xlane.xlu0 %1102 }
 0xe25   :  { %v1106_v20 = vmul.f32 1.442695, %v1104_v57  ;;  %v1105_v21 = vsub.f32 %v1094_v12, %v1103_v18 }
 0xe27   :  { %1504 = vpow2.f32 %v1106_v20  ;;  %v1108_v0 = vmul.f32 1.442695, %v1105_v21 }
 0xe29   :  { %1506 = vpow2.f32 %v1108_v0 }
 0xe2d   :  { %v1505_v1 = vpop.eup %1504 }
 0xe2e   :  { %v1110_v25 = vsel %vm191_vm1, %v1505_v1, 0.0 }
 0xe2f   :  { %v1507_v26 = vpop.eup %1506  ;;  %1111 = vadd.xlane.f32.xlu0 %v1110_v25 }
 0xe30   :  { %v1113_v27 = vsel %vm191_vm1, %v1507_v26, 0.0 }
 0xe31   :  { %1114 = vadd.xlane.f32.xlu2 %v1113_v27 }
 0xea2   :  { %v1112_v29 = vpop.xlane.xlu0 %1111 }
 0xea3   :  { %1508 = vrcp.f32 %v1112_v29 }
 0xea4   :  { %v1115_v30 = vpop.xlane.xlu2 %1114 }
 0xea5   :  { %1510 = vrcp.f32 %v1115_v30 }
 0xea9   :  { %v1509_v31 = vpop.eup %1508 }
 0xeaa   :  { %v1118_v32 = vmul.f32 %v1509_v31, %v1505_v1 }
 0xeab   :  { %v1511_v33 = vpop.eup %1510 }
 0xeac   :  { %v1120_v34 = vpack.c.bf16 %v1118_v32, %v1118_v32  ;;  %v1119_v36 = vmul.f32 %v1511_v33, %v1507_v26 }
 0xeae   :  { %v1121_v37 = vpack.c.bf16 %v1119_v36, %v1119_v36  ;;  %1416 = vmatmul.msk.bf16.vlgmr.msrb.gmra.mxu1 %vm191_vm1, %v1120_v34 }
 0xeb0   :  { %1417 = vmatmul.msk.bf16.vlgmr.msrb.gmra.mxu2 %vm191_vm1, %v1121_v37 }
 0xf2b   :  { %v1137_v40 = vpop.f32.mrf.mxu1 }
 0xf33   :  { %v1139_v41 = vpop.f32.mrf.mxu1  ;;  %v1156_v42 = vpop.f32.mrf.mxu2 }
 0xf34   :  { %v1160_v43 = vpack.c.bf16 %v1156_v42, %v1137_v40 }
 0xf36   :  { %1426 = vmatmul.msk.bf16.vlgmr.msrb.gmra.mxu3 %vm73_vm0, %v1160_v43 }
 0xf3b   :  { %v1158_v46 = vpop.f32.mrf.mxu2 }
 0xfb9   :  { %v1186_v3 = vpop.f32.mrf.mxu3 }
 0xfba   :  { %v1187_v49 = vadd.f32 %v1186_v3, %v1161_v48 }
 0xfbc   :  { %v1191_v50 = vadd.f32 %v1187_v49, %v1752_v44 }
 0xfbe   :  { %v1193_v51 = vsel %vm73_vm0, %v1191_v50, 0.0 }
 0xfbf   :  { %1194 = vadd.xlane.f32.xlu1 %v1193_v51 }
 0xfc1   :  { %v1188_v52 = vpop.f32.mrf.mxu3 }
 0xfc2   :  { %v1189_v53 = vadd.f32 %v1188_v52, %v1161_v48 }
 0xfc4   :  { %v1192_v54 = vadd.f32 %v1189_v53, %v1754_v45 }
 0xfc6   :  { %v1196_v55 = vsel %vm73_vm0, %v1192_v54, 0.0 }
 0xfc7   :  { %1197 = vadd.xlane.f32.xlu2 %v1196_v55 }
0x1032   :  { %v1195_v58 = vpop.xlane.xlu1 %1194 }
0x1033   :  { %v1199_v59 = vmul.f32 %v1195_v58, %v1644_v22 }
0x1035   :  { %v1201_v60 = vsub.f32 %v1191_v50, %v1199_v59 }
0x1037   :  { %v1203_v61 = vmul.f32 %v1201_v60, %v1201_v60 }
0x1039   :  { %v1205_v62 = vsel %vm73_vm0, %v1203_v61, 0.0 }
0x103a   :  { %v1198_v63 = vpop.xlane.xlu2 %1197  ;;  %1206 = vadd.xlane.f32.xlu0 %v1205_v62 }
0x103b   :  { %v1200_v44 = vmul.f32 %v1198_v63, %v1644_v22 }
0x103d   :  { %v1202_v2 = vsub.f32 %v1192_v54, %v1200_v44 }
0x103f   :  { %v1204_v6 = vmul.f32 %v1202_v2, %v1202_v2 }
0x1041   :  { %v1208_v7 = vsel %vm73_vm0, %v1204_v6, 0.0 }
0x1042   :  { %1209 = vadd.xlane.f32.xlu1 %v1208_v7 }
0x10ad   :  { %v1207_v45 = vpop.xlane.xlu0 %1206 }
0x10ae   :  { %v1211_v8 = vmul.f32 %v1207_v45, %v1644_v22 }
0x10b0   :  { %v1213_v9 = vadd.f32 1e-05, %v1211_v8 }
0x10b2   :  { %1512 = vrsqrt.f32 %v1213_v9  ;;  %vm1221_vm2 = vweird.f32 %v1213_v9 }
0x10b5   :  { %v1210_v10 = vpop.xlane.xlu1 %1209 }
0x10b6   :  { %v1212_v11 = vmul.f32 %v1210_v10, %v1644_v22 }
0x10b8   :  { %v1513_v12 = vpop.eup %1512  ;;  %v1214_v13 = vadd.f32 1e-05, %v1212_v11 }
0x10b9   :  { %v1216_v56 = vmul.f32 %v1513_v12, %v1213_v9  ;;  %vm1222_vm1 = vweird.f32 %v1513_v12 }
0x10ba   :  { %1514 = vrsqrt.f32 %v1214_v13  ;;  %vm1223_vm9 = vmor %vm1221_vm2, %vm1222_vm1  ;;  %vm1231_vm11 = vweird.f32 %v1214_v13 }
0x10bb   :  { %v1217_v14 = vmul.f32 %v1513_v12, %v1216_v56 }
0x10bd   :  { %v1218_v15 = vmul.f32 0.5, %v1217_v14 }
0x10bf   :  { %v1219_v16 = vsub.f32 1.5, %v1218_v15 }
0x10c0   :  { %v1515_v57 = vpop.eup %1514 }
0x10c1   :  { %v1220_v17 = vmul.f32 %v1513_v12, %v1219_v16  ;;  %v1226_v18 = vmul.f32 %v1515_v57, %v1214_v13  ;;  %vm1232_vm10 = vweird.f32 %v1515_v57 }
0x10c2   :  { %vm1233_vm12 = vmor %vm1231_vm11, %vm1232_vm10 }
0x10c3   :  { %v1224_v20 = vsel %vm1223_vm9, %v1513_v12, %v1220_v17  ;;  %v1227_v21 = vmul.f32 %v1515_v57, %v1226_v18 }
0x10c4   :  { %v1235_v22 = vmul.f32 %v1224_v20, %v1201_v60 }
0x10c5   :  { %v1228_v0 = vmul.f32 0.5, %v1227_v21 }
0x10c6   :  { %v1238_v4 = vmul.f32 %v1237_v19, %v1235_v22 }
0x10c7   :  { %v1229_v23 = vsub.f32 1.5, %v1228_v0 }
0x10c8   :  { %v1241_v24 = vadd.f32 %v1240_v35, %v1238_v4 }
0x10c9   :  { %v1230_v1 = vmul.f32 %v1515_v57, %v1229_v23 }
0x10ca   :  { %1243 = vst.msk [vmem:[#allocation5] sm:$0xff] %vm73_vm0, %v1241_v24 }
0x10cb   :  { %v1234_v25 = vsel %vm1233_vm12, %v1515_v57, %v1230_v1 }
0x10cc   :  { %v1236_v5 = vmul.f32 %v1234_v25, %v1202_v2 }
0x10ce   :  { %v1239_v47 = vmul.f32 %v1237_v19, %v1236_v5 }
0x10d0   :  { %v1242_v26 = vadd.f32 %v1240_v35, %v1239_v47 }
0x10d2   :  { %1244 = vst.msk [vmem:[#allocation5 + $0x8] sm:$0xff] %vm73_vm0, %v1242_v26 }
0x10d3   :  { %1257 = dma.vmem_to_hbm [thread:$0]  %s1250_s9, 256, %s1252_s12, [#allocation4], %s1573_s13, %s1573_s13, %s1574_s14  }
0x10d4   :  { %1566 = dma.done.wait [#allocation4], 256  }
0x10d5   :  { %1567 = vsyncadd [#allocation4], 4294967040 }
0x10d6   :  { %1262 = vsyncpa [#allocation3], 1 }
0x10d7   :  { %1263 = vsyncpa [#allocation4], 1 }

</bundles_post_ra>
